<compile_context>
chip_gen: v7x
topology: tpu7x:2x2x1
jax: 0.10.0
libtpu: 0.0.40
codegen_flags: <defaults>
</compile_context>

<pallas_src>
import jax
import jax.numpy as jnp
from jax.experimental import pallas as pl
from jax.experimental.pallas import tpu as pltpu

K = 3          # conv kernel size
EPS = 1e-5     # InstanceNorm1d eps (PyTorch default, affine=False)
N_BLOCKS = 6


# ---------------------------------------------------------------------------
# Fused 6-block kernel
# ---------------------------------------------------------------------------

def _instance_norm(v, inv_l):
    """v: (B, L, C) f32; normalize over L per (batch, channel); biased variance."""
    s = jnp.sum(v, axis=1, keepdims=True)
    s2 = jnp.sum(v * v, axis=1, keepdims=True)
    mean = s * inv_l
    var = jnp.maximum(s2 * inv_l - mean * mean, 0.0)
    return (v - mean) * jax.lax.rsqrt(var + EPS)


def _conv_k3_left_pad(x_f32, w_bf16, b_f32):
    """Kernel-3, stride-1 Conv1d with left replication padding (2, 0), as one MXU dot.

    x_f32:  (B, L, Cin) f32
    w_bf16: (K*Cin, Cout) bf16, tap-major rows (row = k*Cin + c)
    b_f32:  (1, Cout) f32
    returns (B, L, Cout) f32
    """
    B, L, cin = x_f32.shape
    cout = w_bf16.shape[1]
    xb = x_f32.astype(jnp.bfloat16)                                  # cast once (hoisted)
    xp = jnp.concatenate(
        [jnp.broadcast_to(xb[:, 0:1, :], (B, K - 1, cin)), xb], axis=1)   # (B, L+2, Cin)
    # im2col: lane-concat the three shifted taps -> (B, L, 3*Cin)
    cols = jnp.concatenate([xp[:, k:k + L, :] for k in range(K)], axis=2)
    out = jnp.dot(cols.reshape(B * L, K * cin), w_bf16,
                  preferred_element_type=jnp.float32)                # one deep contraction
    return out.reshape(B, L, cout) + b_f32


def _res6_kernel(x_ref, w1_ref, b1_ref, w2_ref, b2_ref, o_ref):
    blk = pl.program_id(1)
    B, L, C = o_ref.shape
    cmid = 2 * C                                   # 512
    inv_l = 1.0 / L                                # static

    # The resident output block is the cross-block activation carry.
    @pl.when(blk == 0)
    def _():
        o_ref[...] = x_ref[...]

    x = o_ref[...]                                 # (B, L, 256) f32

    # conv1 + conv_gate (Cout concatenated -> 1024) + bias + InstanceNorm + GLU.
    # (Per-channel InstanceNorm on the concatenation == separate norms on each half.)
    h = _instance_norm(_conv_k3_left_pad(x, w1_ref[0], b1_ref[0]), inv_l)   # (B, L, 1024)
    y = h[:, :, :cmid] * jax.nn.sigmoid(h[:, :, cmid:])                     # GLU -> (B, L, 512)

    # conv2 + bias + InstanceNorm + residual add; result becomes next block's input.
    o_ref[...] = x + _instance_norm(_conv_k3_left_pad(y, w2_ref[0], b2_ref[0]), inv_l)


def _pick_b_tile(n, l, target_m=256, max_m=1024):
    """Batch elements per grid step: push M = bt*L toward target_m, divisor of n."""
    bt = max(1, min(n, -(-target_m // l), max(1, max_m // l)))
    while n % bt:
        bt -= 1
    return bt


def _vmem_limit_bytes():
    try:
        cap = pltpu.get_tpu_info().vmem_capacity_bytes
    except Exception:
        cap = 64 * 1024 * 1024          # conservative (v7x-sized) fallback
    return max(32 * 1024 * 1024, min(int(cap * 3 // 4), 112 * 1024 * 1024))


def res6block_forward(kparams, x_ncl):
    """kparams: dict of stacked per-block weights (see prep_kernel_params).
       x_ncl: (N, 256, L) f32. Returns (N, 256, L) f32."""
    x = jnp.transpose(x_ncl, (0, 2, 1)).astype(jnp.float32)          # channels-last
    N, L, C = x.shape
    bt = _pick_b_tile(N, L)
    nb = kparams["w1"].shape[0]

    out = pl.pallas_call(
        _res6_kernel,
        out_shape=jax.ShapeDtypeStruct((N, L, C), jnp.float32),
        grid_spec=pltpu.PrefetchScalarGridSpec(
            num_scalar_prefetch=0,
            grid=(N // bt, nb),                                      # (batch tiles, blocks)
            in_specs=[
                pl.BlockSpec((bt, L, C), lambda n, b: (n, 0, 0)),
                pl.BlockSpec((1,) + kparams["w1"].shape[1:], lambda n, b: (b, 0, 0)),
                pl.BlockSpec((1,) + kparams["b1"].shape[1:], lambda n, b: (b, 0, 0)),
                pl.BlockSpec((1,) + kparams["w2"].shape[1:], lambda n, b: (b, 0, 0)),
                pl.BlockSpec((1,) + kparams["b2"].shape[1:], lambda n, b: (b, 0, 0)),
            ],
            out_specs=pl.BlockSpec((bt, L, C), lambda n, b: (n, 0, 0)),
        ),
        compiler_params=pltpu.CompilerParams(
            dimension_semantics=("parallel", "arbitrary"),
            vmem_limit_bytes=_vmem_limit_bytes(),
        ),
    )(x, kparams["w1"], kparams["b1"], kparams["w2"], kparams["b2"])
    return jnp.transpose(out, (0, 2, 1))


# ---------------------------------------------------------------------------
# Parameter init (PyTorch Conv1d-style uniform) and kernel-layout preparation
# ---------------------------------------------------------------------------

def _init_conv(key, cout, cin, k):
    k1, k2 = jax.random.split(key)
    bound = 1.0 / (cin * k) ** 0.5
    w = jax.random.uniform(k1, (cout, cin, k), jnp.float32, -bound, bound)
    b = jax.random.uniform(k2, (cout,), jnp.float32, -bound, bound)
    return w, b


def init_torch_params(key, n_blocks=N_BLOCKS):
    params = []
    keys = jax.random.split(key, 3 * n_blocks)
    for i in range(n_blocks):
        w1, b1 = _init_conv(keys[3 * i + 0], 512, 256, K)        # conv1
        wg1, bg1 = _init_conv(keys[3 * i + 1], 512, 256, K)      # conv_gate_1
        w2, b2 = _init_conv(keys[3 * i + 2], 256, 512, K)        # conv2
        params.append(dict(w1=w1, b1=b1, wg1=wg1, bg1=bg1, w2=w2, b2=b2))
    return params


def prep_kernel_params(torch_params):
    """Torch layout (Cout, Cin, K) -> stacked im2col (n_blocks, K*Cin, Cout) bf16."""
    w1s, b1s, w2s, b2s = [], [], [], []
    for p in torch_params:
        w1cat = jnp.concatenate([p["w1"], p["wg1"]], axis=0)                 # (1024, 256, 3)
        w1s.append(jnp.transpose(w1cat, (2, 1, 0)).reshape(K * 256, 1024))   # (768, 1024)
        b1s.append(jnp.concatenate([p["b1"], p["bg1"]]).reshape(1, -1))      # (1, 1024)
        w2s.append(jnp.transpose(p["w2"], (2, 1, 0)).reshape(K * 512, 256))  # (1536, 256)
        b2s.append(p["b2"].reshape(1, -1))                                   # (1, 256)
    return dict(
        w1=jnp.stack(w1s).astype(jnp.bfloat16),   # (6, 768, 1024)
        b1=jnp.stack(b1s),                        # (6, 1, 1024) f32
        w2=jnp.stack(w2s).astype(jnp.bfloat16),   # (6, 1536, 256)
        b2=jnp.stack(b2s),                        # (6, 1, 256) f32
    )


# ---------------------------------------------------------------------------
# Pure-JAX float32 reference (for correctness check)
# ---------------------------------------------------------------------------

def _conv1d_ref(x, w, b):
    # x: (N, L, Cin); w: (Cout, Cin, K) torch layout; left replication pad K-1; stride 1.
    N, L, cin = x.shape
    cout, _, k = w.shape
    xp = jnp.concatenate([jnp.broadcast_to(x[:, :1, :], (N, k - 1, cin)), x], axis=1)
    out = jnp.broadcast_to(b[None, None, :], (N, L, cout))
    for t in range(k):
        out = out + jnp.einsum("nlc,cd->nld", xp[:, t:t + L, :], w[:, :, t].T,
                               precision=jax.lax.Precision.HIGHEST)
    return out


def _inorm_ref(x, eps=EPS):
    mean = jnp.mean(x, axis=1, keepdims=True)
    var = jnp.mean((x - mean) ** 2, axis=1, keepdims=True)
    return (x - mean) * jax.lax.rsqrt(var + eps)


def res6block_reference(torch_params, x_ncl):
    x = jnp.transpose(x_ncl, (0, 2, 1)).astype(jnp.float32)
    for p in torch_params:
        a = _inorm_ref(_conv1d_ref(x, p["w1"], p["b1"]))
        g = _inorm_ref(_conv1d_ref(x, p["wg1"], p["bg1"]))
        y = a * jax.nn.sigmoid(g)
        y = _inorm_ref(_conv1d_ref(y, p["w2"], p["b2"]))
        x = x + y
    return jnp.transpose(x, (0, 2, 1))


# ---------------------------------------------------------------------------
# Main
# ---------------------------------------------------------------------------

if __name__ == "__main__":
    key = jax.random.PRNGKey(0)
    k_x, k_p = jax.random.split(key)

    N, C, L = 2, 256, 16                       # module requires 256 channels; small N, L
    x = jax.random.normal(k_x, (N, C, L), jnp.float32)

    torch_params = init_torch_params(k_p)
    kparams = prep_kernel_params(torch_params)

    fwd = jax.jit(res6block_forward)
    out = jax.block_until_ready(fwd(kparams, x))

    assert out.shape == (N, C, L), out.shape
    assert bool(jnp.all(jnp.isfinite(out)))

    # Correctness vs. a pure-JAX f32 reference (loose tolerance: the kernel's matmuls
    # run in bfloat16 on the MXU).
    ref = res6block_reference(torch_params, x)
    rel_rms = float(jnp.sqrt(jnp.mean((out - ref) ** 2) / jnp.mean(ref ** 2)))
    assert rel_rms < 0.1, f"relative RMS error vs reference too large: {rel_rms}"

    print("KERNEL_OK")
</pallas_src>

<mosaic_0001>
module attributes {stable_mosaic.version = 11 : i64} {
  func.func @_res6_kernel(%arg0: i32, %arg1: i32, %arg2: memref<2x16x256xf32, #tpu.memory_space<vmem>>, %arg3: memref<1x768x1024xbf16, #tpu.memory_space<vmem>>, %arg4: memref<1x1x1024xf32, #tpu.memory_space<vmem>>, %arg5: memref<1x1536x256xbf16, #tpu.memory_space<vmem>>, %arg6: memref<1x1x256xf32, #tpu.memory_space<vmem>>, %arg7: memref<2x16x256xf32, #tpu.memory_space<vmem>>) attributes {dimension_semantics = [#tpu.dimension_semantics<parallel>, #tpu.dimension_semantics<arbitrary>], iteration_bounds = array<i64: 1, 6>, scalar_prefetch = 0 : i64, scratch_operands = 0 : i64, tpu.core_type = #tpu.core_type<tc>, window_params = [{transform_indices = @transform_0, window_bounds = array<i64: 2, 16, 256>}, {transform_indices = @transform_1, window_bounds = array<i64: 1, 768, 1024>}, {transform_indices = @transform_2, window_bounds = array<i64: 1, 1, 1024>}, {transform_indices = @transform_3, window_bounds = array<i64: 1, 1536, 256>}, {transform_indices = @transform_4, window_bounds = array<i64: 1, 1, 256>}, {transform_indices = @transform_5, window_bounds = array<i64: 2, 16, 256>}]} {
    %c0_i32 = arith.constant 0 : i32
    %0 = arith.cmpi eq, %arg1, %c0_i32 : i32
    %1 = arith.extui %0 : i1 to i32
    %c0_i32_0 = arith.constant 0 : i32
    %2 = arith.cmpi ne, %1, %c0_i32_0 : i32
    scf.if %2 {
      %c0_32 = arith.constant 0 : index
      %c0_33 = arith.constant 0 : index
      %c0_34 = arith.constant 0 : index
      %92 = vector.load %arg2[%c0_32, %c0_33, %c0_34] : memref<2x16x256xf32, #tpu.memory_space<vmem>>, vector<2x16x256xf32>
      %c0_35 = arith.constant 0 : index
      %c0_36 = arith.constant 0 : index
      %c0_37 = arith.constant 0 : index
      %93 = vector.load %arg7[%c0_35, %c0_36, %c0_37] : memref<2x16x256xf32, #tpu.memory_space<vmem>>, vector<2x16x256xf32>
      tpu.vector_store %arg7[%c0_35, %c0_36, %c0_37], %92 {strides = array<i32>} : memref<2x16x256xf32, #tpu.memory_space<vmem>>, vector<2x16x256xf32>,
    } else {
    }
    %c0 = arith.constant 0 : index
    %c0_1 = arith.constant 0 : index
    %c0_2 = arith.constant 0 : index
    %3 = vector.load %arg7[%c0, %c0_1, %c0_2] : memref<2x16x256xf32, #tpu.memory_space<vmem>>, vector<2x16x256xf32>
    %c0_3 = arith.constant 0 : index
    %c0_4 = arith.constant 0 : index
    %c0_5 = arith.constant 0 : index
    %4 = vector.load %arg3[%c0_3, %c0_4, %c0_5] : memref<1x768x1024xbf16, #tpu.memory_space<vmem>>, vector<1x768x1024xbf16>
    %5 = vector.shape_cast %4 : vector<1x768x1024xbf16> to vector<768x1024xbf16>
    %c0_6 = arith.constant 0 : index
    %c0_7 = arith.constant 0 : index
    %c0_8 = arith.constant 0 : index
    %6 = vector.load %arg4[%c0_6, %c0_7, %c0_8] : memref<1x1x1024xf32, #tpu.memory_space<vmem>>, vector<1x1x1024xf32>
    %7 = vector.shape_cast %6 : vector<1x1x1024xf32> to vector<1x1024xf32>
    %8 = arith.truncf %3 : vector<2x16x256xf32> to vector<2x16x256xbf16>
    %9 = vector.extract_strided_slice %8 {offsets = [0, 0, 0], sizes = [2, 1, 256], strides = [1, 1, 1]} : vector<2x16x256xbf16> to vector<2x1x256xbf16>
    %10 = vector.shape_cast %9 : vector<2x1x256xbf16> to vector<2x1x256xbf16>
    %11 = vector.broadcast %10 : vector<2x1x256xbf16> to vector<2x2x256xbf16>
    %12 = tpu.concatenate %11, %8 in 1 : vector<2x2x256xbf16>, vector<2x16x256xbf16> -> vector<2x18x256xbf16>
    %13 = vector.extract_strided_slice %12 {offsets = [0, 0, 0], sizes = [2, 16, 256], strides = [1, 1, 1]} : vector<2x18x256xbf16> to vector<2x16x256xbf16>
    %14 = vector.extract_strided_slice %12 {offsets = [0, 1, 0], sizes = [2, 16, 256], strides = [1, 1, 1]} : vector<2x18x256xbf16> to vector<2x16x256xbf16>
    %15 = vector.extract_strided_slice %12 {offsets = [0, 2, 0], sizes = [2, 16, 256], strides = [1, 1, 1]} : vector<2x18x256xbf16> to vector<2x16x256xbf16>
    %16 = tpu.concatenate %13, %14, %15 in 2 : vector<2x16x256xbf16>, vector<2x16x256xbf16>, vector<2x16x256xbf16> -> vector<2x16x768xbf16>
    %17 = vector.shape_cast %16 : vector<2x16x768xbf16> to vector<32x768xbf16>
    %cst = arith.constant dense<0.000000e+00> : vector<32x1024xf32>
    %18 = tpu.matmul %17, %5, %cst {dimension_numbers = #tpu.dot_dimension_numbers<[1], [0], [0], [1], [0, 0, 1, 1], [], []>} : vector<32x768xbf16>, vector<768x1024xbf16>, vector<32x1024xf32> -> vector<32x1024xf32>
    %19 = vector.shape_cast %18 : vector<32x1024xf32> to vector<2x16x1024xf32>
    %20 = vector.shape_cast %7 : vector<1x1024xf32> to vector<1x1x1024xf32>
    %21 = vector.broadcast %20 : vector<1x1x1024xf32> to vector<2x16x1024xf32>
    %22 = arith.addf %19, %21 : vector<2x16x1024xf32>
    %cst_9 = arith.constant dense<0.000000e+00> : vector<2x1024xf32>
    %23 = vector.multi_reduction <add>, %22, %cst_9 [1] : vector<2x16x1024xf32> to vector<2x1024xf32>
    %24 = vector.shape_cast %23 : vector<2x1024xf32> to vector<2x1x1024xf32>
    %25 = arith.mulf %22, %22 : vector<2x16x1024xf32>
    %cst_10 = arith.constant dense<0.000000e+00> : vector<2x1024xf32>
    %26 = vector.multi_reduction <add>, %25, %cst_10 [1] : vector<2x16x1024xf32> to vector<2x1024xf32>
    %27 = vector.shape_cast %26 : vector<2x1024xf32> to vector<2x1x1024xf32>
    %cst_11 = arith.constant 6.250000e-02 : f32
    %28 = vector.broadcast %cst_11 : f32 to vector<2x1x1024xf32>
    %29 = arith.mulf %24, %28 : vector<2x1x1024xf32>
    %cst_12 = arith.constant 6.250000e-02 : f32
    %30 = vector.broadcast %cst_12 : f32 to vector<2x1x1024xf32>
    %31 = arith.mulf %27, %30 : vector<2x1x1024xf32>
    %32 = arith.mulf %29, %29 : vector<2x1x1024xf32>
    %33 = arith.subf %31, %32 : vector<2x1x1024xf32>
    %cst_13 = arith.constant 0.000000e+00 : f32
    %34 = vector.broadcast %cst_13 : f32 to vector<2x1x1024xf32>
    %35 = arith.maximumf %33, %34 : vector<2x1x1024xf32>
    %36 = vector.broadcast %29 : vector<2x1x1024xf32> to vector<2x16x1024xf32>
    %37 = arith.subf %22, %36 : vector<2x16x1024xf32>
    %cst_14 = arith.constant 9.99999974E-6 : f32
    %38 = vector.broadcast %cst_14 : f32 to vector<2x1x1024xf32>
    %39 = arith.addf %35, %38 : vector<2x1x1024xf32>
    %40 = math.rsqrt %39 : vector<2x1x1024xf32>
    %41 = vector.broadcast %40 : vector<2x1x1024xf32> to vector<2x16x1024xf32>
    %42 = arith.mulf %37, %41 : vector<2x16x1024xf32>
    %43 = vector.extract_strided_slice %42 {offsets = [0, 0, 0], sizes = [2, 16, 512], strides = [1, 1, 1]} : vector<2x16x1024xf32> to vector<2x16x512xf32>
    %44 = vector.extract_strided_slice %42 {offsets = [0, 0, 512], sizes = [2, 16, 512], strides = [1, 1, 1]} : vector<2x16x1024xf32> to vector<2x16x512xf32>
    %45 = arith.negf %44 : vector<2x16x512xf32>
    %46 = math.exp %45 : vector<2x16x512xf32>
    %cst_15 = arith.constant 1.000000e+00 : f32
    %47 = vector.broadcast %cst_15 : f32 to vector<2x16x512xf32>
    %48 = arith.addf %47, %46 : vector<2x16x512xf32>
    %49 = arith.divf %47, %48 : vector<2x16x512xf32>
    %50 = arith.mulf %43, %49 : vector<2x16x512xf32>
    %c0_16 = arith.constant 0 : index
    %c0_17 = arith.constant 0 : index
    %c0_18 = arith.constant 0 : index
    %51 = vector.load %arg5[%c0_16, %c0_17, %c0_18] : memref<1x1536x256xbf16, #tpu.memory_space<vmem>>, vector<1x1536x256xbf16>
    %52 = vector.shape_cast %51 : vector<1x1536x256xbf16> to vector<1536x256xbf16>
    %c0_19 = arith.constant 0 : index
    %c0_20 = arith.constant 0 : index
    %c0_21 = arith.constant 0 : index
    %53 = vector.load %arg6[%c0_19, %c0_20, %c0_21] : memref<1x1x256xf32, #tpu.memory_space<vmem>>, vector<1x1x256xf32>
    %54 = vector.shape_cast %53 : vector<1x1x256xf32> to vector<1x256xf32>
    %55 = arith.truncf %50 : vector<2x16x512xf32> to vector<2x16x512xbf16>
    %56 = vector.extract_strided_slice %55 {offsets = [0, 0, 0], sizes = [2, 1, 512], strides = [1, 1, 1]} : vector<2x16x512xbf16> to vector<2x1x512xbf16>
    %57 = vector.shape_cast %56 : vector<2x1x512xbf16> to vector<2x1x512xbf16>
    %58 = vector.broadcast %57 : vector<2x1x512xbf16> to vector<2x2x512xbf16>
    %59 = tpu.concatenate %58, %55 in 1 : vector<2x2x512xbf16>, vector<2x16x512xbf16> -> vector<2x18x512xbf16>
    %60 = vector.extract_strided_slice %59 {offsets = [0, 0, 0], sizes = [2, 16, 512], strides = [1, 1, 1]} : vector<2x18x512xbf16> to vector<2x16x512xbf16>
    %61 = vector.extract_strided_slice %59 {offsets = [0, 1, 0], sizes = [2, 16, 512], strides = [1, 1, 1]} : vector<2x18x512xbf16> to vector<2x16x512xbf16>
    %62 = vector.extract_strided_slice %59 {offsets = [0, 2, 0], sizes = [2, 16, 512], strides = [1, 1, 1]} : vector<2x18x512xbf16> to vector<2x16x512xbf16>
    %63 = tpu.concatenate %60, %61, %62 in 2 : vector<2x16x512xbf16>, vector<2x16x512xbf16>, vector<2x16x512xbf16> -> vector<2x16x1536xbf16>
    %64 = vector.shape_cast %63 : vector<2x16x1536xbf16> to vector<32x1536xbf16>
    %cst_22 = arith.constant dense<0.000000e+00> : vector<32x256xf32>
    %65 = tpu.matmul %64, %52, %cst_22 {dimension_numbers = #tpu.dot_dimension_numbers<[1], [0], [0], [1], [0, 0, 1, 1], [], []>} : vector<32x1536xbf16>, vector<1536x256xbf16>, vector<32x256xf32> -> vector<32x256xf32>
    %66 = vector.shape_cast %65 : vector<32x256xf32> to vector<2x16x256xf32>
    %67 = vector.shape_cast %54 : vector<1x256xf32> to vector<1x1x256xf32>
    %68 = vector.broadcast %67 : vector<1x1x256xf32> to vector<2x16x256xf32>
    %69 = arith.addf %66, %68 : vector<2x16x256xf32>
    %cst_23 = arith.constant dense<0.000000e+00> : vector<2x256xf32>
    %70 = vector.multi_reduction <add>, %69, %cst_23 [1] : vector<2x16x256xf32> to vector<2x256xf32>
    %71 = vector.shape_cast %70 : vector<2x256xf32> to vector<2x1x256xf32>
    %72 = arith.mulf %69, %69 : vector<2x16x256xf32>
    %cst_24 = arith.constant dense<0.000000e+00> : vector<2x256xf32>
    %73 = vector.multi_reduction <add>, %72, %cst_24 [1] : vector<2x16x256xf32> to vector<2x256xf32>
    %74 = vector.shape_cast %73 : vector<2x256xf32> to vector<2x1x256xf32>
    %cst_25 = arith.constant 6.250000e-02 : f32
    %75 = vector.broadcast %cst_25 : f32 to vector<2x1x256xf32>
    %76 = arith.mulf %71, %75 : vector<2x1x256xf32>
    %cst_26 = arith.constant 6.250000e-02 : f32
    %77 = vector.broadcast %cst_26 : f32 to vector<2x1x256xf32>
    %78 = arith.mulf %74, %77 : vector<2x1x256xf32>
    %79 = arith.mulf %76, %76 : vector<2x1x256xf32>
    %80 = arith.subf %78, %79 : vector<2x1x256xf32>
    %cst_27 = arith.constant 0.000000e+00 : f32
    %81 = vector.broadcast %cst_27 : f32 to vector<2x1x256xf32>
    %82 = arith.maximumf %80, %81 : vector<2x1x256xf32>
    %83 = vector.broadcast %76 : vector<2x1x256xf32> to vector<2x16x256xf32>
    %84 = arith.subf %69, %83 : vector<2x16x256xf32>
    %cst_28 = arith.constant 9.99999974E-6 : f32
    %85 = vector.broadcast %cst_28 : f32 to vector<2x1x256xf32>
    %86 = arith.addf %82, %85 : vector<2x1x256xf32>
    %87 = math.rsqrt %86 : vector<2x1x256xf32>
    %88 = vector.broadcast %87 : vector<2x1x256xf32> to vector<2x16x256xf32>
    %89 = arith.mulf %84, %88 : vector<2x16x256xf32>
    %90 = arith.addf %3, %89 : vector<2x16x256xf32>
    %c0_29 = arith.constant 0 : index
    %c0_30 = arith.constant 0 : index
    %c0_31 = arith.constant 0 : index
    %91 = vector.load %arg7[%c0_29, %c0_30, %c0_31] : memref<2x16x256xf32, #tpu.memory_space<vmem>>, vector<2x16x256xf32>
    tpu.vector_store %arg7[%c0_29, %c0_30, %c0_31], %90 {strides = array<i32>} : memref<2x16x256xf32, #tpu.memory_space<vmem>>, vector<2x16x256xf32>,
    return
  }
  func.func @transform_0(%arg0: i32, %arg1: i32) -> (i32, i32, i32) {
    %c0_i32 = arith.constant 0 : i32
    %c0_i32_0 = arith.constant 0 : i32
    %c0_i32_1 = arith.constant 0 : i32
    return %arg0, %c0_i32, %c0_i32_0 : i32, i32, i32
  }
  func.func @transform_1(%arg0: i32, %arg1: i32) -> (i32, i32, i32) {
    %c0_i32 = arith.constant 0 : i32
    %c0_i32_0 = arith.constant 0 : i32
    %c0_i32_1 = arith.constant 0 : i32
    return %arg1, %c0_i32, %c0_i32_0 : i32, i32, i32
  }
  func.func @transform_2(%arg0: i32, %arg1: i32) -> (i32, i32, i32) {
    %c0_i32 = arith.constant 0 : i32
    %c0_i32_0 = arith.constant 0 : i32
    %c0_i32_1 = arith.constant 0 : i32
    return %arg1, %c0_i32, %c0_i32_0 : i32, i32, i32
  }
  func.func @transform_3(%arg0: i32, %arg1: i32) -> (i32, i32, i32) {
    %c0_i32 = arith.constant 0 : i32
    %c0_i32_0 = arith.constant 0 : i32
    %c0_i32_1 = arith.constant 0 : i32
    return %arg1, %c0_i32, %c0_i32_0 : i32, i32, i32
  }
  func.func @transform_4(%arg0: i32, %arg1: i32) -> (i32, i32, i32) {
    %c0_i32 = arith.constant 0 : i32
    %c0_i32_0 = arith.constant 0 : i32
    %c0_i32_1 = arith.constant 0 : i32
    return %arg1, %c0_i32, %c0_i32_0 : i32, i32, i32
  }
  func.func @transform_5(%arg0: i32, %arg1: i32) -> (i32, i32, i32) {
    %c0_i32 = arith.constant 0 : i32
    %c0_i32_0 = arith.constant 0 : i32
    %c0_i32_1 = arith.constant 0 : i32
    return %arg0, %c0_i32, %c0_i32_0 : i32, i32, i32
  }
}

</mosaic_0001>

<bundles_post_ra>
// kernel: res6block_forward.1
= control target key start
LH: loop header
LB: loop body
LE: loop exit
PB: predicated region body
PF: predicated region fallthrough
CT: control target
= control target key end

     0   :  { %s9341_s0 = inlined_call_operand.hbm [shape: f32[2,16,256], index: 0, kind: input, shape index: {}]   ;;  %s9342_s1 = inlined_call_operand.hbm [shape: bf16[6,768,1024], index: 1, kind: input, shape index: {}]   ;;  %s9343_s2 = inlined_call_operand.hbm [shape: f32[6,1,1024], index: 2, kind: input, shape index: {}]   ;;  %s9344_s3 = inlined_call_operand.hbm [shape: bf16[6,1536,256], index: 3, kind: input, shape index: {}]   ;;  %s9345_s4 = inlined_call_operand.hbm [shape: f32[6,1,256], index: 4, kind: input, shape index: {}]   ;;  %s9346_s5 = inlined_call_operand.hbm [shape: f32[2,16,256], index: 5, kind: output, shape index: {}]  }
   0x1   :  { %9383 = sst [smem:[#allocation37_spill]] %s9342_s1 }
   0x2   :  { %9384 = sst [smem:[#allocation38_spill]] %s9344_s3 }
   0x3   :  { %10 = vsyncpa [#allocation3], 0 }
   0x4   :  { %11 = vsyncpa [#allocation6], 0 }
   0x5   :  { %13 = vsyncpa [#allocation6 + $0x1], 0 }
   0x6   :  { %14 = vsyncpa [#allocation9], 0 }
   0x7   :  { %16 = vsyncpa [#allocation9 + $0x1], 0 }
   0x8   :  { %17 = vsyncpa [#allocation4], 0  ;;  %s7602_s18 = smov 0   ;;  %s7604_s19 = smov 0  }
   0x9   :  { %s7606_s20 = smov 0   ;;  %s7608_s21 = smov 0  }
   0xa   :  { %s7610_s22 = smov 0   ;;  %s7612_s23 = smov 0  }
   0xb LB: > { %s32_s24 = sadd.s32 1, %s7552_s22  ;;  %s68_s25 = sadd.s32 1, %s7544_s20  ;;  %s7556_s23 = sphi %s7612_s23, %s23_s23   ;;  %s7552_s22 = sphi %s7610_s22, %s9470_s22   ;;  %s7548_s21 = sphi %s7608_s21, %s9469_s21   ;;  %s7544_s20 = sphi %s7606_s20, %s9468_s20   ;;  %s7540_s19 = sphi %s7604_s19, %s9467_s19   ;;  %s7536_s18 = sphi %s7602_s18, %s9466_s18  }
   0xc   : > { %p33_p0 = scmp.ge.s32.totalorder %s32_s24, 6  ;;  %p75_p1 = scmp.ne.s32.totalorder %s7544_s20, %s7540_s19 }
   0xd   : > { %p76_p2 = scmp.eq.s32.totalorder %s7556_s23, 0  ;;  %p6857_p4 = scmp.lt.s32.totalorder %s7556_s23, 6 }
   0xe   : > { %s9472_s24 = smov (%p33_p0, %s32_s24), 0  ;;  %s226_s27 = sand.u32 1, %s7556_s23  }
   0xf   : > { %9385 = sst [smem:[#allocation16_spill]] %s9472_s24  ;;  %p77_p3 = por %p76_p2, %p75_p1 }
  0x10   : > { %s65_s26 = ssub.s32 %s7552_s22, %s9472_s24  ;;  %s7644_s28 = sand.u32 1, %s7544_s20  }
  0x11   : > { %p66_p5 = scmp.eq.s32.totalorder %s65_s26, 0  ;;  %s6818_s29 = smul.u32 49152, %s7552_s22 }
  0x12   : > { %s6817_s6 = smul.u32 3072, %s7644_s28  ;;  %s9387_s1 = sld [smem:[#allocation37_spill]] }
  0x13   : > { %s7648_s30 = scalar_select %p66_p5, %s7544_s20, %s68_s25  }
  0x14   : > { %p7656_p6 = pnand %p6857_p4, %p77_p3  ;;  %s230_s11 = scalar_lea.vmem [#allocation5], %s6817_s6 }
  0x15   : > { %9386 = sst [smem:[#allocation17_spill]] %s7648_s30  ;;  %s237_s12 = sshll.u32 %s230_s11, 4  ;;  %s7660_s12 = int_to_ptr.vmem [resolvable:$true] %s237_s12 }
  0x16   : > { %s9388_s10 = scalar_select %p7656_p6, 1, 0 }
  0x17   : > { %s7664_s13 = scalar_lea.sflag [#allocation6], %s226_s27  ;;  %p7670_p8 = pneg %p7656_p6 }
  0x18   : > { %s7654_s9 = scalar_lea.hbm %s9387_s1, %s6818_s29  ;;  %s7325_s25 = scalar_lea.hbm %s9387_s1, 294912 }
  0x19   : > { %s7320_s14 = scalar_lea.hbm %s7654_s9, 49152  ;;  %p7326_p11 = scmp.lt.u32.totalorder %s7654_s9, %s9387_s1 }
  0x1a   : > { %p7321_p7 = scmp.ne.s32.totalorder %s7654_s9, %s7320_s14  ;;  %p7327_p12 = scmp.lt.u32.totalorder %s7325_s25, %s7320_s14 }
  0x1b   : > { %s9389_s15 = scalar_select %p7670_p8, 1, 0 }
  0x1c   : > { %p7323_p9 = pnand %p7670_p8, %p7321_p7  ;;  %p7328_p13 = por %p7327_p12, %p7326_p11 }
  0x1d   : > { %p7329_p0 = scmp.lt.u32.totalorder %s7320_s14, %s7654_s9 }
  0x1e   : > { %p7324_p10 = pneg %p7323_p9 }
  0x1f   : > { %p7330_p1 = por %p7329_p0, %p7328_p13 }
  0x21   : > { %p7331_p2 = pnand %p7330_p1, %p7324_p10 }
  0x23   : > { %7334 = shalt.err (!%p7331_p2)
}
  0x24   : > { %s7335_s6 = scalar_lea.vmem %s7660_s12, 49152  ;;  %s7558_s7 = smov [#allocation5]  }
  0x25   : > { %p7336_p3 = scmp.ne.s32.totalorder %s7660_s12, %s7335_s6  ;;  %s7340_s8 = sshll.u32 %s7558_s7, 4  ;;  %s7341_s8 = int_to_ptr.vmem [resolvable:$false] %s7340_s8 }
  0x26   : > { %s7342_s11 = scalar_lea.vmem %s7341_s8, 98304  ;;  %p7343_p7 = scmp.lt.s32.totalorder %s7660_s12, %s7341_s8 }
  0x27   : > { %p7338_p4 = pnand %p7336_p3, %p7670_p8  ;;  %p7344_p9 = scmp.lt.s32.totalorder %s7342_s11, %s7335_s6 }
  0x29   : > { %p7339_p5 = pneg %p7338_p4  ;;  %p7345_p11 = por %p7344_p9, %p7343_p7 }
  0x2b   : > { %p7346_p12 = pnand %p7345_p11, %p7339_p5 }
  0x2d   : > { %7349 = shalt.err (!%p7346_p12)
}
  0x2e   : > { %s7559_s14 = smov 512   ;;  %s7560_s16 = smov 32  }
  0x2f   : > { %6846 = dma.hbm_to_vmem [thread:$0]  (!%p7656_p6), %s7654_s9, 49152, %s7660_s12, %s7664_s13, %s7559_s14, %s7559_s14, %s7560_s16  }
  0x30   : > { %s6819_s17 = smul.u32 1536, %s7644_s28  ;;  %s9390_s3 = sld [smem:[#allocation38_spill]] }
  0x31   : > { %s6820_s25 = smul.u32 24576, %s7552_s22  ;;  %s7705_s11 = scalar_lea.sflag [#allocation9], %s226_s27 }
  0x32   : > { %s270_s7 = scalar_lea.vmem [#allocation8], %s6819_s17 }
  0x33   : > { %s277_s8 = sshll.u32 %s270_s7, 4  ;;  %s7701_s8 = int_to_ptr.vmem [resolvable:$true] %s277_s8 }
  0x36   : > { %s7699_s6 = scalar_lea.hbm %s9390_s3, %s6820_s25  ;;  %s7355_s14 = scalar_lea.hbm %s9390_s3, 147456 }
  0x37   : > { %s7350_s1 = scalar_lea.hbm %s7699_s6, 24576  ;;  %p7356_p1 = scmp.lt.u32.totalorder %s7699_s6, %s9390_s3 }
  0x38   : > { %p7351_p10 = scmp.ne.s32.totalorder %s7699_s6, %s7350_s1  ;;  %p7357_p2 = scmp.lt.u32.totalorder %s7355_s14, %s7350_s1 }
  0x39   : > { %p7359_p4 = scmp.lt.u32.totalorder %s7350_s1, %s7699_s6 }
  0x3a   : > { %p7353_p13 = pnand %p7351_p10, %p7670_p8  ;;  %p7358_p3 = por %p7357_p2, %p7356_p1 }
  0x3c   : > { %p7354_p0 = pneg %p7353_p13  ;;  %p7360_p5 = por %p7359_p4, %p7358_p3 }
  0x3e   : > { %p7361_p7 = pnand %p7360_p5, %p7354_p0 }
  0x40   : > { %7364 = shalt.err (!%p7361_p7)
}
  0x41   : > { %s7365_s27 = scalar_lea.vmem %s7701_s8, 24576  ;;  %s7561_s17 = smov [#allocation8]  }
  0x42   : > { %p7366_p9 = scmp.ne.s32.totalorder %s7701_s8, %s7365_s27  ;;  %s7370_s26 = sshll.u32 %s7561_s17, 4  ;;  %s7371_s26 = int_to_ptr.vmem [resolvable:$false] %s7370_s26 }
  0x43   : > { %s7372_s29 = scalar_lea.vmem %s7371_s26, 49152  ;;  %p7373_p10 = scmp.lt.s32.totalorder %s7701_s8, %s7371_s26 }
  0x44   : > { %p7368_p11 = pnand %p7366_p9, %p7670_p8  ;;  %p7374_p13 = scmp.lt.s32.totalorder %s7372_s29, %s7365_s27 }
  0x46   : > { %p7369_p12 = pneg %p7368_p11  ;;  %p7375_p1 = por %p7374_p13, %p7373_p10 }
  0x48   : > { %p7376_p2 = pnand %p7375_p1, %p7369_p12 }
  0x4a   : > { %7379 = shalt.err (!%p7376_p2)
}
  0x4b   : > { %s7562_s1 = smov 128   ;;  %s7563_s7 = smov 8  }
  0x4c   : > { %6852 = dma.hbm_to_vmem [thread:$0]  (!%p7656_p6), %s7699_s6, 24576, %s7701_s8, %s7705_s11, %s7562_s1, %s7562_s1, %s7563_s7  }
  0x4d   : > { %s7730_s9 = sadd.s32 4294967295, %s7556_s23   ;;  %p81_p0 = scmp.ne.s32.totalorder %s7540_s19, %s7536_s18 }
  0x4e   : > { %p9348_p3 = scmp.eq.s32.totalorder %s7730_s9, 0  ;;  %p6099_p4 = scmp.ge.s32.totalorder %s7556_s23, 1 }
  0x4f   : > { %p196_p5 = scmp.lt.s32.totalorder %s7556_s23, 7  ;;  %s7564_s6 = smov [#allocation2]  }
  0x50   : > { %p7739_p7 = por %p9348_p3, %p81_p0  ;;  %s212_s8 = sshll.u32 %s7564_s6, 4  ;;  %s7747_s8 = int_to_ptr.vmem [resolvable:$true] %s212_s8 }
  0x51   : > { %p7743_p9 = pnand %p6099_p4, %p196_p5  ;;  %s6103_s18 = sshll.u32 %s7644_s28, 3 }
  0x52   : > { %s9391_s12 = scalar_select %p7739_p7, 1, 0 }
  0x53   : > { %s9392_s14 = scalar_select %p7743_p9, 1, 0 }
  0x54   : > { %p6839_p11 = pneg %p7743_p9  ;;  %s6711_s16 = sshll.u32 %s7552_s22, 7 }
  0x55   : > { %s7762_s26 = scalar_lea.hbm %s9343_s2, %s6711_s16  ;;  %s251_s29 = scalar_lea.vmem [#allocation7], %s6103_s18 }
  0x56   : > { %p7755_p12 = pnand %p6839_p11, %p9348_p3  ;;  %s259_s1 = sshll.u32 %s251_s29, 4  ;;  %s7764_s1 = int_to_ptr.vmem [resolvable:$true] %s259_s1 }
  0x57   : > { %s7380_s3 = scalar_lea.hbm %s9341_s0, 1024 }
  0x58   : > { %p7381_p10 = scmp.ne.s32.totalorder %s9341_s0, %s7380_s3  ;;  %p7382_p13 = pneg %p7755_p12 }
  0x59   : > { %p7387_p0 = scmp.lt.u32.totalorder %s7380_s3, %s9341_s0 }
  0x5a   : > { %p7383_p1 = pnand %p7382_p13, %p7381_p10 }
  0x5c   : > { %p7384_p2 = pneg %p7383_p1 }
  0x5e   : > { %p7389_p4 = pnand %p7387_p0, %p7384_p2 }
  0x60   : > { %7392 = shalt.err (!%p7389_p4)
}
  0x61   : > { %s7393_s18 = scalar_lea.vmem %s7747_s8, 1024  ;;  %p7401_p7 = scmp.lt.s32.totalorder %s7747_s8, %s7747_s8 }
  0x62   : > { %p7394_p5 = scmp.ne.s32.totalorder %s7747_s8, %s7393_s18  ;;  %p7402_p9 = scmp.lt.s32.totalorder %s7393_s18, %s7393_s18 }
  0x64   : > { %p7396_p11 = pnand %p7394_p5, %p7382_p13  ;;  %p7403_p6 = por %p7402_p9, %p7401_p7 }
  0x66   : > { %p7397_p3 = pneg %p7396_p11 }
  0x68   : > { %p7404_p8 = pnand %p7403_p6, %p7397_p3 }
  0x6a   : > { %7407 = shalt.err (!%p7404_p8)
}
  0x6b   : > { %s7565_s24 = smov 256   ;;  %s7566_s3 = smov 16  }
  0x6c   : > { %6842 = dma.hbm_to_vmem [thread:$0]  (!%p7755_p12), %s9341_s0, 1024, %s7747_s8, [#allocation3], %s7565_s24, %s7565_s24, %s7566_s3  }
  0x6d   : > { %s7408_s29 = scalar_lea.hbm %s7762_s26, 128  ;;  %p9394_p13 = scmp.ne.s32.totalorder %s9389_s15, 0 }
  0x6e   : > { %p7409_p10 = scmp.ne.s32.totalorder %s7762_s26, %s7408_s29  ;;  %s7413_s27 = scalar_lea.hbm %s9343_s2, 768 }
  0x6f   : > { %p7414_p8 = scmp.lt.u32.totalorder %s7762_s26, %s9343_s2  ;;  %p7415_p3 = scmp.lt.u32.totalorder %s7413_s27, %s7408_s29 }
  0x70   : > { %p7411_p7 = pnand %p7409_p10, %p9394_p13  ;;  %p7417_p1 = scmp.lt.u32.totalorder %s7408_s29, %s7762_s26 }
  0x71   : > { %p7416_p9 = por %p7415_p3, %p7414_p8 }
  0x72   : > { %p7412_p6 = pneg %p7411_p7 }
  0x73   : > { %p7418_p2 = por %p7417_p1, %p7416_p9 }
  0x75   : > { %p7419_p0 = pnand %p7418_p2, %p7412_p6 }
  0x77   : > { %7422 = shalt.err (!%p7419_p0)
}
  0x78   : > { %s7423_s8 = scalar_lea.vmem %s7764_s1, 128  ;;  %s7567_s25 = smov [#allocation7]  }
  0x79   : > { %p7424_p12 = scmp.ne.s32.totalorder %s7764_s1, %s7423_s8  ;;  %s7428_s24 = sshll.u32 %s7567_s25, 4  ;;  %s7429_s24 = int_to_ptr.vmem [resolvable:$false] %s7428_s24 }
  0x7a   : > { %s7430_s3 = scalar_lea.vmem %s7429_s24, 256  ;;  %p7431_p11 = scmp.lt.s32.totalorder %s7764_s1, %s7429_s24 }
  0x7b   : > { %p7426_p4 = pnand %p7424_p12, %p9394_p13  ;;  %p7432_p10 = scmp.lt.s32.totalorder %s7430_s3, %s7423_s8 }
  0x7d   : > { %p7427_p5 = pneg %p7426_p4  ;;  %p7433_p7 = por %p7432_p10, %p7431_p11 }
  0x7f   : > { %p7434_p8 = pnand %p7433_p7, %p7427_p5 }
  0x81   : > { %7437 = shalt.err (!%p7434_p8)
}
  0x82   : > { %p9395_p6 = scmp.ne.s32.totalorder %s9388_s10, 0  ;;  %s6107_s30 = sshll.u32 %s7644_s28, 1 }
  0x83   : > { %s6712_s16 = sshll.u32 %s7552_s22, 5  ;;  %s291_s27 = scalar_lea.vmem [#allocation10], %s6107_s30 }
  0x84   : > { %6849 = dma.hbm_to_vmem [thread:$0]  (!%p9395_p6), %s7762_s26, 128, %s7764_s1, %s7664_s13  }
  0x85   : > { %s7814_s6 = scalar_lea.hbm %s9345_s4, %s6712_s16  ;;  %s299_s17 = sshll.u32 %s291_s27, 4  ;;  %s300_s17 = int_to_ptr.vmem [resolvable:$true] %s299_s17 }
  0x86   : > { %s7438_s18 = scalar_lea.hbm %s7814_s6, 32  ;;  %s7443_s26 = scalar_lea.hbm %s9345_s4, 192 }
  0x87   : > { %p7439_p3 = scmp.ne.s32.totalorder %s7814_s6, %s7438_s18  ;;  %p7444_p2 = scmp.lt.u32.totalorder %s7814_s6, %s9345_s4 }
  0x88   : > { %p7445_p0 = scmp.lt.u32.totalorder %s7443_s26, %s7438_s18  ;;  %p7447_p4 = scmp.lt.u32.totalorder %s7438_s18, %s7814_s6 }
  0x89   : > { %p7441_p9 = pnand %p7439_p3, %p9394_p13 }
  0x8a   : > { %p7446_p12 = por %p7445_p0, %p7444_p2 }
  0x8b   : > { %p7442_p1 = pneg %p7441_p9 }
  0x8c   : > { %p7448_p5 = por %p7447_p4, %p7446_p12 }
  0x8e   : > { %p7449_p11 = pnand %p7448_p5, %p7442_p1 }
  0x90   : > { %7452 = shalt.err (!%p7449_p11)
}
  0x91   : > { %s7453_s25 = scalar_lea.vmem %s300_s17, 32  ;;  %s7568_s24 = smov [#allocation10]  }
  0x92   : > { %p7454_p10 = scmp.ne.s32.totalorder %s300_s17, %s7453_s25  ;;  %s7458_s3 = sshll.u32 %s7568_s24, 4  ;;  %s7459_s3 = int_to_ptr.vmem [resolvable:$false] %s7458_s3 }
  0x93   : > { %s7460_s30 = scalar_lea.vmem %s7459_s3, 64  ;;  %p7461_p3 = scmp.lt.s32.totalorder %s300_s17, %s7459_s3 }
  0x94   : > { %p7456_p7 = pnand %p7454_p10, %p9394_p13  ;;  %p7462_p9 = scmp.lt.s32.totalorder %s7460_s30, %s7453_s25 }
  0x96   : > { %p7457_p8 = pneg %p7456_p7  ;;  %p7463_p6 = por %p7462_p9, %p7461_p3 }
  0x98   : > { %p7464_p0 = pnand %p7463_p6, %p7457_p8 }
  0x9a   : > { %7467 = shalt.err (!%p7464_p0)
}
  0x9b   : > { %p9396_p2 = scmp.ne.s32.totalorder %s9388_s10, 0  ;;  %p9397_p1 = scmp.ne.s32.totalorder %s9392_s14, 0 }
  0x9d   : > { %6855 = dma.hbm_to_vmem [thread:$0]  (!%p9396_p2), %s7814_s6, 32, %s300_s17, %s7705_s11  }
  0x9e   : > { %308 = sbr.rel (%p9397_p1) target bundleno = 1603 (0x643), region = 40 }
  0xa5   : > { %p9398_p13 = scmp.eq.s32.totalorder %s7730_s9, 0 }
  0xa7   : > { %7519 = dma.done.wait (%p9398_p13), [#allocation3], 1024   ;;  %p9399_p12 = pmov %p9398_p13 }
  0xa8   : > { %s314_s15 = sand.u32 1, %s7730_s9   ;;  %s316_s16 = sand.u32 1, %s7540_s19  }
  0xa9   : > { %7521 = vsyncadd (%p9399_p12), [#allocation3], 4294966272  ;;  %s6821_s29 = smul.u32 3072, %s316_s16  ;;  %s315_s7 = scalar_lea.sflag [#allocation6], %s314_s15 }
  0xaa   : > { %p9400_p6 = scmp.ne.s32.totalorder %s9391_s12, 0 }
  0xab   : > { %s7842_s10 = scalar_lea.vmem [#allocation5], %s6821_s29 }
  0xac   : > { %7523 = dma.done.wait (%p9400_p6), %s315_s7, 49280  }
  0xad   : > { %7525 = vsyncadd (%p9400_p6), %s315_s7, 4294918016  ;;  %s6112_s11 = sshll.u32 %s316_s16, 3  ;;  %s6822_s14 = smul.u32 1536, %s316_s16 }
  0xae   : > { %s7848_s6 = scalar_lea.vmem [#allocation7], %s6112_s11  ;;  %s333_s27 = scalar_lea.sflag [#allocation9], %s314_s15 }
  0xaf   : > { %s7850_s17 = scalar_lea.vmem [#allocation8], %s6822_s14 }
  0xb0   : > { %7527 = dma.done.wait (%p9400_p6), %s333_s27, 24608  }
  0xb1   : > { %7529 = vsyncadd (%p9400_p6), %s333_s27, 4294942688  ;;  %s6113_s18 = sshll.u32 %s316_s16, 1  ;;  %p6114_p4 = scmp.ne.s32.totalorder %s7548_s21, 0 }
  0xb2   : > { %s7856_s13 = scalar_lea.vmem [#allocation10], %s6113_s18  ;;  %v388_v0 = vld [vmem:[#allocation2] sm:$0xff] (!%p6114_p4)  ;;  %v389_v1 = vld [vmem:[#allocation2 + $0x8] sm:$0xff] (!%p6114_p4)  ;;  %v390_v2 = vld [vmem:[#allocation2 + $0x10] sm:$0xff] (!%p6114_p4) }
  0xb3   : > { %387 = sbr.rel (%p6114_p4) target bundleno = 186 (0xba), region = 64  ;;  %396 = vst [vmem:[#allocation11] sm:$0xff] (!%p6114_p4), %v388_v0  ;;  %397 = vst [vmem:[#allocation11 + $0x8] sm:$0xff] (!%p6114_p4), %v389_v1  ;;  %v391_v3 = vld [vmem:[#allocation2 + $0x18] sm:$0xff] (!%p6114_p4)  ;;  %v392_v4 = vld [vmem:[#allocation2 + $0x20] sm:$0xff] (!%p6114_p4) }
  0xb4   : > { %398 = vst [vmem:[#allocation11 + $0x10] sm:$0xff] (!%p6114_p4), %v390_v2  ;;  %v393_v5 = vld [vmem:[#allocation2 + $0x28] sm:$0xff] (!%p6114_p4)  ;;  %399 = vst [vmem:[#allocation11 + $0x18] sm:$0xff] (!%p6114_p4), %v391_v3  ;;  %v394_v6 = vld [vmem:[#allocation2 + $0x30] sm:$0xff] (!%p6114_p4) }
  0xb5   : > { %400 = vst [vmem:[#allocation11 + $0x20] sm:$0xff] (!%p6114_p4), %v392_v4  ;;  %401 = vst [vmem:[#allocation11 + $0x28] sm:$0xff] (!%p6114_p4), %v393_v5  ;;  %v395_v7 = vld [vmem:[#allocation2 + $0x38] sm:$0xff] (!%p6114_p4) }
  0xb6   : > { %402 = vst [vmem:[#allocation11 + $0x30] sm:$0xff] (!%p6114_p4), %v394_v6  ;;  %403 = vst [vmem:[#allocation11 + $0x38] sm:$0xff] (!%p6114_p4), %v395_v7 }
  0xba PF: > { %v412_v8 = vld [vmem:[%s7842_s10] sm:$0xff]  ;;  %v414_v10 = vld [vmem:[%s7842_s10 + $0x10] sm:$0xff]  ;;  %v804_v48 = vlaneseq  ;;  %vm837_vm0 = vcmask 1040384   ;;  %vm854_vm1 = vsmask.f32 7424  ;;  %vm903_vm2 = vcmask 1046528  }
  0xbb   : > { %v416_v9 = vld [vmem:[%s7842_s10 + $0x20] sm:$0xff]  ;;  %v418_v12 = vld [vmem:[%s7842_s10 + $0x30] sm:$0xff]  ;;  %s7569_s21 = smov [#allocation11]   ;;  %p6859_p5 = scmp.eq.s32.totalorder %s7730_s9, 5 }
  0xbc   : > { %v6116_v11 = vcombine.high %v412_v8, %v416_v9  ;;  %v6115_v13 = vcombine.low %v412_v8, %v416_v9  ;;  %v420_v14 = vld [vmem:[%s7842_s10 + $0x40] sm:$0xff]  ;;  %v6120_v16 = vcombine.high %v414_v10, %v418_v12  ;;  %v6119_v17 = vcombine.low %v414_v10, %v418_v12  ;;  %v422_v19 = vld [vmem:[%s7842_s10 + $0x50] sm:$0xff]  ;;  %s5957_s12 = sshll.u32 %s7569_s21, 4  ;;  %s5958_s12 = int_to_ptr.vmem [resolvable:$true] %s5957_s12 }
  0xbd   : > { %v424_v15 = vld [vmem:[%s7842_s10 + $0x60] sm:$0xff]  ;;  %v426_v20 = vld [vmem:[%s7842_s10 + $0x70] sm:$0xff]  ;;  %v7885_v57 = vshrl.u32 %v804_v48, 7  ;;  %s7468_s28 = scalar_lea.vmem %s5958_s12, 1024  ;;  %p7475_p8 = scmp.lt.s32.totalorder %s5958_s12, %s5958_s12 }
  0xbe   : > { %v6124_v18 = vcombine.high %v420_v14, %v424_v15  ;;  %v428_v21 = vld [vmem:[%s7842_s10 + $0x80] sm:$0xff]  ;;  %2840 = vmatprep.subr.bf16.mxu1 %v6116_v11  ;;  %v6128_v22 = vcombine.high %v422_v19, %v426_v20  ;;  %v430_v24 = vld [vmem:[%s7842_s10 + $0x90] sm:$0xff]  ;;  %3158 = vmatprep.subr.bf16.mxu0 %v6120_v16  ;;  %v6123_v26 = vcombine.low %v420_v14, %v424_v15  ;;  %p7469_p11 = scmp.ne.s32.totalorder %s5958_s12, %s7468_s28  ;;  %p7476_p3 = scmp.lt.s32.totalorder %s7468_s28, %s7468_s28 }
  0xbf   : > { %v432_v23 = vld [vmem:[%s7842_s10 + $0xa0] sm:$0xff]  ;;  %v434_v25 = vld [vmem:[%s7842_s10 + $0xb0] sm:$0xff]  ;;  %2841 = vmatpush1.bf16.msra.mxu1 %v6115_v13  ;;  %3159 = vmatpush1.bf16.msra.mxu0 %v6119_v17  ;;  %v6127_v27 = vcombine.low %v422_v19, %v426_v20  ;;  %9401 = vst [vmem:[#allocation18_spill] sm:$0xff] %v7885_v57  ;;  %v7892_v5 = vsub.s32 0, %v7885_v57 }
  0xc0   : > { %2842 = vmatprep.subr.bf16.mxu1 %v6124_v18  ;;  %v6132_v28 = vcombine.high %v428_v21, %v432_v23  ;;  %3160 = vmatprep.subr.bf16.mxu0 %v6128_v22  ;;  %v6136_v29 = vcombine.high %v430_v24, %v434_v25  ;;  %v436_v30 = vld [vmem:[%s7842_s10 + $0xc0] sm:$0xff]  ;;  %v438_v32 = vld [vmem:[%s7842_s10 + $0xd0] sm:$0xff]  ;;  %v6131_v34 = vcombine.low %v428_v21, %v432_v23  ;;  %p7470_p10 = pnand %p7469_p11, %p6859_p5  ;;  %p7477_p9 = por %p7476_p3, %p7475_p8 }
  0xc1   : > { %v440_v31 = vld [vmem:[%s7842_s10 + $0xe0] sm:$0xff]  ;;  %v442_v33 = vld [vmem:[%s7842_s10 + $0xf0] sm:$0xff]  ;;  %v6135_v35 = vcombine.low %v430_v24, %v434_v25  ;;  %9402 = vst [vmem:[#allocation19_spill] sm:$0xff] %v7892_v5 }
  0xc2   : > { %v6140_v36 = vcombine.high %v436_v30, %v440_v31  ;;  %v6144_v37 = vcombine.high %v438_v32, %v442_v33  ;;  %v444_v38 = vld [vmem:[%s7842_s10 + $0x100] sm:$0xff]  ;;  %v446_v40 = vld [vmem:[%s7842_s10 + $0x110] sm:$0xff]  ;;  %v6139_v42 = vcombine.low %v436_v30, %v440_v31  ;;  %v6143_v43 = vcombine.low %v438_v32, %v442_v33  ;;  %p7471_p7 = pneg %p7470_p10 }
  0xc3   : > { %2843 = vmatpush1.bf16.msra.mxu1 %v6123_v26  ;;  %3161 = vmatpush1.bf16.msra.mxu0 %v6127_v27  ;;  %v448_v39 = vld [vmem:[%s7842_s10 + $0x120] sm:$0xff]  ;;  %v450_v41 = vld [vmem:[%s7842_s10 + $0x130] sm:$0xff] }
  0xc4   : > { %2844 = vmatprep.subr.bf16.mxu1 %v6132_v28  ;;  %3162 = vmatprep.subr.bf16.mxu0 %v6136_v29  ;;  %v6148_v44 = vcombine.high %v444_v38, %v448_v39  ;;  %v6152_v45 = vcombine.high %v446_v40, %v450_v41  ;;  %v452_v46 = vld [vmem:[%s7842_s10 + $0x140] sm:$0xff]  ;;  %v454_v49 = vld [vmem:[%s7842_s10 + $0x150] sm:$0xff]  ;;  %v6147_v51 = vcombine.low %v444_v38, %v448_v39  ;;  %p7478_p0 = pnand %p7477_p9, %p7471_p7 }
  0xc5   : > { %v456_v47 = vld [vmem:[%s7842_s10 + $0x160] sm:$0xff]  ;;  %v458_v50 = vld [vmem:[%s7842_s10 + $0x170] sm:$0xff]  ;;  %v6151_v52 = vcombine.low %v446_v40, %v450_v41 }
  0xc6   : > { %v6156_v53 = vcombine.high %v452_v46, %v456_v47  ;;  %v6160_v54 = vcombine.high %v454_v49, %v458_v50  ;;  %v460_v55 = vld [vmem:[%s7842_s10 + $0x180] sm:$0xff]  ;;  %v462_v58 = vld [vmem:[%s7842_s10 + $0x190] sm:$0xff]  ;;  %v6155_v60 = vcombine.low %v452_v46, %v456_v47  ;;  %v6159_v61 = vcombine.low %v454_v49, %v458_v50 }
  0xc7   : > { %2845 = vmatpush1.bf16.msra.mxu1 %v6131_v34  ;;  %3163 = vmatpush1.bf16.msra.mxu0 %v6135_v35  ;;  %v464_v56 = vld [vmem:[%s7842_s10 + $0x1a0] sm:$0xff]  ;;  %v466_v59 = vld [vmem:[%s7842_s10 + $0x1b0] sm:$0xff] }
  0xc8   : > { %2846 = vmatprep.subr.bf16.mxu1 %v6140_v36  ;;  %3164 = vmatprep.subr.bf16.mxu0 %v6144_v37  ;;  %v6164_v62 = vcombine.high %v460_v55, %v464_v56  ;;  %v405_v63 = vld [vmem:[#allocation11 + $0x8] sm:$0xff]  ;;  %v407_v0 = vld [vmem:[#allocation11 + $0x18] sm:$0xff]  ;;  %v6168_v1 = vcombine.high %v462_v58, %v466_v59  ;;  %v6163_v8 = vcombine.low %v460_v55, %v464_v56 }
  0xc9   : > { %v468_v2 = vld [vmem:[%s7842_s10 + $0x1c0] sm:$0xff]  ;;  %v798_v4 = vpack.c.bf16 %v407_v0, %v405_v63  ;;  %v470_v6 = vld [vmem:[%s7842_s10 + $0x1d0] sm:$0xff]  ;;  %v6167_v11 = vcombine.low %v462_v58, %v466_v59 }
  0xca   : > { %v472_v3 = vld [vmem:[%s7842_s10 + $0x1e0] sm:$0xff]  ;;  %v474_v7 = vld [vmem:[%s7842_s10 + $0x1f0] sm:$0xff] }
  0xcb   : > { %2847 = vmatpush1.bf16.msra.mxu1 %v6139_v42  ;;  %3165 = vmatpush1.bf16.msra.mxu0 %v6143_v43  ;;  %v809_v9 = vpack.i.b16 %v798_v4, %v798_v4  ;;  %v7896_v10 = vrot.slane %v798_v4, 7  ;;  %v6172_v12 = vcombine.high %v468_v2, %v472_v3  ;;  %v6176_v13 = vcombine.high %v470_v6, %v474_v7  ;;  %v476_v14 = vld [vmem:[%s7842_s10 + $0x200] sm:$0xff]  ;;  %v478_v17 = vld [vmem:[%s7842_s10 + $0x210] sm:$0xff] }
  0xcc   : > { %2848 = vmatprep.subr.bf16.mxu1 %v6148_v44  ;;  %3166 = vmatprep.subr.bf16.mxu0 %v6152_v45  ;;  %v480_v15 = vld [vmem:[%s7842_s10 + $0x220] sm:$0xff]  ;;  %v482_v18 = vld [vmem:[%s7842_s10 + $0x230] sm:$0xff]  ;;  %v6171_v19 = vcombine.low %v468_v2, %v472_v3  ;;  %v6175_v21 = vcombine.low %v470_v6, %v474_v7 }
  0xcd   : > { %v814_v16 = vrot.slane %v809_v9, %v7892_v5  ;;  %v6180_v22 = vcombine.high %v476_v14, %v480_v15  ;;  %v6184_v23 = vcombine.high %v478_v17, %v482_v18  ;;  %v484_v24 = vld [vmem:[%s7842_s10 + $0x240] sm:$0xff]  ;;  %v486_v26 = vld [vmem:[%s7842_s10 + $0x250] sm:$0xff]  ;;  %v6179_v28 = vcombine.low %v476_v14, %v480_v15 }
  0xce   : > { %v488_v25 = vld [vmem:[%s7842_s10 + $0x260] sm:$0xff]  ;;  %v490_v27 = vld [vmem:[%s7842_s10 + $0x270] sm:$0xff]  ;;  %v6183_v29 = vcombine.low %v478_v17, %v482_v18 }
  0xcf   : > { %2849 = vmatpush1.bf16.msra.mxu1 %v6147_v51  ;;  %3167 = vmatpush1.bf16.msra.mxu0 %v6151_v52  ;;  %v7905_v20 = vsel %vm837_vm0, %v814_v16, %v7896_v10  ;;  %v6188_v30 = vcombine.high %v484_v24, %v488_v25  ;;  %v6192_v31 = vcombine.high %v486_v26, %v490_v27  ;;  %v492_v32 = vld [vmem:[%s7842_s10 + $0x280] sm:$0xff]  ;;  %v494_v34 = vld [vmem:[%s7842_s10 + $0x290] sm:$0xff] }
  0xd0   : > { %2850 = vmatprep.subr.bf16.mxu1 %v6156_v53  ;;  %3168 = vmatprep.subr.bf16.mxu0 %v6160_v54  ;;  %v496_v33 = vld [vmem:[%s7842_s10 + $0x2a0] sm:$0xff]  ;;  %v498_v35 = vld [vmem:[%s7842_s10 + $0x2b0] sm:$0xff]  ;;  %v6187_v36 = vcombine.low %v484_v24, %v488_v25  ;;  %v6191_v37 = vcombine.low %v486_v26, %v490_v27 }
  0xd1   : > { %2872 = vmatprep.mubr.bf16.mxu1 %v7905_v20  ;;  %3190 = vmatprep.mubr.bf16.mxu0 %v7905_v20  ;;  %v6196_v38 = vcombine.high %v492_v32, %v496_v33  ;;  %v6200_v39 = vcombine.high %v494_v34, %v498_v35  ;;  %v500_v40 = vld [vmem:[%s7842_s10 + $0x2c0] sm:$0xff]  ;;  %v502_v42 = vld [vmem:[%s7842_s10 + $0x2d0] sm:$0xff]  ;;  %v6195_v44 = vcombine.low %v492_v32, %v496_v33 }
  0xd2   : > { %v504_v41 = vld [vmem:[%s7842_s10 + $0x2e0] sm:$0xff]  ;;  %v506_v43 = vld [vmem:[%s7842_s10 + $0x2f0] sm:$0xff]  ;;  %v6199_v45 = vcombine.low %v494_v34, %v498_v35 }
  0xd3   : > { %2851 = vmatpush1.bf16.msra.mxu1 %v6155_v60  ;;  %3169 = vmatpush1.bf16.msra.mxu0 %v6159_v61  ;;  %v6204_v46 = vcombine.high %v500_v40, %v504_v41  ;;  %v6208_v47 = vcombine.high %v502_v42, %v506_v43  ;;  %v508_v48 = vld [vmem:[%s7842_s10 + $0x300] sm:$0xff]  ;;  %v510_v50 = vld [vmem:[%s7842_s10 + $0x310] sm:$0xff]  ;;  %v6203_v52 = vcombine.low %v500_v40, %v504_v41 }
  0xd4   : > { %2852 = vmatprep.subr.bf16.mxu1 %v6164_v62  ;;  %3170 = vmatprep.subr.bf16.mxu0 %v6168_v1  ;;  %v512_v49 = vld [vmem:[%s7842_s10 + $0x320] sm:$0xff]  ;;  %v514_v51 = vld [vmem:[%s7842_s10 + $0x330] sm:$0xff]  ;;  %v6207_v53 = vcombine.low %v502_v42, %v506_v43 }
  0xd5   : > { %v6212_v54 = vcombine.high %v508_v48, %v512_v49  ;;  %v6216_v55 = vcombine.high %v510_v50, %v514_v51  ;;  %v516_v56 = vld [vmem:[%s7842_s10 + $0x340] sm:$0xff]  ;;  %v518_v59 = vld [vmem:[%s7842_s10 + $0x350] sm:$0xff]  ;;  %v6211_v61 = vcombine.low %v508_v48, %v512_v49  ;;  %v6215_v62 = vcombine.low %v510_v50, %v514_v51 }
  0xd6   : > { %v520_v58 = vld [vmem:[%s7842_s10 + $0x360] sm:$0xff]  ;;  %v522_v60 = vld [vmem:[%s7842_s10 + $0x370] sm:$0xff] }
  0xd7   : > { %2853 = vmatpush1.bf16.msra.mxu1 %v6163_v8  ;;  %3171 = vmatpush1.bf16.msra.mxu0 %v6167_v11  ;;  %v6220_v63 = vcombine.high %v516_v56, %v520_v58  ;;  %v404_v0 = vld [vmem:[#allocation11] sm:$0xff]  ;;  %v406_v1 = vld [vmem:[#allocation11 + $0x10] sm:$0xff]  ;;  %v6224_v2 = vcombine.high %v518_v59, %v522_v60  ;;  %v6219_v8 = vcombine.low %v516_v56, %v520_v58  ;;  %v409_v11 = vld [vmem:[#allocation11 + $0x28] sm:$0xff] }
  0xd8   : > { %2854 = vmatprep.subr.bf16.mxu1 %v6172_v12  ;;  %3172 = vmatprep.subr.bf16.mxu0 %v6176_v13  ;;  %v524_v3 = vld [vmem:[%s7842_s10 + $0x380] sm:$0xff]  ;;  %v526_v6 = vld [vmem:[%s7842_s10 + $0x390] sm:$0xff]  ;;  %v797_v9 = vpack.c.bf16 %v406_v1, %v404_v0  ;;  %v6223_v13 = vcombine.low %v518_v59, %v522_v60  ;;  %v865_v60 = vshrl.u32 %v7905_v20, 16 }
  0xd9   : > { %v528_v4 = vld [vmem:[%s7842_s10 + $0x3a0] sm:$0xff]  ;;  %v530_v7 = vld [vmem:[%s7842_s10 + $0x3b0] sm:$0xff] }
  0xda   : > { %v411_v12 = vld [vmem:[#allocation11 + $0x38] sm:$0xff]  ;;  %v6228_v14 = vcombine.high %v524_v3, %v528_v4  ;;  %v6232_v15 = vcombine.high %v526_v6, %v530_v7  ;;  %v532_v16 = vld [vmem:[%s7842_s10 + $0x3c0] sm:$0xff]  ;;  %v6231_v24 = vcombine.low %v526_v6, %v530_v7  ;;  %v408_v26 = vld [vmem:[#allocation11 + $0x20] sm:$0xff] }
  0xdb   : > { %2855 = vmatpush1.bf16.msra.mxu1 %v6171_v19  ;;  %3173 = vmatpush1.bf16.msra.mxu0 %v6175_v21  ;;  %v536_v17 = vld [vmem:[%s7842_s10 + $0x3e0] sm:$0xff]  ;;  %v534_v18 = vld [vmem:[%s7842_s10 + $0x3d0] sm:$0xff]  ;;  %v800_v21 = vpack.c.bf16 %v411_v12, %v409_v11 }
  0xdc   : > { %2856 = vmatprep.subr.bf16.mxu1 %v6180_v22  ;;  %3174 = vmatprep.subr.bf16.mxu0 %v6184_v23  ;;  %v538_v19 = vld [vmem:[%s7842_s10 + $0x3f0] sm:$0xff]  ;;  %v6227_v22 = vcombine.low %v524_v3, %v528_v4  ;;  %v802_v23 = vpack.i.b16 %v797_v9, %v797_v9  ;;  %v6236_v25 = vcombine.high %v532_v16, %v536_v17  ;;  %v410_v27 = vld [vmem:[#allocation11 + $0x30] sm:$0xff] }
  0xdd   : > { %v546_v32 = vld [vmem:[%s7842_s10 + $0x430] sm:$0xff]  ;;  %v823_v33 = vpack.i.b16 %v800_v21, %v800_v21  ;;  %v6235_v34 = vcombine.low %v532_v16, %v536_v17  ;;  %v548_v41 = vld [vmem:[%s7842_s10 + $0x440] sm:$0xff] }
  0xde   : > { %v807_v35 = vrot.slane %v802_v23, %v7892_v5  ;;  %v552_v42 = vld [vmem:[%s7842_s10 + $0x460] sm:$0xff]  ;;  %v550_v43 = vld [vmem:[%s7842_s10 + $0x450] sm:$0xff] }
  0xdf   : > { %2857 = vmatpush1.bf16.msra.mxu1 %v6179_v28  ;;  %3175 = vmatpush1.bf16.msra.mxu0 %v6183_v29  ;;  %v6240_v28 = vcombine.high %v534_v18, %v538_v19  ;;  %v540_v29 = vld [vmem:[%s7842_s10 + $0x400] sm:$0xff]  ;;  %v558_v56 = vld [vmem:[%s7842_s10 + $0x490] sm:$0xff] }
  0xe0   : > { %2858 = vmatprep.subr.bf16.mxu1 %v6188_v30  ;;  %3176 = vmatprep.subr.bf16.mxu0 %v6192_v31  ;;  %v544_v30 = vld [vmem:[%s7842_s10 + $0x420] sm:$0xff]  ;;  %v542_v31 = vld [vmem:[%s7842_s10 + $0x410] sm:$0xff] }
  0xe1   : > { %v6248_v40 = vcombine.high %v542_v31, %v546_v32  ;;  %v6243_v48 = vcombine.low %v540_v29, %v544_v30  ;;  %v6247_v51 = vcombine.low %v542_v31, %v546_v32  ;;  %v562_v58 = vld [vmem:[%s7842_s10 + $0x4b0] sm:$0xff]  ;;  %v564_v0 = vld [vmem:[%s7842_s10 + $0x4c0] sm:$0xff] }
  0xe2   : > { %v568_v1 = vld [vmem:[%s7842_s10 + $0x4e0] sm:$0xff]  ;;  %v566_v7 = vld [vmem:[%s7842_s10 + $0x4d0] sm:$0xff]  ;;  %v6263_v17 = vcombine.low %v558_v56, %v562_v58 }
  0xe3   : > { %2859 = vmatpush1.bf16.msra.mxu1 %v6187_v36  ;;  %3177 = vmatpush1.bf16.msra.mxu0 %v6191_v37  ;;  %v7942_v36 = vrot.slane %v797_v9, 7  ;;  %v799_v37 = vpack.c.bf16 %v410_v27, %v408_v26  ;;  %v6264_v9 = vcombine.high %v558_v56, %v562_v58  ;;  %v584_v26 = vld [vmem:[%s7842_s10 + $0x560] sm:$0xff]  ;;  %v606_v56 = vld [vmem:[%s7842_s10 + $0x610] sm:$0xff] }
  0xe4   : > { %2860 = vmatprep.subr.bf16.mxu1 %v6196_v38  ;;  %3178 = vmatprep.subr.bf16.mxu0 %v6200_v39  ;;  %v6239_v38 = vcombine.low %v534_v18, %v538_v19  ;;  %v6244_v39 = vcombine.high %v540_v29, %v544_v30  ;;  %v6268_v18 = vcombine.high %v564_v0, %v568_v1  ;;  %v574_v19 = vld [vmem:[%s7842_s10 + $0x510] sm:$0xff] }
  0xe5   : > { %v7954_v49 = vsel %vm837_vm0, %v807_v35, %v7942_v36  ;;  %v816_v50 = vpack.i.b16 %v799_v37, %v799_v37  ;;  %v7971_v3 = vrot.slane %v799_v37, 7  ;;  %v582_v29 = vld [vmem:[%s7842_s10 + $0x550] sm:$0xff] }
  0xe6   : > { %9403 = vst [vmem:[#allocation20_spill] sm:$0xff] %v7954_v49  ;;  %v586_v30 = vld [vmem:[%s7842_s10 + $0x570] sm:$0xff] }
  0xe7   : > { %2861 = vmatpush1.bf16.msra.mxu1 %v6195_v44  ;;  %3179 = vmatpush1.bf16.msra.mxu0 %v6199_v45  ;;  %v554_v44 = vld [vmem:[%s7842_s10 + $0x470] sm:$0xff]  ;;  %v828_v45 = vrot.slane %v823_v33, %v7892_v5  ;;  %v588_v33 = vld [vmem:[%s7842_s10 + $0x580] sm:$0xff] }
  0xe8   : > { %2862 = vmatprep.subr.bf16.mxu1 %v6204_v46  ;;  %3180 = vmatprep.subr.bf16.mxu0 %v6208_v47  ;;  %v7949_v46 = vrot.slane %v800_v21, 7  ;;  %v867_v47 = vshll.u32 %v7905_v20, 16  ;;  %v6255_v4 = vcombine.low %v550_v43, %v554_v44  ;;  %v578_v21 = vld [vmem:[%s7842_s10 + $0x530] sm:$0xff] }
  0xe9   : > { %v6280_v31 = vcombine.high %v574_v19, %v578_v21  ;;  %v6279_v35 = vcombine.low %v574_v19, %v578_v21  ;;  %v610_v58 = vld [vmem:[%s7842_s10 + $0x630] sm:$0xff]  ;;  %v632_v19 = vld [vmem:[%s7842_s10 + $0x6e0] sm:$0xff] }
  0xea   : > { %v7963_v59 = vsel %vm837_vm0, %v828_v45, %v7949_v46 }
  0xeb   : > { %2863 = vmatpush1.bf16.msra.mxu1 %v6203_v52  ;;  %3181 = vmatpush1.bf16.msra.mxu0 %v6207_v53  ;;  %v6252_v52 = vcombine.high %v548_v41, %v552_v42  ;;  %v6256_v53 = vcombine.high %v550_v43, %v554_v44  ;;  %9404 = vst [vmem:[#allocation21_spill] sm:$0xff] %v7963_v59  ;;  %v600_v43 = vld [vmem:[%s7842_s10 + $0x5e0] sm:$0xff] }
  0xec   : > { %2864 = vmatprep.subr.bf16.mxu1 %v6212_v54  ;;  %3182 = vmatprep.subr.bf16.mxu0 %v6216_v55  ;;  %v556_v54 = vld [vmem:[%s7842_s10 + $0x480] sm:$0xff]  ;;  %v6287_v44 = vcombine.low %v582_v29, %v586_v30 }
  0xed   : > { %v560_v55 = vld [vmem:[%s7842_s10 + $0x4a0] sm:$0xff] }
  0xee   : > { %v6260_v6 = vcombine.high %v556_v54, %v560_v55 }
  0xef   : > { %2865 = vmatpush1.bf16.msra.mxu1 %v6211_v61  ;;  %3183 = vmatpush1.bf16.msra.mxu0 %v6215_v62  ;;  %v869_v61 = vrot.slane %v867_v47, 1  ;;  %v871_v62 = vshll.u32 %v7896_v10, 16  ;;  %v598_v47 = vld [vmem:[%s7842_s10 + $0x5d0] sm:$0xff] }
  0xf0   : > { %2866 = vmatprep.subr.bf16.mxu1 %v6220_v63  ;;  %3184 = vmatprep.subr.bf16.mxu0 %v6224_v2  ;;  %v6251_v63 = vcombine.low %v548_v41, %v552_v42  ;;  %v821_v2 = vrot.slane %v816_v50, %v7892_v5  ;;  %v596_v42 = vld [vmem:[%s7842_s10 + $0x5c0] sm:$0xff] }
  0xf1   : > { %v870_v11 = vor.u32 %v869_v61, %v865_v60  ;;  %v873_v12 = vrot.slane %v871_v62, 1  ;;  %v6299_v61 = vcombine.low %v596_v42, %v600_v43  ;;  %v612_v62 = vld [vmem:[%s7842_s10 + $0x640] sm:$0xff] }
  0xf2   : > { %v7981_v16 = vsel %vm837_vm0, %v821_v2, %v7971_v3  ;;  %v614_v2 = vld [vmem:[%s7842_s10 + $0x650] sm:$0xff] }
  0xf3   : > { %2867 = vmatpush1.bf16.msra.mxu1 %v6219_v8  ;;  %3185 = vmatpush1.bf16.msra.mxu0 %v6223_v13  ;;  %v570_v8 = vld [vmem:[%s7842_s10 + $0x4f0] sm:$0xff]  ;;  %v6259_v13 = vcombine.low %v556_v54, %v560_v55  ;;  %9405 = vst [vmem:[#allocation22_spill] sm:$0xff] %v7981_v16  ;;  %v7987_v23 = vsel %vm854_vm1, %v870_v11, %v873_v12 }
  0xf4   : > { %2868 = vmatprep.subr.bf16.mxu1 %v6228_v14  ;;  %3186 = vmatprep.subr.bf16.mxu0 %v6232_v15  ;;  %v572_v14 = vld [vmem:[%s7842_s10 + $0x500] sm:$0xff]  ;;  %9406 = vst [vmem:[#allocation23_spill] sm:$0xff] %v7987_v23  ;;  %v6271_v27 = vcombine.low %v566_v7, %v570_v8  ;;  %v6300_v55 = vcombine.high %v596_v42, %v600_v43  ;;  %v650_v42 = vld [vmem:[%s7842_s10 + $0x770] sm:$0xff] }
  0xf5   : > { %v576_v15 = vld [vmem:[%s7842_s10 + $0x520] sm:$0xff]  ;;  %v6311_v11 = vcombine.low %v606_v56, %v610_v58 }
  0xf6   : > { %v6275_v32 = vcombine.low %v572_v14, %v576_v15 }
  0xf7   : > { %2869 = vmatpush1.bf16.msra.mxu1 %v6227_v22  ;;  %3187 = vmatpush1.bf16.msra.mxu0 %v6231_v24  ;;  %v6272_v22 = vcombine.high %v566_v7, %v570_v8  ;;  %v6267_v24 = vcombine.low %v564_v0, %v568_v1  ;;  %v620_v8 = vld [vmem:[%s7842_s10 + $0x680] sm:$0xff] }
  0xf8   : > { %2870 = vmatprep.subr.bf16.mxu1 %v6236_v25  ;;  %3188 = vmatprep.subr.bf16.mxu0 %v6240_v28  ;;  %v580_v25 = vld [vmem:[%s7842_s10 + $0x540] sm:$0xff]  ;;  %v6276_v28 = vcombine.high %v572_v14, %v576_v15  ;;  %v626_v14 = vld [vmem:[%s7842_s10 + $0x6b0] sm:$0xff] }
  0xf9   : > { %v6284_v37 = vcombine.high %v580_v25, %v584_v26  ;;  %v6283_v41 = vcombine.low %v580_v25, %v584_v26  ;;  %v634_v25 = vld [vmem:[%s7842_s10 + $0x6f0] sm:$0xff] }
  0xfb   : > { %2871 = vmatpush1.bf16.msra.mxu1 %v6235_v34  ;;  %3189 = vmatpush1.bf16.msra.mxu0 %v6239_v38  ;;  %v592_v34 = vld [vmem:[%s7842_s10 + $0x5a0] sm:$0xff]  ;;  %v590_v38 = vld [vmem:[%s7842_s10 + $0x590] sm:$0xff] }
  0xfc   : > { %2893 = vmatprep.subr.bf16.mxu1 %v6244_v39  ;;  %3211 = vmatprep.subr.bf16.mxu0 %v6248_v40  ;;  %v594_v39 = vld [vmem:[%s7842_s10 + $0x5b0] sm:$0xff]  ;;  %v6288_v40 = vcombine.high %v582_v29, %v586_v30  ;;  %v6292_v45 = vcombine.high %v588_v33, %v592_v34  ;;  %v640_v29 = vld [vmem:[%s7842_s10 + $0x720] sm:$0xff] }
  0xfd   : > { %v6296_v50 = vcombine.high %v590_v38, %v594_v39  ;;  %v6295_v54 = vcombine.low %v590_v38, %v594_v39  ;;  %v648_v38 = vld [vmem:[%s7842_s10 + $0x760] sm:$0xff] }
  0xfe   : > { %2873 = vmatmul.mubr.bf16.vlgmr.msra.gmra.mrb[0].mxu1 %v7954_v49  ;;  %3191 = vmatmul.mubr.bf16.vlgmr.msra.gmra.mrb[0].mxu0 %v7954_v49 }
  0xff   : > { %2894 = vmatpush1.bf16.msra.mxu1 %v6243_v48  ;;  %3212 = vmatpush1.bf16.msra.mxu0 %v6247_v51  ;;  %v602_v48 = vld [vmem:[%s7842_s10 + $0x5f0] sm:$0xff]  ;;  %v6291_v51 = vcombine.low %v588_v33, %v592_v34 }
 0x100   : > { %2895 = vmatprep.subr.bf16.mxu1 %v6252_v52  ;;  %3213 = vmatprep.subr.bf16.mxu0 %v6256_v53  ;;  %v604_v52 = vld [vmem:[%s7842_s10 + $0x600] sm:$0xff]  ;;  %v6304_v60 = vcombine.high %v598_v47, %v602_v48  ;;  %v6303_v0 = vcombine.low %v598_v47, %v602_v48  ;;  %v642_v33 = vld [vmem:[%s7842_s10 + $0x730] sm:$0xff] }
 0x101   : > { %2882 = vmatprep.mubr.bf16.mxu1 %v7963_v59  ;;  %3200 = vmatprep.mubr.bf16.mxu0 %v7963_v59  ;;  %v608_v53 = vld [vmem:[%s7842_s10 + $0x620] sm:$0xff] }
 0x102   : > { %v6308_v1 = vcombine.high %v604_v52, %v608_v53  ;;  %v6307_v7 = vcombine.low %v604_v52, %v608_v53  ;;  %v656_v47 = vld [vmem:[%s7842_s10 + $0x7a0] sm:$0xff]  ;;  %v658_v52 = vld [vmem:[%s7842_s10 + $0x7b0] sm:$0xff] }
 0x103   : > { %2896 = vmatpush1.bf16.msra.mxu1 %v6251_v63  ;;  %3214 = vmatpush1.bf16.msra.mxu0 %v6255_v4  ;;  %v616_v63 = vld [vmem:[%s7842_s10 + $0x660] sm:$0xff]  ;;  %v618_v4 = vld [vmem:[%s7842_s10 + $0x670] sm:$0xff] }
 0x104   : > { %2897 = vmatprep.subr.bf16.mxu1 %v6260_v6  ;;  %3215 = vmatprep.subr.bf16.mxu0 %v6264_v9  ;;  %v6312_v6 = vcombine.high %v606_v56, %v610_v58  ;;  %v624_v9 = vld [vmem:[%s7842_s10 + $0x6a0] sm:$0xff]  ;;  %v6316_v12 = vcombine.high %v612_v62, %v616_v63  ;;  %v6320_v15 = vcombine.high %v614_v2, %v618_v4  ;;  %v857_v58 = vshll.u32 %v7954_v49, 16 }
 0x105   : > { %v6319_v21 = vcombine.low %v614_v2, %v618_v4  ;;  %v664_v56 = vld [vmem:[%s7842_s10 + $0x7e0] sm:$0xff] }
 0x106   : > { %2883 = vmatmul.mubr.bf16.gmra.mrb[4].mxu1 %v7981_v16  ;;  %3201 = vmatmul.mubr.bf16.gmra.mrb[4].mxu0 %v7981_v16  ;;  %v668_v4 = vld [vmem:[%s7842_s10 + $0x800] sm:$0xff] }
 0x107   : > { %2898 = vmatpush1.bf16.msra.mxu1 %v6259_v13  ;;  %3216 = vmatpush1.bf16.msra.mxu0 %v6263_v17  ;;  %v622_v13 = vld [vmem:[%s7842_s10 + $0x690] sm:$0xff]  ;;  %v6315_v17 = vcombine.low %v612_v62, %v616_v63 }
 0x108   : > { %2899 = vmatprep.subr.bf16.mxu1 %v6268_v18  ;;  %3217 = vmatprep.subr.bf16.mxu0 %v6272_v22  ;;  %v628_v18 = vld [vmem:[%s7842_s10 + $0x6c0] sm:$0xff]  ;;  %v6324_v22 = vcombine.high %v620_v8, %v624_v9  ;;  %v6328_v26 = vcombine.high %v622_v13, %v626_v14  ;;  %v6327_v30 = vcombine.low %v622_v13, %v626_v14  ;;  %v662_v62 = vld [vmem:[%s7842_s10 + $0x7d0] sm:$0xff] }
 0x109   : > { %2925 = vmatprep.mubr.bf16.mxu1 %v7987_v23  ;;  %3243 = vmatprep.mubr.bf16.mxu0 %v7987_v23  ;;  %v666_v63 = vld [vmem:[%s7842_s10 + $0x7f0] sm:$0xff] }
 0x10a   : > { %v670_v13 = vld [vmem:[%s7842_s10 + $0x810] sm:$0xff] }
 0x10b   : > { %2900 = vmatpush1.bf16.msra.mxu1 %v6267_v24  ;;  %3218 = vmatpush1.bf16.msra.mxu0 %v6271_v27  ;;  %v630_v24 = vld [vmem:[%s7842_s10 + $0x6d0] sm:$0xff]  ;;  %v6323_v27 = vcombine.low %v620_v8, %v624_v9  ;;  %v859_v8 = vrot.slane %v857_v58, 1  ;;  %v861_v9 = vshll.u32 %v7942_v36, 16 }
 0x10c   : > { %2901 = vmatprep.subr.bf16.mxu1 %v6276_v28  ;;  %3219 = vmatprep.subr.bf16.mxu0 %v6280_v31  ;;  %v636_v28 = vld [vmem:[%s7842_s10 + $0x700] sm:$0xff]  ;;  %v6332_v31 = vcombine.high %v628_v18, %v632_v19  ;;  %v6336_v34 = vcombine.high %v630_v24, %v634_v25  ;;  %v6335_v39 = vcombine.low %v630_v24, %v634_v25  ;;  %v674_v14 = vld [vmem:[%s7842_s10 + $0x830] sm:$0xff] }
 0x10d   : > { %v863_v24 = vrot.slane %v861_v9, 1  ;;  %v676_v25 = vld [vmem:[%s7842_s10 + $0x840] sm:$0xff]  ;;  %v702_v9 = vld [vmem:[%s7842_s10 + $0x910] sm:$0xff] }
 0x10f   : > { %2902 = vmatpush1.bf16.msra.mxu1 %v6275_v32  ;;  %3220 = vmatpush1.bf16.msra.mxu0 %v6279_v35  ;;  %v638_v32 = vld [vmem:[%s7842_s10 + $0x710] sm:$0xff]  ;;  %v6331_v35 = vcombine.low %v628_v18, %v632_v19  ;;  %v891_v19 = vshll.u32 %v7949_v46, 16 }
 0x110   : > { %2903 = vmatprep.subr.bf16.mxu1 %v6284_v37  ;;  %3221 = vmatprep.subr.bf16.mxu0 %v6288_v40  ;;  %v644_v37 = vld [vmem:[%s7842_s10 + $0x740] sm:$0xff]  ;;  %v6340_v40 = vcombine.high %v636_v28, %v640_v29  ;;  %v6344_v43 = vcombine.high %v638_v32, %v642_v33  ;;  %v6343_v48 = vcombine.low %v638_v32, %v642_v33 }
 0x111   : > { %v6376_v32 = vcombine.high %v670_v13, %v674_v14 }
 0x113   : > { %2904 = vmatpush1.bf16.msra.mxu1 %v6283_v41  ;;  %3222 = vmatpush1.bf16.msra.mxu0 %v6287_v44  ;;  %v646_v41 = vld [vmem:[%s7842_s10 + $0x750] sm:$0xff]  ;;  %v6339_v44 = vcombine.low %v636_v28, %v640_v29  ;;  %v6367_v28 = vcombine.low %v662_v62, %v666_v63 }
 0x114   : > { %2905 = vmatprep.subr.bf16.mxu1 %v6292_v45  ;;  %3223 = vmatprep.subr.bf16.mxu0 %v6296_v50  ;;  %v652_v45 = vld [vmem:[%s7842_s10 + $0x780] sm:$0xff]  ;;  %v6348_v50 = vcombine.high %v644_v37, %v648_v38  ;;  %v6352_v53 = vcombine.high %v646_v41, %v650_v42 }
 0x115   : > { %v6355_v2 = vcombine.low %v652_v45, %v656_v47 }
 0x117   : > { %2906 = vmatpush1.bf16.msra.mxu1 %v6291_v51  ;;  %3224 = vmatpush1.bf16.msra.mxu0 %v6295_v54  ;;  %v654_v51 = vld [vmem:[%s7842_s10 + $0x790] sm:$0xff]  ;;  %v6347_v54 = vcombine.low %v644_v37, %v648_v38  ;;  %v684_v38 = vld [vmem:[%s7842_s10 + $0x880] sm:$0xff] }
 0x118   : > { %2907 = vmatprep.subr.bf16.mxu1 %v6300_v55  ;;  %3225 = vmatprep.subr.bf16.mxu0 %v6304_v60  ;;  %v660_v55 = vld [vmem:[%s7842_s10 + $0x7c0] sm:$0xff]  ;;  %v6351_v60 = vcombine.low %v646_v41, %v650_v42  ;;  %v881_v42 = vshll.u32 %v7971_v3, 16 }
 0x11b   : > { %2908 = vmatpush1.bf16.msra.mxu1 %v6299_v61  ;;  %3226 = vmatpush1.bf16.msra.mxu0 %v6303_v0  ;;  %v6356_v61 = vcombine.high %v652_v45, %v656_v47  ;;  %v6360_v0 = vcombine.high %v654_v51, %v658_v52  ;;  %v686_v45 = vld [vmem:[%s7842_s10 + $0x890] sm:$0xff] }
 0x11c   : > { %2909 = vmatprep.subr.bf16.mxu1 %v6308_v1  ;;  %3227 = vmatprep.subr.bf16.mxu0 %v6312_v6  ;;  %v887_v1 = vshll.u32 %v7963_v59, 16  ;;  %v672_v6 = vld [vmem:[%s7842_s10 + $0x820] sm:$0xff]  ;;  %v690_v47 = vld [vmem:[%s7842_s10 + $0x8b0] sm:$0xff] }
 0x11d   : > { %v6372_v29 = vcombine.high %v668_v4, %v672_v6  ;;  %v6371_v33 = vcombine.low %v668_v4, %v672_v6  ;;  %v704_v4 = vld [vmem:[%s7842_s10 + $0x920] sm:$0xff] }
 0x11e   : > { %v889_v18 = vrot.slane %v887_v1, 1 }
 0x11f   : > { %2910 = vmatpush1.bf16.msra.mxu1 %v6307_v7  ;;  %3228 = vmatpush1.bf16.msra.mxu0 %v6311_v11  ;;  %v855_v7 = vshrl.u32 %v7954_v49, 16  ;;  %v6359_v11 = vcombine.low %v654_v51, %v658_v52  ;;  %v692_v52 = vld [vmem:[%s7842_s10 + $0x8c0] sm:$0xff] }
 0x120   : > { %2911 = vmatprep.subr.bf16.mxu1 %v6316_v12  ;;  %3229 = vmatprep.subr.bf16.mxu0 %v6320_v15  ;;  %v6364_v12 = vcombine.high %v660_v55, %v664_v56  ;;  %v6368_v15 = vcombine.high %v662_v62, %v666_v63  ;;  %v6392_v62 = vcombine.high %v686_v45, %v690_v47  ;;  %v907_v63 = vrot.slane %v7905_v20, 1 }
 0x123   : > { %2912 = vmatpush1.bf16.msra.mxu1 %v6315_v17  ;;  %3230 = vmatpush1.bf16.msra.mxu0 %v6319_v21  ;;  %v885_v17 = vshrl.u32 %v7963_v59, 16  ;;  %v6363_v21 = vcombine.low %v660_v55, %v664_v56  ;;  %v883_v55 = vrot.slane %v881_v42, 1 }
 0x124   : > { %2913 = vmatprep.subr.bf16.mxu1 %v6324_v22  ;;  %3231 = vmatprep.subr.bf16.mxu0 %v6328_v26  ;;  %v860_v22 = vor.u32 %v859_v8, %v855_v7  ;;  %v680_v26 = vld [vmem:[%s7842_s10 + $0x860] sm:$0xff]  ;;  %v6391_v7 = vcombine.low %v686_v45, %v690_v47 }
 0x125   : > { %v6379_v51 = vcombine.low %v676_v25, %v680_v26  ;;  %v732_v47 = vld [vmem:[%s7842_s10 + $0xa00] sm:$0xff] }
 0x126   : > { %v8052_v37 = vsel %vm854_vm1, %v860_v22, %v863_v24 }
 0x127   : > { %2914 = vmatpush1.bf16.msra.mxu1 %v6323_v27  ;;  %3232 = vmatpush1.bf16.msra.mxu0 %v6327_v30  ;;  %v877_v27 = vshll.u32 %v7981_v16, 16  ;;  %v678_v30 = vld [vmem:[%s7842_s10 + $0x850] sm:$0xff]  ;;  %9407 = vst [vmem:[#allocation24_spill] sm:$0xff] %v8052_v37 }
 0x128   : > { %2915 = vmatprep.subr.bf16.mxu1 %v6332_v31  ;;  %3233 = vmatprep.subr.bf16.mxu0 %v6336_v34  ;;  %v682_v31 = vld [vmem:[%s7842_s10 + $0x870] sm:$0xff]  ;;  %v890_v34 = vor.u32 %v889_v18, %v885_v17 }
 0x129   : > { %v879_v41 = vrot.slane %v877_v27, 1  ;;  %v6383_v56 = vcombine.low %v678_v30, %v682_v31 }
 0x12b   : > { %2916 = vmatpush1.bf16.msra.mxu1 %v6331_v35  ;;  %3234 = vmatpush1.bf16.msra.mxu0 %v6335_v39  ;;  %v893_v35 = vrot.slane %v891_v19, 1  ;;  %v688_v39 = vld [vmem:[%s7842_s10 + $0x8a0] sm:$0xff]  ;;  %v710_v19 = vld [vmem:[%s7842_s10 + $0x950] sm:$0xff] }
 0x12c   : > { %2917 = vmatprep.subr.bf16.mxu1 %v6340_v40  ;;  %3235 = vmatprep.subr.bf16.mxu0 %v6344_v43  ;;  %v875_v40 = vshrl.u32 %v7981_v16, 16  ;;  %v6375_v43 = vcombine.low %v670_v13, %v674_v14  ;;  %v6388_v58 = vcombine.high %v684_v38, %v688_v39  ;;  %v6387_v1 = vcombine.low %v684_v38, %v688_v39  ;;  %v708_v14 = vld [vmem:[%s7842_s10 + $0x940] sm:$0xff] }
 0x12d   : > { %v724_v38 = vld [vmem:[%s7842_s10 + $0x9c0] sm:$0xff] }
 0x12e   : > { %v728_v39 = vld [vmem:[%s7842_s10 + $0x9e0] sm:$0xff] }
 0x12f   : > { %2918 = vmatpush1.bf16.msra.mxu1 %v6339_v44  ;;  %3236 = vmatpush1.bf16.msra.mxu0 %v6343_v48  ;;  %v6380_v44 = vcombine.high %v676_v25, %v680_v26  ;;  %v6384_v48 = vcombine.high %v678_v30, %v682_v31  ;;  %v718_v30 = vld [vmem:[%s7842_s10 + $0x990] sm:$0xff] }
 0x130   : > { %2919 = vmatprep.subr.bf16.mxu1 %v6348_v50  ;;  %3237 = vmatprep.subr.bf16.mxu0 %v6352_v53  ;;  %v8062_v50 = vsel %vm854_vm1, %v890_v34, %v893_v35  ;;  %v696_v53 = vld [vmem:[%s7842_s10 + $0x8e0] sm:$0xff]  ;;  %v722_v31 = vld [vmem:[%s7842_s10 + $0x9b0] sm:$0xff] }
 0x131   : > { %9408 = vst [vmem:[#allocation25_spill] sm:$0xff] %v8062_v50  ;;  %v6396_v8 = vcombine.high %v692_v52, %v696_v53  ;;  %v6395_v13 = vcombine.low %v692_v52, %v696_v53  ;;  %v6424_v35 = vcombine.high %v718_v30, %v722_v31  ;;  %v738_v52 = vld [vmem:[%s7842_s10 + $0xa30] sm:$0xff]  ;;  %v6427_v53 = vcombine.low %v724_v38, %v728_v39 }
 0x133   : > { %2920 = vmatpush1.bf16.msra.mxu1 %v6347_v54  ;;  %3238 = vmatpush1.bf16.msra.mxu0 %v6351_v60  ;;  %v880_v54 = vor.u32 %v879_v41, %v875_v40  ;;  %v694_v60 = vld [vmem:[%s7842_s10 + $0x8d0] sm:$0xff] }
 0x134   : > { %2921 = vmatprep.subr.bf16.mxu1 %v6356_v61  ;;  %3239 = vmatprep.subr.bf16.mxu0 %v6360_v0  ;;  %v698_v61 = vld [vmem:[%s7842_s10 + $0x8f0] sm:$0xff]  ;;  %v908_v0 = vrot.slane %v7896_v10, 1 }
 0x135   : > { %v8076_v6 = vsel %vm854_vm1, %v880_v54, %v883_v55  ;;  %v6400_v10 = vcombine.high %v694_v60, %v698_v61  ;;  %v6399_v17 = vcombine.low %v694_v60, %v698_v61  ;;  %v726_v40 = vld [vmem:[%s7842_s10 + $0x9d0] sm:$0xff]  ;;  %v744_v60 = vld [vmem:[%s7842_s10 + $0xa60] sm:$0xff] }
 0x136   : > { %9409 = vst [vmem:[#allocation26_spill] sm:$0xff] %v8076_v6  ;;  %v730_v41 = vld [vmem:[%s7842_s10 + $0x9f0] sm:$0xff] }
 0x137   : > { %2922 = vmatpush1.bf16.msra.mxu1 %v6355_v2  ;;  %3240 = vmatpush1.bf16.msra.mxu0 %v6359_v11  ;;  %v700_v2 = vld [vmem:[%s7842_s10 + $0x900] sm:$0xff]  ;;  %v706_v11 = vld [vmem:[%s7842_s10 + $0x930] sm:$0xff]  ;;  %v6432_v45 = vcombine.high %v726_v40, %v730_v41  ;;  %v6431_v54 = vcombine.low %v726_v40, %v730_v41 }
 0x138   : > { %2923 = vmatprep.subr.bf16.mxu1 %v6364_v12  ;;  %3241 = vmatprep.subr.bf16.mxu0 %v6368_v15  ;;  %v8082_v12 = vsel %vm903_vm2, %v907_v63, %v908_v0  ;;  %v712_v15 = vld [vmem:[%s7842_s10 + $0x960] sm:$0xff]  ;;  %v6404_v18 = vcombine.high %v700_v2, %v704_v4  ;;  %v6408_v22 = vcombine.high %v702_v9, %v706_v11  ;;  %v742_v61 = vld [vmem:[%s7842_s10 + $0xa50] sm:$0xff] }
 0x139   : > { %9410 = vst [vmem:[#allocation27_spill] sm:$0xff] %v8082_v12  ;;  %v6403_v24 = vcombine.low %v700_v2, %v704_v4  ;;  %v6407_v25 = vcombine.low %v702_v9, %v706_v11  ;;  %v6412_v26 = vcombine.high %v708_v14, %v712_v15  ;;  %v748_v4 = vld [vmem:[%s7842_s10 + $0xa80] sm:$0xff]  ;;  %v754_v9 = vld [vmem:[%s7842_s10 + $0xab0] sm:$0xff] }
 0x13b   : > { %2924 = vmatpush1.bf16.msra.mxu1 %v6363_v21  ;;  %3242 = vmatpush1.bf16.msra.mxu0 %v6367_v28  ;;  %v714_v21 = vld [vmem:[%s7842_s10 + $0x970] sm:$0xff]  ;;  %v716_v28 = vld [vmem:[%s7842_s10 + $0x980] sm:$0xff] }
 0x13c   : > { %2946 = vmatprep.subr.bf16.mxu1 %v6372_v29  ;;  %3264 = vmatprep.subr.bf16.mxu0 %v6376_v32  ;;  %v6416_v27 = vcombine.high %v710_v19, %v714_v21  ;;  %v720_v29 = vld [vmem:[%s7842_s10 + $0x9a0] sm:$0xff]  ;;  %v6411_v32 = vcombine.low %v708_v14, %v712_v15 }
 0x13d   : > { %v6420_v34 = vcombine.high %v716_v28, %v720_v29  ;;  %v6419_v42 = vcombine.low %v716_v28, %v720_v29  ;;  %v756_v15 = vld [vmem:[%s7842_s10 + $0xac0] sm:$0xff]  ;;  %v766_v28 = vld [vmem:[%s7842_s10 + $0xb10] sm:$0xff] }
 0x13e   : > { %2926 = vmatmul.mubr.bf16.vlgmr.msra.gmra.mrb[0].mxu1 %v8052_v37  ;;  %3244 = vmatmul.mubr.bf16.vlgmr.msra.gmra.mrb[0].mxu0 %v8052_v37  ;;  %v770_v29 = vld [vmem:[%s7842_s10 + $0xb30] sm:$0xff] }
 0x13f   : > { %2947 = vmatpush1.bf16.msra.mxu1 %v6371_v33  ;;  %3265 = vmatpush1.bf16.msra.mxu0 %v6375_v43  ;;  %v6415_v33 = vcombine.low %v710_v19, %v714_v21  ;;  %v6423_v43 = vcombine.low %v718_v30, %v722_v31  ;;  %v762_v19 = vld [vmem:[%s7842_s10 + $0xaf0] sm:$0xff]  ;;  %v6471_v41 = vcombine.low %v766_v28, %v770_v29 }
 0x140   : > { %2948 = vmatprep.subr.bf16.mxu1 %v6380_v44  ;;  %3266 = vmatprep.subr.bf16.mxu0 %v6384_v48  ;;  %v6428_v44 = vcombine.high %v724_v38, %v728_v39  ;;  %v736_v48 = vld [vmem:[%s7842_s10 + $0xa20] sm:$0xff]  ;;  %v774_v38 = vld [vmem:[%s7842_s10 + $0xb50] sm:$0xff] }
 0x141   : > { %2935 = vmatprep.mubr.bf16.mxu1 %v8062_v50  ;;  %3253 = vmatprep.mubr.bf16.mxu0 %v8062_v50  ;;  %v6436_v55 = vcombine.high %v732_v47, %v736_v48  ;;  %v6435_v63 = vcombine.low %v732_v47, %v736_v48  ;;  %v778_v39 = vld [vmem:[%s7842_s10 + $0xb70] sm:$0xff] }
 0x142   : > { %v782_v47 = vld [vmem:[%s7842_s10 + $0xb90] sm:$0xff] }
 0x143   : > { %2949 = vmatpush1.bf16.msra.mxu1 %v6379_v51  ;;  %3267 = vmatpush1.bf16.msra.mxu0 %v6383_v56  ;;  %v734_v51 = vld [vmem:[%s7842_s10 + $0xa10] sm:$0xff] }
 0x144   : > { %2950 = vmatprep.subr.bf16.mxu1 %v6388_v58  ;;  %3268 = vmatprep.subr.bf16.mxu0 %v6392_v62  ;;  %v6440_v56 = vcombine.high %v734_v51, %v738_v52  ;;  %v740_v58 = vld [vmem:[%s7842_s10 + $0xa40] sm:$0xff]  ;;  %v746_v62 = vld [vmem:[%s7842_s10 + $0xa70] sm:$0xff]  ;;  %v6439_v0 = vcombine.low %v734_v51, %v738_v52  ;;  %v6479_v52 = vcombine.low %v774_v38, %v778_v39 }
 0x145   : > { %v6448_v2 = vcombine.high %v742_v61, %v746_v62  ;;  %v6443_v11 = vcombine.low %v740_v58, %v744_v60  ;;  %v786_v48 = vld [vmem:[%s7842_s10 + $0xbb0] sm:$0xff] }
 0x146   : > { %2936 = vmatmul.mubr.bf16.gmra.mrb[4].mxu1 %v8076_v6  ;;  %3254 = vmatmul.mubr.bf16.gmra.mrb[4].mxu0 %v8076_v6 }
 0x147   : > { %2951 = vmatpush1.bf16.msra.mxu1 %v6387_v1  ;;  %3269 = vmatpush1.bf16.msra.mxu0 %v6391_v7  ;;  %v6444_v1 = vcombine.high %v740_v58, %v744_v60  ;;  %v752_v7 = vld [vmem:[%s7842_s10 + $0xaa0] sm:$0xff]  ;;  %v790_v58 = vld [vmem:[%s7842_s10 + $0xbd0] sm:$0xff] }
 0x148   : > { %2952 = vmatprep.subr.bf16.mxu1 %v6396_v8  ;;  %3270 = vmatprep.subr.bf16.mxu0 %v6400_v10  ;;  %v750_v8 = vld [vmem:[%s7842_s10 + $0xa90] sm:$0xff]  ;;  %v6447_v10 = vcombine.low %v742_v61, %v746_v62  ;;  %v6451_v21 = vcombine.low %v748_v4, %v752_v7  ;;  %v6487_v62 = vcombine.low %v782_v47, %v786_v48 }
 0x149   : > { %2978 = vmatprep.mubr.bf16.mxu1 %v8082_v12  ;;  %3296 = vmatprep.mubr.bf16.mxu0 %v8082_v12  ;;  %v6456_v14 = vcombine.high %v750_v8, %v754_v9  ;;  %v794_v60 = vld [vmem:[%s7842_s10 + $0xbf0] sm:$0xff] }
 0x14b   : > { %2953 = vmatpush1.bf16.msra.mxu1 %v6395_v13  ;;  %3271 = vmatpush1.bf16.msra.mxu0 %v6399_v17  ;;  %v6452_v13 = vcombine.high %v748_v4, %v752_v7  ;;  %v760_v17 = vld [vmem:[%s7842_s10 + $0xae0] sm:$0xff]  ;;  %v904_v7 = vrot.slane %v7954_v49, 1 }
 0x14c   : > { %2954 = vmatprep.subr.bf16.mxu1 %v6404_v18  ;;  %3272 = vmatprep.subr.bf16.mxu0 %v6408_v22  ;;  %v758_v18 = vld [vmem:[%s7842_s10 + $0xad0] sm:$0xff]  ;;  %v6455_v22 = vcombine.low %v750_v8, %v754_v9  ;;  %v6459_v30 = vcombine.low %v756_v15, %v760_v17  ;;  %v905_v8 = vrot.slane %v7942_v36, 1  ;;  %v6495_v9 = vcombine.low %v790_v58, %v794_v60 }
 0x14d   : > { %v6463_v31 = vcombine.low %v758_v18, %v762_v19 }
 0x14f   : > { %2955 = vmatpush1.bf16.msra.mxu1 %v6403_v24  ;;  %3273 = vmatpush1.bf16.msra.mxu0 %v6407_v25  ;;  %v6460_v24 = vcombine.high %v756_v15, %v760_v17  ;;  %v6464_v25 = vcombine.high %v758_v18, %v762_v19  ;;  %v914_v15 = vrot.slane %v7949_v46, 1  ;;  %v8140_v17 = vsel %vm903_vm2, %v904_v7, %v905_v8 }
 0x150   : > { %2956 = vmatprep.subr.bf16.mxu1 %v6412_v26  ;;  %3274 = vmatprep.subr.bf16.mxu0 %v6416_v27  ;;  %v764_v26 = vld [vmem:[%s7842_s10 + $0xb00] sm:$0xff]  ;;  %9411 = vst [vmem:[#allocation28_spill] sm:$0xff] %v8140_v17 }
 0x151   : > { %v768_v27 = vld [vmem:[%s7842_s10 + $0xb20] sm:$0xff] }
 0x152   : > { %v6467_v40 = vcombine.low %v764_v26, %v768_v27 }
 0x153   : > { %2957 = vmatpush1.bf16.msra.mxu1 %v6411_v32  ;;  %3275 = vmatpush1.bf16.msra.mxu0 %v6415_v33  ;;  %v6468_v32 = vcombine.high %v764_v26, %v768_v27  ;;  %v6472_v33 = vcombine.high %v766_v28, %v770_v29  ;;  %v437_v27 = vld [vmem:[%s7842_s10 + $0xc8] sm:$0xff] }
 0x154   : > { %2958 = vmatprep.subr.bf16.mxu1 %v6420_v34  ;;  %3276 = vmatprep.subr.bf16.mxu0 %v6424_v35  ;;  %v772_v34 = vld [vmem:[%s7842_s10 + $0xb40] sm:$0xff]  ;;  %v441_v28 = vld [vmem:[%s7842_s10 + $0xe8] sm:$0xff] }
 0x155   : > { %v776_v35 = vld [vmem:[%s7842_s10 + $0xb60] sm:$0xff] }
 0x156   : > { %v6475_v51 = vcombine.low %v772_v34, %v776_v35 }
 0x157   : > { %2959 = vmatpush1.bf16.msra.mxu1 %v6419_v42  ;;  %3277 = vmatpush1.bf16.msra.mxu0 %v6423_v43  ;;  %v6476_v42 = vcombine.high %v772_v34, %v776_v35  ;;  %v6480_v43 = vcombine.high %v774_v38, %v778_v39  ;;  %v453_v35 = vld [vmem:[%s7842_s10 + $0x148] sm:$0xff] }
 0x158   : > { %2960 = vmatprep.subr.bf16.mxu1 %v6428_v44  ;;  %3278 = vmatprep.subr.bf16.mxu0 %v6432_v45  ;;  %v780_v44 = vld [vmem:[%s7842_s10 + $0xb80] sm:$0xff]  ;;  %v457_v38 = vld [vmem:[%s7842_s10 + $0x168] sm:$0xff] }
 0x159   : > { %v784_v45 = vld [vmem:[%s7842_s10 + $0xba0] sm:$0xff] }
 0x15a   : > { %v6483_v61 = vcombine.low %v780_v44, %v784_v45 }
 0x15b   : > { %2961 = vmatpush1.bf16.msra.mxu1 %v6427_v53  ;;  %3279 = vmatpush1.bf16.msra.mxu0 %v6431_v54  ;;  %v6484_v53 = vcombine.high %v780_v44, %v784_v45  ;;  %v6488_v54 = vcombine.high %v782_v47, %v786_v48  ;;  %v469_v45 = vld [vmem:[%s7842_s10 + $0x1c8] sm:$0xff] }
 0x15c   : > { %2962 = vmatprep.subr.bf16.mxu1 %v6436_v55  ;;  %3280 = vmatprep.subr.bf16.mxu0 %v6440_v56  ;;  %v788_v55 = vld [vmem:[%s7842_s10 + $0xbc0] sm:$0xff]  ;;  %v473_v47 = vld [vmem:[%s7842_s10 + $0x1e8] sm:$0xff] }
 0x15d   : > { %v792_v56 = vld [vmem:[%s7842_s10 + $0xbe0] sm:$0xff] }
 0x15e   : > { %v6491_v4 = vcombine.low %v788_v55, %v792_v56 }
 0x15f   : > { %2963 = vmatpush1.bf16.msra.mxu1 %v6435_v63  ;;  %3281 = vmatpush1.bf16.msra.mxu0 %v6439_v0  ;;  %v6492_v63 = vcombine.high %v788_v55, %v792_v56  ;;  %v6496_v0 = vcombine.high %v790_v58, %v794_v60  ;;  %v485_v56 = vld [vmem:[%s7842_s10 + $0x248] sm:$0xff] }
 0x160   : > { %2964 = vmatprep.subr.bf16.mxu1 %v6444_v1  ;;  %3282 = vmatprep.subr.bf16.mxu0 %v6448_v2  ;;  %v413_v1 = vld [vmem:[%s7842_s10 + $0x8] sm:$0xff] }
 0x161   : > { %v417_v2 = vld [vmem:[%s7842_s10 + $0x28] sm:$0xff] }
 0x162   : > { %v6117_v18 = vcombine.low %v413_v1, %v417_v2  ;;  %v489_v58 = vld [vmem:[%s7842_s10 + $0x268] sm:$0xff] }
 0x163   : > { %2965 = vmatpush1.bf16.msra.mxu1 %v6443_v11  ;;  %3283 = vmatpush1.bf16.msra.mxu0 %v6447_v10  ;;  %v6118_v11 = vcombine.high %v413_v1, %v417_v2  ;;  %v421_v10 = vld [vmem:[%s7842_s10 + $0x48] sm:$0xff] }
 0x164   : > { %2966 = vmatprep.subr.bf16.mxu1 %v6452_v13  ;;  %3284 = vmatprep.subr.bf16.mxu0 %v6456_v14  ;;  %v425_v13 = vld [vmem:[%s7842_s10 + $0x68] sm:$0xff]  ;;  %v913_v14 = vrot.slane %v7963_v59, 1 }
 0x165   : > { %v6126_v36 = vcombine.high %v421_v10, %v425_v13  ;;  %v6125_v46 = vcombine.low %v421_v10, %v425_v13  ;;  %v501_v2 = vld [vmem:[%s7842_s10 + $0x2c8] sm:$0xff] }
 0x166   : > { %v8143_v19 = vsel %vm903_vm2, %v913_v14, %v914_v15  ;;  %v517_v14 = vld [vmem:[%s7842_s10 + $0x348] sm:$0xff] }
 0x167   : > { %2967 = vmatpush1.bf16.msra.mxu1 %v6451_v21  ;;  %3285 = vmatpush1.bf16.msra.mxu0 %v6455_v22  ;;  %9412 = vst [vmem:[#allocation29_spill] sm:$0xff] %v8143_v19  ;;  %v429_v21 = vld [vmem:[%s7842_s10 + $0x88] sm:$0xff] }
 0x168   : > { %2968 = vmatprep.subr.bf16.mxu1 %v6460_v24  ;;  %3286 = vmatprep.subr.bf16.mxu0 %v6464_v25  ;;  %v433_v22 = vld [vmem:[%s7842_s10 + $0xa8] sm:$0xff]  ;;  %v910_v24 = vrot.slane %v7981_v16, 1  ;;  %v911_v25 = vrot.slane %v7971_v3, 1 }
 0x169   : > { %v6134_v26 = vcombine.high %v429_v21, %v433_v22  ;;  %v449_v3 = vld [vmem:[%s7842_s10 + $0x128] sm:$0xff] }
 0x16a   : > { %v8156_v29 = vsel %vm903_vm2, %v910_v24, %v911_v25  ;;  %v521_v15 = vld [vmem:[%s7842_s10 + $0x368] sm:$0xff] }
 0x16b   : > { %2969 = vmatpush1.bf16.msra.mxu1 %v6459_v30  ;;  %3287 = vmatpush1.bf16.msra.mxu0 %v6463_v31  ;;  %9413 = vst [vmem:[#allocation30_spill] sm:$0xff] %v8156_v29  ;;  %v6133_v30 = vcombine.low %v429_v21, %v433_v22  ;;  %v6142_v31 = vcombine.high %v437_v27, %v441_v28  ;;  %v525_v21 = vld [vmem:[%s7842_s10 + $0x388] sm:$0xff] }
 0x16c   : > { %2970 = vmatprep.subr.bf16.mxu1 %v6468_v32  ;;  %3288 = vmatprep.subr.bf16.mxu0 %v6472_v33  ;;  %v445_v32 = vld [vmem:[%s7842_s10 + $0x108] sm:$0xff]  ;;  %v6141_v33 = vcombine.low %v437_v27, %v441_v28 }
 0x16d   : > { %v6150_v34 = vcombine.high %v445_v32, %v449_v3  ;;  %v6149_v39 = vcombine.low %v445_v32, %v449_v3  ;;  %v529_v22 = vld [vmem:[%s7842_s10 + $0x3a8] sm:$0xff] }
 0x16e   : > { %v6230_v24 = vcombine.high %v525_v21, %v529_v22  ;;  %v533_v25 = vld [vmem:[%s7842_s10 + $0x3c8] sm:$0xff]  ;;  %v6229_v27 = vcombine.low %v525_v21, %v529_v22 }
 0x16f   : > { %2971 = vmatpush1.bf16.msra.mxu1 %v6467_v40  ;;  %3289 = vmatpush1.bf16.msra.mxu0 %v6471_v41  ;;  %v6158_v40 = vcombine.high %v453_v35, %v457_v38  ;;  %v461_v41 = vld [vmem:[%s7842_s10 + $0x188] sm:$0xff] }
 0x170   : > { %2972 = vmatprep.subr.bf16.mxu1 %v6476_v42  ;;  %3290 = vmatprep.subr.bf16.mxu0 %v6480_v43  ;;  %v465_v42 = vld [vmem:[%s7842_s10 + $0x1a8] sm:$0xff]  ;;  %v6157_v43 = vcombine.low %v453_v35, %v457_v38 }
 0x171   : > { %v6166_v44 = vcombine.high %v461_v41, %v465_v42  ;;  %v6165_v48 = vcombine.low %v461_v41, %v465_v42 }
 0x173   : > { %2973 = vmatpush1.bf16.msra.mxu1 %v6475_v51  ;;  %3291 = vmatpush1.bf16.msra.mxu0 %v6479_v52  ;;  %v6174_v51 = vcombine.high %v469_v45, %v473_v47  ;;  %v477_v52 = vld [vmem:[%s7842_s10 + $0x208] sm:$0xff] }
 0x174   : > { %2974 = vmatprep.subr.bf16.mxu1 %v6484_v53  ;;  %3292 = vmatprep.subr.bf16.mxu0 %v6488_v54  ;;  %v481_v53 = vld [vmem:[%s7842_s10 + $0x228] sm:$0xff]  ;;  %v6173_v54 = vcombine.low %v469_v45, %v473_v47 }
 0x175   : > { %v6182_v55 = vcombine.high %v477_v52, %v481_v53  ;;  %v6181_v60 = vcombine.low %v477_v52, %v481_v53 }
 0x177   : > { %2975 = vmatpush1.bf16.msra.mxu1 %v6483_v61  ;;  %3293 = vmatpush1.bf16.msra.mxu0 %v6487_v62  ;;  %v6190_v61 = vcombine.high %v485_v56, %v489_v58  ;;  %v493_v62 = vld [vmem:[%s7842_s10 + $0x288] sm:$0xff] }
 0x178   : > { %2976 = vmatprep.subr.bf16.mxu1 %v6492_v63  ;;  %3294 = vmatprep.subr.bf16.mxu0 %v6496_v0  ;;  %v497_v63 = vld [vmem:[%s7842_s10 + $0x2a8] sm:$0xff]  ;;  %v6189_v0 = vcombine.low %v485_v56, %v489_v58 }
 0x179   : > { %v6198_v1 = vcombine.high %v493_v62, %v497_v63  ;;  %v6197_v7 = vcombine.low %v493_v62, %v497_v63 }
 0x17b   : > { %2977 = vmatpush1.bf16.msra.mxu1 %v6491_v4  ;;  %3295 = vmatpush1.bf16.msra.mxu0 %v6495_v9  ;;  %v505_v4 = vld [vmem:[%s7842_s10 + $0x2e8] sm:$0xff] }
 0x17c   : > { %2999 = vmatprep.subr.bf16.mxu1 %v6118_v11  ;;  %v6206_v8 = vcombine.high %v501_v2, %v505_v4  ;;  %v509_v9 = vld [vmem:[%s7842_s10 + $0x308] sm:$0xff]  ;;  %v6205_v10 = vcombine.low %v501_v2, %v505_v4 }
 0x17d   : > { %v513_v11 = vld [vmem:[%s7842_s10 + $0x328] sm:$0xff] }
 0x17e   : > { %2979 = vmatmul.mubr.bf16.vlgmr.msra.gmra.mrb[0].mxu1 %v8140_v17  ;;  %3297 = vmatmul.mubr.bf16.vlgmr.msra.gmra.mrb[0].mxu0 %v8140_v17  ;;  %v6214_v13 = vcombine.high %v509_v9, %v513_v11 }
 0x17f   : > { %3000 = vmatpush1.bf16.msra.mxu1 %v6117_v18  ;;  %2988 = vmatprep.mubr.bf16.mxu1 %v8143_v19  ;;  %v6213_v18 = vcombine.low %v509_v9, %v513_v11 }
 0x180   : > { %3001 = vmatprep.subr.bf16.mxu1 %v6126_v36  ;;  %3306 = vmatprep.mubr.bf16.mxu0 %v8143_v19  ;;  %v6222_v36 = vcombine.high %v517_v14, %v521_v15 }
 0x183   : > { %3002 = vmatpush1.bf16.msra.mxu1 %v6125_v46  ;;  %v6221_v46 = vcombine.low %v517_v14, %v521_v15 }
 0x184   : > { %3003 = vmatprep.subr.bf16.mxu1 %v6134_v26  ;;  %v537_v26 = vld [vmem:[%s7842_s10 + $0x3e8] sm:$0xff] }
 0x185   : > { %v6238_v28 = vcombine.high %v533_v25, %v537_v26  ;;  %v6237_v32 = vcombine.low %v533_v25, %v537_v26 }
 0x186   : > { %2989 = vmatmul.mubr.bf16.gmra.mrb[4].mxu1 %v8156_v29  ;;  %3307 = vmatmul.mubr.bf16.gmra.mrb[4].mxu0 %v8156_v29 }
 0x187   : > { %3004 = vmatpush1.bf16.msra.mxu1 %v6133_v30  ;;  %3031 = vmatprep.mubr.bf16.mxu1 %v7905_v20  ;;  %v541_v30 = vld [vmem:[%s7842_s10 + $0x408] sm:$0xff] }
 0x188   : > { %3005 = vmatprep.subr.bf16.mxu1 %v6142_v31  ;;  %v545_v31 = vld [vmem:[%s7842_s10 + $0x428] sm:$0xff] }
 0x189   : > { %v6246_v3 = vcombine.high %v541_v30, %v545_v31  ;;  %v6245_v35 = vcombine.low %v541_v30, %v545_v31 }
 0x18b   : > { %3006 = vmatpush1.bf16.msra.mxu1 %v6141_v33  ;;  %v549_v33 = vld [vmem:[%s7842_s10 + $0x448] sm:$0xff] }
 0x18c   : > { %3007 = vmatprep.subr.bf16.mxu1 %v6150_v34  ;;  %v553_v34 = vld [vmem:[%s7842_s10 + $0x468] sm:$0xff] }
 0x18d   : > { %v6254_v38 = vcombine.high %v549_v33, %v553_v34  ;;  %v6253_v41 = vcombine.low %v549_v33, %v553_v34 }
 0x18f   : > { %3008 = vmatpush1.bf16.msra.mxu1 %v6149_v39  ;;  %v557_v39 = vld [vmem:[%s7842_s10 + $0x488] sm:$0xff] }
 0x190   : > { %3009 = vmatprep.subr.bf16.mxu1 %v6158_v40  ;;  %v561_v40 = vld [vmem:[%s7842_s10 + $0x4a8] sm:$0xff] }
 0x191   : > { %v6262_v42 = vcombine.high %v557_v39, %v561_v40  ;;  %v6261_v45 = vcombine.low %v557_v39, %v561_v40 }
 0x193   : > { %3010 = vmatpush1.bf16.msra.mxu1 %v6157_v43  ;;  %v565_v43 = vld [vmem:[%s7842_s10 + $0x4c8] sm:$0xff] }
 0x194   : > { %3011 = vmatprep.subr.bf16.mxu1 %v6166_v44  ;;  %v569_v44 = vld [vmem:[%s7842_s10 + $0x4e8] sm:$0xff] }
 0x195   : > { %v6270_v47 = vcombine.high %v565_v43, %v569_v44  ;;  %v6269_v52 = vcombine.low %v565_v43, %v569_v44 }
 0x197   : > { %3012 = vmatpush1.bf16.msra.mxu1 %v6165_v48  ;;  %v573_v48 = vld [vmem:[%s7842_s10 + $0x508] sm:$0xff] }
 0x198   : > { %3013 = vmatprep.subr.bf16.mxu1 %v6174_v51  ;;  %v577_v51 = vld [vmem:[%s7842_s10 + $0x528] sm:$0xff] }
 0x199   : > { %v6278_v53 = vcombine.high %v573_v48, %v577_v51  ;;  %v6277_v56 = vcombine.low %v573_v48, %v577_v51 }
 0x19b   : > { %3014 = vmatpush1.bf16.msra.mxu1 %v6173_v54  ;;  %v581_v54 = vld [vmem:[%s7842_s10 + $0x548] sm:$0xff] }
 0x19c   : > { %3015 = vmatprep.subr.bf16.mxu1 %v6182_v55  ;;  %v585_v55 = vld [vmem:[%s7842_s10 + $0x568] sm:$0xff] }
 0x19d   : > { %v6286_v58 = vcombine.high %v581_v54, %v585_v55  ;;  %v6285_v62 = vcombine.low %v581_v54, %v585_v55 }
 0x19f   : > { %3016 = vmatpush1.bf16.msra.mxu1 %v6181_v60  ;;  %v589_v60 = vld [vmem:[%s7842_s10 + $0x588] sm:$0xff] }
 0x1a0   : > { %3017 = vmatprep.subr.bf16.mxu1 %v6190_v61  ;;  %v593_v61 = vld [vmem:[%s7842_s10 + $0x5a8] sm:$0xff] }
 0x1a1   : > { %v6294_v63 = vcombine.high %v589_v60, %v593_v61  ;;  %v6293_v2 = vcombine.low %v589_v60, %v593_v61 }
 0x1a3   : > { %3018 = vmatpush1.bf16.msra.mxu1 %v6189_v0  ;;  %v597_v0 = vld [vmem:[%s7842_s10 + $0x5c8] sm:$0xff] }
 0x1a4   : > { %3019 = vmatprep.subr.bf16.mxu1 %v6198_v1  ;;  %v601_v1 = vld [vmem:[%s7842_s10 + $0x5e8] sm:$0xff] }
 0x1a5   : > { %v6302_v4 = vcombine.high %v597_v0, %v601_v1  ;;  %v6301_v9 = vcombine.low %v597_v0, %v601_v1  ;;  %v6921_v0 = vld [vmem:[%s7850_s17 + $0x4] ss:$8 sps:$4 sm:$0xff]   ;;  %v6919_v1 = vld [vmem:[%s7850_s17] ss:$8 sps:$4 sm:$0xff]  }
 0x1a6   : > { %5486 = vmatprep.subr.bf16.mxu0 %v6921_v0 }
 0x1a7   : > { %3020 = vmatpush1.bf16.msra.mxu1 %v6197_v7  ;;  %v605_v7 = vld [vmem:[%s7842_s10 + $0x608] sm:$0xff]  ;;  %5487 = vmatpush1.bf16.msra.mxu0 %v6919_v1 }
 0x1a8   : > { %3021 = vmatprep.subr.bf16.mxu1 %v6206_v8  ;;  %v609_v8 = vld [vmem:[%s7842_s10 + $0x628] sm:$0xff] }
 0x1a9   : > { %v6310_v11 = vcombine.high %v605_v7, %v609_v8  ;;  %v6309_v14 = vcombine.low %v605_v7, %v609_v8  ;;  %v701_v7 = vld [vmem:[%s7842_s10 + $0x908] sm:$0xff] }
 0x1aa   : > { %v705_v8 = vld [vmem:[%s7842_s10 + $0x928] sm:$0xff] }
 0x1ab   : > { %3022 = vmatpush1.bf16.msra.mxu1 %v6205_v10  ;;  %v613_v10 = vld [vmem:[%s7842_s10 + $0x648] sm:$0xff] }
 0x1ac   : > { %3023 = vmatprep.subr.bf16.mxu1 %v6214_v13  ;;  %v617_v13 = vld [vmem:[%s7842_s10 + $0x668] sm:$0xff] }
 0x1ad   : > { %v6318_v15 = vcombine.high %v613_v10, %v617_v13  ;;  %v6317_v21 = vcombine.low %v613_v10, %v617_v13  ;;  %v6406_v13 = vcombine.high %v701_v7, %v705_v8 }
 0x1af   : > { %3024 = vmatpush1.bf16.msra.mxu1 %v6213_v18  ;;  %v621_v18 = vld [vmem:[%s7842_s10 + $0x688] sm:$0xff] }
 0x1b0   : > { %3025 = vmatprep.subr.bf16.mxu1 %v6222_v36  ;;  %v625_v36 = vld [vmem:[%s7842_s10 + $0x6a8] sm:$0xff] }
 0x1b1   : > { %v6326_v22 = vcombine.high %v621_v18, %v625_v36  ;;  %v6325_v25 = vcombine.low %v621_v18, %v625_v36  ;;  %v6927_v18 = vld [vmem:[%s7850_s17 + $0x24] ss:$8 sps:$4 sm:$0xff]   ;;  %v6925_v36 = vld [vmem:[%s7850_s17 + $0x20] ss:$8 sps:$4 sm:$0xff]  }
 0x1b3   : > { %3026 = vmatpush1.bf16.msra.mxu1 %v6221_v46  ;;  %v629_v46 = vld [vmem:[%s7842_s10 + $0x6c8] sm:$0xff] }
 0x1b4   : > { %3027 = vmatprep.subr.bf16.mxu1 %v6230_v24  ;;  %v633_v24 = vld [vmem:[%s7842_s10 + $0x6e8] sm:$0xff] }
 0x1b5   : > { %v6334_v26 = vcombine.high %v629_v46, %v633_v24  ;;  %v6333_v30 = vcombine.low %v629_v46, %v633_v24  ;;  %v717_v46 = vld [vmem:[%s7842_s10 + $0x988] sm:$0xff] }
 0x1b6   : > { %v721_v24 = vld [vmem:[%s7842_s10 + $0x9a8] sm:$0xff] }
 0x1b7   : > { %3028 = vmatpush1.bf16.msra.mxu1 %v6229_v27  ;;  %v637_v27 = vld [vmem:[%s7842_s10 + $0x708] sm:$0xff] }
 0x1b8   : > { %3029 = vmatprep.subr.bf16.mxu1 %v6238_v28  ;;  %v641_v28 = vld [vmem:[%s7842_s10 + $0x728] sm:$0xff] }
 0x1b9   : > { %v6342_v31 = vcombine.high %v637_v27, %v641_v28  ;;  %v6341_v33 = vcombine.low %v637_v27, %v641_v28  ;;  %v6422_v28 = vcombine.high %v717_v46, %v721_v24 }
 0x1bb   : > { %3030 = vmatpush1.bf16.msra.mxu1 %v6237_v32  ;;  %v645_v32 = vld [vmem:[%s7842_s10 + $0x748] sm:$0xff] }
 0x1bc   : > { %3052 = vmatprep.subr.bf16.mxu1 %v6246_v3  ;;  %v649_v3 = vld [vmem:[%s7842_s10 + $0x768] sm:$0xff] }
 0x1bd   : > { %v6350_v34 = vcombine.high %v645_v32, %v649_v3  ;;  %v6349_v39 = vcombine.low %v645_v32, %v649_v3  ;;  %v6933_v32 = vld [vmem:[%s7850_s17 + $0x44] ss:$8 sps:$4 sm:$0xff]   ;;  %v6931_v3 = vld [vmem:[%s7850_s17 + $0x40] ss:$8 sps:$4 sm:$0xff]  }
 0x1be   : > { %3032 = vmatmul.mubr.bf16.vlgmr.msra.gmra.mrb[8].mxu1 %v7954_v49 }
 0x1bf   : > { %3053 = vmatpush1.bf16.msra.mxu1 %v6245_v35  ;;  %3041 = vmatprep.mubr.bf16.mxu1 %v7963_v59  ;;  %v653_v35 = vld [vmem:[%s7842_s10 + $0x788] sm:$0xff] }
 0x1c0   : > { %3054 = vmatprep.subr.bf16.mxu1 %v6254_v38  ;;  %v657_v38 = vld [vmem:[%s7842_s10 + $0x7a8] sm:$0xff] }
 0x1c1   : > { %v6358_v40 = vcombine.high %v653_v35, %v657_v38  ;;  %v6357_v43 = vcombine.low %v653_v35, %v657_v38  ;;  %v733_v35 = vld [vmem:[%s7842_s10 + $0xa08] sm:$0xff] }
 0x1c2   : > { %v737_v38 = vld [vmem:[%s7842_s10 + $0xa28] sm:$0xff] }
 0x1c3   : > { %3055 = vmatpush1.bf16.msra.mxu1 %v6253_v41  ;;  %v661_v41 = vld [vmem:[%s7842_s10 + $0x7c8] sm:$0xff] }
 0x1c4   : > { %3056 = vmatprep.subr.bf16.mxu1 %v6262_v42  ;;  %v665_v42 = vld [vmem:[%s7842_s10 + $0x7e8] sm:$0xff] }
 0x1c5   : > { %v6366_v44 = vcombine.high %v661_v41, %v665_v42  ;;  %v6365_v48 = vcombine.low %v661_v41, %v665_v42  ;;  %v6438_v42 = vcombine.high %v733_v35, %v737_v38 }
 0x1c6   : > { %3042 = vmatmul.mubr.bf16.gmra.mrb[12].mxu1 %v7981_v16 }
 0x1c7   : > { %3057 = vmatpush1.bf16.msra.mxu1 %v6261_v45  ;;  %3084 = vmatprep.mubr.bf16.mxu1 %v7987_v23  ;;  %v669_v45 = vld [vmem:[%s7842_s10 + $0x808] sm:$0xff] }
 0x1c8   : > { %3058 = vmatprep.subr.bf16.mxu1 %v6270_v47  ;;  %v673_v47 = vld [vmem:[%s7842_s10 + $0x828] sm:$0xff] }
 0x1c9   : > { %v6374_v51 = vcombine.high %v669_v45, %v673_v47  ;;  %v6373_v54 = vcombine.low %v669_v45, %v673_v47  ;;  %v6939_v45 = vld [vmem:[%s7850_s17 + $0x64] ss:$8 sps:$4 sm:$0xff]   ;;  %v6937_v47 = vld [vmem:[%s7850_s17 + $0x60] ss:$8 sps:$4 sm:$0xff]  }
 0x1cb   : > { %3059 = vmatpush1.bf16.msra.mxu1 %v6269_v52  ;;  %v677_v52 = vld [vmem:[%s7842_s10 + $0x848] sm:$0xff] }
 0x1cc   : > { %3060 = vmatprep.subr.bf16.mxu1 %v6278_v53  ;;  %v681_v53 = vld [vmem:[%s7842_s10 + $0x868] sm:$0xff] }
 0x1cd   : > { %v6382_v55 = vcombine.high %v677_v52, %v681_v53  ;;  %v6381_v60 = vcombine.low %v677_v52, %v681_v53  ;;  %v749_v52 = vld [vmem:[%s7842_s10 + $0xa88] sm:$0xff] }
 0x1ce   : > { %v753_v53 = vld [vmem:[%s7842_s10 + $0xaa8] sm:$0xff] }
 0x1cf   : > { %3061 = vmatpush1.bf16.msra.mxu1 %v6277_v56  ;;  %v685_v56 = vld [vmem:[%s7842_s10 + $0x888] sm:$0xff]  ;;  %v6453_v0 = vcombine.low %v749_v52, %v753_v53 }
 0x1d0   : > { %3062 = vmatprep.subr.bf16.mxu1 %v6286_v58  ;;  %v689_v58 = vld [vmem:[%s7842_s10 + $0x8a8] sm:$0xff] }
 0x1d1   : > { %v6390_v61 = vcombine.high %v685_v56, %v689_v58 }
 0x1d3   : > { %3063 = vmatpush1.bf16.msra.mxu1 %v6285_v62  ;;  %v693_v62 = vld [vmem:[%s7842_s10 + $0x8c8] sm:$0xff] }
 0x1d4   : > { %3064 = vmatprep.subr.bf16.mxu1 %v6294_v63  ;;  %v697_v63 = vld [vmem:[%s7842_s10 + $0x8e8] sm:$0xff] }
 0x1d5   : > { %v6397_v10 = vcombine.low %v693_v62, %v697_v63 }
 0x1d7   : > { %3065 = vmatpush1.bf16.msra.mxu1 %v6293_v2  ;;  %v6389_v2 = vcombine.low %v685_v56, %v689_v58  ;;  %v6454_v58 = vcombine.high %v749_v52, %v753_v53  ;;  %v435_v52 = vld [vmem:[%s7842_s10 + $0xb8] sm:$0xff]  ;;  %v6964_v53 = vld [vmem:[%s7850_s17 + $0xf0] ss:$8 sps:$4 sm:$0xff]  }
 0x1d8   : > { %3066 = vmatprep.subr.bf16.mxu1 %v6302_v4  ;;  %v6398_v4 = vcombine.high %v693_v62, %v697_v63  ;;  %v6945_v62 = vld [vmem:[%s7850_s17 + $0x84] ss:$8 sps:$4 sm:$0xff]   ;;  %v6943_v63 = vld [vmem:[%s7850_s17 + $0x80] ss:$8 sps:$4 sm:$0xff]  }
 0x1db   : > { %3067 = vmatpush1.bf16.msra.mxu1 %v6301_v9  ;;  %v6924_v9 = vld [vmem:[%s7850_s17 + $0x14] ss:$8 sps:$4 sm:$0xff]  }
 0x1dc   : > { %3068 = vmatprep.subr.bf16.mxu1 %v6310_v11  ;;  %v6922_v11 = vld [vmem:[%s7850_s17 + $0x10] ss:$8 sps:$4 sm:$0xff]   ;;  %5488 = vmatprep.subr.bf16.mxu0 %v6924_v9 }
 0x1dd   : > { %5489 = vmatpush1.bf16.msra.mxu0 %v6922_v11 }
 0x1de   : > { %5490 = vmatprep.subr.bf16.mxu0 %v6927_v18 }
 0x1df   : > { %3069 = vmatpush1.bf16.msra.mxu1 %v6309_v14  ;;  %v709_v14 = vld [vmem:[%s7842_s10 + $0x948] sm:$0xff] }
 0x1e0   : > { %3070 = vmatprep.subr.bf16.mxu1 %v6318_v15  ;;  %v713_v15 = vld [vmem:[%s7842_s10 + $0x968] sm:$0xff] }
 0x1e1   : > { %5491 = vmatpush1.bf16.msra.mxu0 %v6925_v36  ;;  %v6413_v27 = vcombine.low %v709_v14, %v713_v15 }
 0x1e3   : > { %3071 = vmatpush1.bf16.msra.mxu1 %v6317_v21  ;;  %v6405_v21 = vcombine.low %v701_v7, %v705_v8  ;;  %v6948_v7 = vld [vmem:[%s7850_s17 + $0x94] ss:$8 sps:$4 sm:$0xff]   ;;  %v6946_v8 = vld [vmem:[%s7850_s17 + $0x90] ss:$8 sps:$4 sm:$0xff]  }
 0x1e4   : > { %3072 = vmatprep.subr.bf16.mxu1 %v6326_v22  ;;  %v6414_v22 = vcombine.high %v709_v14, %v713_v15  ;;  %v6951_v14 = vld [vmem:[%s7850_s17 + $0xa4] ss:$8 sps:$4 sm:$0xff]   ;;  %v6949_v15 = vld [vmem:[%s7850_s17 + $0xa0] ss:$8 sps:$4 sm:$0xff]  }
 0x1e7   : > { %3073 = vmatpush1.bf16.msra.mxu1 %v6325_v25  ;;  %v6930_v25 = vld [vmem:[%s7850_s17 + $0x34] ss:$8 sps:$4 sm:$0xff]  }
 0x1e8   : > { %3074 = vmatprep.subr.bf16.mxu1 %v6334_v26  ;;  %v6928_v26 = vld [vmem:[%s7850_s17 + $0x30] ss:$8 sps:$4 sm:$0xff]   ;;  %5492 = vmatprep.subr.bf16.mxu0 %v6930_v25 }
 0x1e9   : > { %5493 = vmatpush1.bf16.msra.mxu0 %v6928_v26 }
 0x1ea   : > { %5494 = vmatprep.subr.bf16.mxu0 %v6933_v32 }
 0x1eb   : > { %3075 = vmatpush1.bf16.msra.mxu1 %v6333_v30  ;;  %v725_v30 = vld [vmem:[%s7842_s10 + $0x9c8] sm:$0xff] }
 0x1ec   : > { %3076 = vmatprep.subr.bf16.mxu1 %v6342_v31  ;;  %v729_v31 = vld [vmem:[%s7842_s10 + $0x9e8] sm:$0xff] }
 0x1ed   : > { %5495 = vmatpush1.bf16.msra.mxu0 %v6931_v3  ;;  %v6429_v41 = vcombine.low %v725_v30, %v729_v31 }
 0x1ef   : > { %3077 = vmatpush1.bf16.msra.mxu1 %v6341_v33  ;;  %v6421_v33 = vcombine.low %v717_v46, %v721_v24  ;;  %v6954_v46 = vld [vmem:[%s7850_s17 + $0xb4] ss:$8 sps:$4 sm:$0xff]   ;;  %v6952_v24 = vld [vmem:[%s7850_s17 + $0xb0] ss:$8 sps:$4 sm:$0xff]  }
 0x1f0   : > { %3078 = vmatprep.subr.bf16.mxu1 %v6350_v34  ;;  %v6430_v34 = vcombine.high %v725_v30, %v729_v31  ;;  %v6957_v30 = vld [vmem:[%s7850_s17 + $0xc4] ss:$8 sps:$4 sm:$0xff]   ;;  %v6955_v31 = vld [vmem:[%s7850_s17 + $0xc0] ss:$8 sps:$4 sm:$0xff]  }
 0x1f3   : > { %3079 = vmatpush1.bf16.msra.mxu1 %v6349_v39  ;;  %v6936_v39 = vld [vmem:[%s7850_s17 + $0x54] ss:$8 sps:$4 sm:$0xff]  }
 0x1f4   : > { %3080 = vmatprep.subr.bf16.mxu1 %v6358_v40  ;;  %v6934_v40 = vld [vmem:[%s7850_s17 + $0x50] ss:$8 sps:$4 sm:$0xff]   ;;  %5496 = vmatprep.subr.bf16.mxu0 %v6936_v39 }
 0x1f5   : > { %5497 = vmatpush1.bf16.msra.mxu0 %v6934_v40  ;;  %v6963_v40 = vld [vmem:[%s7850_s17 + $0xe4] ss:$8 sps:$4 sm:$0xff]  }
 0x1f6   : > { %5498 = vmatprep.subr.bf16.mxu0 %v6939_v45  ;;  %v6966_v45 = vld [vmem:[%s7850_s17 + $0xf4] ss:$8 sps:$4 sm:$0xff]  }
 0x1f7   : > { %3081 = vmatpush1.bf16.msra.mxu1 %v6357_v43  ;;  %v741_v43 = vld [vmem:[%s7842_s10 + $0xa48] sm:$0xff] }
 0x1f8   : > { %3082 = vmatprep.subr.bf16.mxu1 %v6366_v44  ;;  %v745_v44 = vld [vmem:[%s7842_s10 + $0xa68] sm:$0xff] }
 0x1f9   : > { %5499 = vmatpush1.bf16.msra.mxu0 %v6937_v47  ;;  %v6445_v56 = vcombine.low %v741_v43, %v745_v44 }
 0x1fb   : > { %3083 = vmatpush1.bf16.msra.mxu1 %v6365_v48  ;;  %v6437_v48 = vcombine.low %v733_v35, %v737_v38  ;;  %v6960_v35 = vld [vmem:[%s7850_s17 + $0xd4] ss:$8 sps:$4 sm:$0xff]   ;;  %v6958_v38 = vld [vmem:[%s7850_s17 + $0xd0] ss:$8 sps:$4 sm:$0xff]  }
 0x1fc   : > { %3105 = vmatprep.subr.bf16.mxu1 %v6374_v51  ;;  %v6446_v51 = vcombine.high %v741_v43, %v745_v44  ;;  %v427_v43 = vld [vmem:[%s7842_s10 + $0x78] sm:$0xff] }
 0x1fd   : > { %v6961_v44 = vld [vmem:[%s7850_s17 + $0xe0] ss:$8 sps:$4 sm:$0xff]  }
 0x1fe   : > { %3085 = vmatmul.mubr.bf16.vlgmr.msra.gmra.mrb[8].mxu1 %v8052_v37 }
 0x1ff   : > { %3106 = vmatpush1.bf16.msra.mxu1 %v6373_v54  ;;  %3094 = vmatprep.mubr.bf16.mxu1 %v8062_v50  ;;  %v6942_v54 = vld [vmem:[%s7850_s17 + $0x74] ss:$8 sps:$4 sm:$0xff]  }
 0x200   : > { %3107 = vmatprep.subr.bf16.mxu1 %v6382_v55  ;;  %v6940_v55 = vld [vmem:[%s7850_s17 + $0x70] ss:$8 sps:$4 sm:$0xff]   ;;  %5500 = vmatprep.subr.bf16.mxu0 %v6942_v54 }
 0x201   : > { %5501 = vmatpush1.bf16.msra.mxu0 %v6940_v55 }
 0x202   : > { %5502 = vmatprep.subr.bf16.mxu0 %v6945_v62  ;;  %v447_v62 = vld [vmem:[%s7842_s10 + $0x118] sm:$0xff] }
 0x203   : > { %3108 = vmatpush1.bf16.msra.mxu1 %v6381_v60  ;;  %v757_v60 = vld [vmem:[%s7842_s10 + $0xac8] sm:$0xff] }
 0x204   : > { %3109 = vmatprep.subr.bf16.mxu1 %v6390_v61  ;;  %v761_v61 = vld [vmem:[%s7842_s10 + $0xae8] sm:$0xff] }
 0x205   : > { %v6462_v1 = vcombine.high %v757_v60, %v761_v61  ;;  %5503 = vmatpush1.bf16.msra.mxu0 %v6943_v63  ;;  %v6461_v9 = vcombine.low %v757_v60, %v761_v61  ;;  %v451_v63 = vld [vmem:[%s7842_s10 + $0x138] sm:$0xff] }
 0x206   : > { %3095 = vmatmul.mubr.bf16.gmra.mrb[12].mxu1 %v8076_v6  ;;  %5504 = vmatprep.subr.bf16.mxu0 %v6948_v7  ;;  %v6154_v7 = vcombine.high %v447_v62, %v451_v63 }
 0x207   : > { %3110 = vmatpush1.bf16.msra.mxu1 %v6389_v2  ;;  %3137 = vmatprep.mubr.bf16.mxu1 %v8082_v12  ;;  %v765_v2 = vld [vmem:[%s7842_s10 + $0xb08] sm:$0xff] }
 0x208   : > { %3111 = vmatprep.subr.bf16.mxu1 %v6398_v4  ;;  %v769_v4 = vld [vmem:[%s7842_s10 + $0xb28] sm:$0xff] }
 0x209   : > { %v6470_v11 = vcombine.high %v765_v2, %v769_v4  ;;  %5505 = vmatpush1.bf16.msra.mxu0 %v6946_v8  ;;  %v6469_v18 = vcombine.low %v765_v2, %v769_v4  ;;  %v8304_v2 = vld [vmem:[%s7842_s10 + $0x158] sm:$0xff]  ;;  %v3495_v8 = vsub.s32 4, %v7885_v57 }
 0x20a   : > { %5506 = vmatprep.subr.bf16.mxu0 %v6951_v14  ;;  %v8307_v4 = vld [vmem:[%s7842_s10 + $0x178] sm:$0xff] }
 0x20b   : > { %3112 = vmatpush1.bf16.msra.mxu1 %v6397_v10  ;;  %v773_v10 = vld [vmem:[%s7842_s10 + $0xb48] sm:$0xff]  ;;  %v8320_v14 = vld [vmem:[%s7842_s10 + $0x1d8] sm:$0xff] }
 0x20c   : > { %3113 = vmatprep.subr.bf16.mxu1 %v6406_v13  ;;  %v777_v13 = vld [vmem:[%s7842_s10 + $0xb68] sm:$0xff] }
 0x20d   : > { %v6478_v36 = vcombine.high %v773_v10, %v777_v13  ;;  %5507 = vmatpush1.bf16.msra.mxu0 %v6949_v15  ;;  %v6477_v25 = vcombine.low %v773_v10, %v777_v13  ;;  %v8314_v10 = vld [vmem:[%s7842_s10 + $0x198] sm:$0xff] }
 0x20e   : > { %5508 = vmatprep.subr.bf16.mxu0 %v6954_v46  ;;  %v8317_v13 = vld [vmem:[%s7842_s10 + $0x1b8] sm:$0xff]  ;;  %v6153_v46 = vcombine.low %v447_v62, %v451_v63 }
 0x20f   : > { %3114 = vmatpush1.bf16.msra.mxu1 %v6405_v21  ;;  %v781_v21 = vld [vmem:[%s7842_s10 + $0xb88] sm:$0xff]  ;;  %v8323_v15 = vld [vmem:[%s7842_s10 + $0x1f8] sm:$0xff] }
 0x210   : > { %3115 = vmatprep.subr.bf16.mxu1 %v6414_v22  ;;  %v785_v22 = vld [vmem:[%s7842_s10 + $0xba8] sm:$0xff]  ;;  %v8419_v62 = vld [vmem:[%s7842_s10 + $0x458] sm:$0xff] }
 0x211   : > { %v6486_v26 = vcombine.high %v781_v21, %v785_v22  ;;  %5509 = vmatpush1.bf16.msra.mxu0 %v6952_v24  ;;  %v6485_v32 = vcombine.low %v781_v21, %v785_v22  ;;  %v8335_v21 = vld [vmem:[%s7842_s10 + $0x278] sm:$0xff]  ;;  %9416 = vst [vmem:[#allocation33_spill] sm:$0xff] %v8419_v62 }
 0x212   : > { %5510 = vmatprep.subr.bf16.mxu0 %v6957_v30  ;;  %v8338_v22 = vld [vmem:[%s7842_s10 + $0x298] sm:$0xff] }
 0x213   : > { %3116 = vmatpush1.bf16.msra.mxu1 %v6413_v27  ;;  %v789_v27 = vld [vmem:[%s7842_s10 + $0xbc8] sm:$0xff]  ;;  %v8422_v63 = vld [vmem:[%s7842_s10 + $0x478] sm:$0xff] }
 0x214   : > { %3117 = vmatprep.subr.bf16.mxu1 %v6422_v28  ;;  %v793_v28 = vld [vmem:[%s7842_s10 + $0xbe8] sm:$0xff]  ;;  %9417 = vst [vmem:[#allocation34_spill] sm:$0xff] %v8422_v63 }
 0x215   : > { %v6494_v3 = vcombine.high %v789_v27, %v793_v28  ;;  %5511 = vmatpush1.bf16.msra.mxu0 %v6955_v31  ;;  %v6493_v39 = vcombine.low %v789_v27, %v793_v28  ;;  %v8349_v27 = vld [vmem:[%s7842_s10 + $0x2d8] sm:$0xff] }
 0x216   : > { %5512 = vmatprep.subr.bf16.mxu0 %v6960_v35  ;;  %v8352_v28 = vld [vmem:[%s7842_s10 + $0x2f8] sm:$0xff] }
 0x217   : > { %3118 = vmatpush1.bf16.msra.mxu1 %v6421_v33  ;;  %v415_v33 = vld [vmem:[%s7842_s10 + $0x18] sm:$0xff] }
 0x218   : > { %3119 = vmatprep.subr.bf16.mxu1 %v6430_v34  ;;  %v419_v34 = vld [vmem:[%s7842_s10 + $0x38] sm:$0xff] }
 0x219   : > { %5513 = vmatpush1.bf16.msra.mxu0 %v6958_v38  ;;  %v6121_v47 = vcombine.low %v415_v33, %v419_v34  ;;  %v8371_v35 = vld [vmem:[%s7842_s10 + $0x358] sm:$0xff]  ;;  %v6169_v38 = vcombine.low %v8314_v10, %v8317_v13 }
 0x21a   : > { %5514 = vmatprep.subr.bf16.mxu0 %v6963_v40 }
 0x21b   : > { %3120 = vmatpush1.bf16.msra.mxu1 %v6429_v41  ;;  %v6122_v41 = vcombine.high %v415_v33, %v419_v34  ;;  %v8365_v33 = vld [vmem:[%s7842_s10 + $0x318] sm:$0xff] }
 0x21c   : > { %3121 = vmatprep.subr.bf16.mxu1 %v6438_v42  ;;  %v423_v42 = vld [vmem:[%s7842_s10 + $0x58] sm:$0xff] }
 0x21d   : > { %5515 = vmatpush1.bf16.msra.mxu0 %v6961_v44  ;;  %v6129_v54 = vcombine.low %v423_v42, %v427_v43  ;;  %v8368_v34 = vld [vmem:[%s7842_s10 + $0x338] sm:$0xff] }
 0x21e   : > { %5516 = vmatprep.subr.bf16.mxu0 %v6966_v45  ;;  %v8388_v44 = vld [vmem:[%s7842_s10 + $0x3b8] sm:$0xff] }
 0x21f   : > { %3122 = vmatpush1.bf16.msra.mxu1 %v6437_v48  ;;  %v6130_v48 = vcombine.high %v423_v42, %v427_v43  ;;  %v8382_v42 = vld [vmem:[%s7842_s10 + $0x378] sm:$0xff] }
 0x220   : > { %3123 = vmatprep.subr.bf16.mxu1 %v6446_v51  ;;  %v431_v51 = vld [vmem:[%s7842_s10 + $0x98] sm:$0xff] }
 0x221   : > { %v6138_v55 = vcombine.high %v431_v51, %v435_v52  ;;  %5517 = vmatpush1.bf16.msra.mxu0 %v6964_v53  ;;  %v6137_v60 = vcombine.low %v431_v51, %v435_v52  ;;  %v8385_v43 = vld [vmem:[%s7842_s10 + $0x398] sm:$0xff] }
 0x222   : > { %v8399_v52 = vld [vmem:[%s7842_s10 + $0x3d8] sm:$0xff] }
 0x223   : > { %3124 = vmatpush1.bf16.msra.mxu1 %v6445_v56  ;;  %v439_v56 = vld [vmem:[%s7842_s10 + $0xd8] sm:$0xff] }
 0x224   : > { %3125 = vmatprep.subr.bf16.mxu1 %v6454_v58  ;;  %v443_v58 = vld [vmem:[%s7842_s10 + $0xf8] sm:$0xff] }
 0x225   : > { %v6146_v61 = vcombine.high %v439_v56, %v443_v58  ;;  %v8402_v53 = vld [vmem:[%s7842_s10 + $0x3f8] sm:$0xff] }
 0x227   : > { %3126 = vmatpush1.bf16.msra.mxu1 %v6453_v0  ;;  %v6145_v0 = vcombine.low %v439_v56, %v443_v58 }
 0x228   : > { %3127 = vmatprep.subr.bf16.mxu1 %v6462_v1  ;;  %v796_v1 = vld [vmem:[%s7848_s6] sm:$0xff] }
 0x229   : > { %v8341_v24 = vrot.slane %v796_v1, %v7892_v5  ;;  %v8354_v30 = vrot.slane %v796_v1, %v3495_v8  ;;  %v8436_v8 = vld [vmem:[%s7842_s10 + $0x4b8] sm:$0xff] }
 0x22a   : > { %9419 = vst [vmem:[#allocation36_spill] sm:$0xff] %v8436_v8 }
 0x22b   : > { %3128 = vmatpush1.bf16.msra.mxu1 %v6461_v9  ;;  %v9355_v9 = vsub.s32 1, %v7885_v57 }
 0x22c   : > { %3129 = vmatprep.subr.bf16.mxu1 %v6470_v11  ;;  %v3499_v11 = vsub.s32 5, %v7885_v57 }
 0x22d   : > { %v8358_v31 = vrot.slane %v796_v1, %v9355_v9 }
 0x22f   : > { %3130 = vmatpush1.bf16.msra.mxu1 %v6469_v18  ;;  %v8329_v18 = vld [vmem:[%s7842_s10 + $0x238] sm:$0xff] }
 0x230   : > { %3131 = vmatprep.subr.bf16.mxu1 %v6478_v36  ;;  %v8332_v36 = vld [vmem:[%s7842_s10 + $0x258] sm:$0xff] }
 0x233   : > { %3132 = vmatpush1.bf16.msra.mxu1 %v6477_v25  ;;  %v6162_v25 = vcombine.high %v8304_v2, %v8307_v4 }
 0x234   : > { %3133 = vmatprep.subr.bf16.mxu1 %v6486_v26  ;;  %v8346_v26 = vld [vmem:[%s7842_s10 + $0x2b8] sm:$0xff] }
 0x237   : > { %3134 = vmatpush1.bf16.msra.mxu1 %v6485_v32  ;;  %v8360_v32 = vrot.slane %v796_v1, %v3499_v11 }
 0x238   : > { %3135 = vmatprep.subr.bf16.mxu1 %v6494_v3  ;;  %v6161_v3 = vcombine.low %v8304_v2, %v8307_v4 }
 0x23b   : > { %3136 = vmatpush1.bf16.msra.mxu1 %v6493_v39  ;;  %v6170_v39 = vcombine.high %v8314_v10, %v8317_v13 }
 0x23c   : > { %3317 = vmatprep.subr.bf16.mxu1 %v6122_v41 }
 0x23e   : > { %3138 = vmatmul.mubr.bf16.vlgmr.msra.gmra.mrb[8].mxu1 %v8140_v17 }
 0x23f   : > { %3318 = vmatpush1.bf16.msra.mxu1 %v6121_v47  ;;  %3147 = vmatprep.mubr.bf16.mxu1 %v8143_v19  ;;  %v9420_v19 = vcombine.high %v8320_v14, %v8323_v15 }
 0x240   : > { %3319 = vmatprep.subr.bf16.mxu1 %v6130_v48 }
 0x243   : > { %3320 = vmatpush1.bf16.msra.mxu1 %v6129_v54  ;;  %v8405_v54 = vld [vmem:[%s7842_s10 + $0x418] sm:$0xff] }
 0x244   : > { %3321 = vmatprep.subr.bf16.mxu1 %v6138_v55  ;;  %9414 = vst [vmem:[#allocation31_spill] sm:$0xff] %v8405_v54 }
 0x246   : > { %3148 = vmatmul.mubr.bf16.gmra.mrb[12].mxu1 %v8156_v29 }
 0x247   : > { %3322 = vmatpush1.bf16.msra.mxu1 %v6137_v60  ;;  %3349 = vmatprep.mubr.bf16.mxu1 %v7905_v20  ;;  %v8326_v20 = vld [vmem:[%s7842_s10 + $0x218] sm:$0xff] }
 0x248   : > { %3323 = vmatprep.subr.bf16.mxu1 %v6146_v61  ;;  %v8416_v61 = vld [vmem:[%s7842_s10 + $0x438] sm:$0xff]  ;;  %v9423_v49 = vcombine.low %v8326_v20, %v8329_v18 }
 0x249   : > { %9415 = vst [vmem:[#allocation32_spill] sm:$0xff] %v8416_v61 }
 0x24b   : > { %3324 = vmatpush1.bf16.msra.mxu1 %v6145_v0 }
 0x24c   : > { %3325 = vmatprep.subr.bf16.mxu1 %v6154_v7  ;;  %v8433_v7 = vld [vmem:[%s7842_s10 + $0x498] sm:$0xff] }
 0x24d   : > { %9418 = vst [vmem:[#allocation35_spill] sm:$0xff] %v8433_v7 }
 0x24f   : > { %3326 = vmatpush1.bf16.msra.mxu1 %v6153_v46 }
 0x250   : > { %3327 = vmatprep.subr.bf16.mxu1 %v6162_v25 }
 0x251   : > { %v2980_v11 = vpop.f32.mrb[0].mxu1  ;;  %v3298_v4 = vpop.f32.mrb[0].mxu0 }
 0x252   : > { %v8447_v0 = vadd.f32 %v8341_v24, %v2980_v11  ;;  %v2982_v1 = vpop.f32.mrb[1].mxu1  ;;  %v8456_v60 = vadd.f32 %v8354_v30, %v3298_v4  ;;  %v3300_v2 = vpop.f32.mrb[1].mxu0 }
 0x253   : > { %v8459_v9 = vadd.f32 %v8358_v31, %v2982_v1  ;;  %v2984_v11 = vpop.f32.mrb[2].mxu1  ;;  %3328 = vmatpush1.bf16.msra.mxu1 %v6161_v3  ;;  %v8468_v25 = vadd.f32 %v8360_v32, %v3300_v2  ;;  %v3302_v1 = vpop.f32.mrb[2].mxu0 }
 0x254   : > { %v3661_v46 = vmul.f32 %v8447_v0, %v8447_v0  ;;  %v8471_v4 = vadd.f32 %v8341_v24, %v2984_v11  ;;  %v2986_v56 = vpop.f32.mrb[3].mxu1  ;;  %3329 = vmatprep.subr.bf16.mxu1 %v6170_v39  ;;  %v3665_v55 = vmul.f32 %v8456_v60, %v8456_v60  ;;  %v8480_v48 = vadd.f32 %v8354_v30, %v3302_v1  ;;  %v3304_v11 = vpop.f32.mrb[3].mxu0 }
 0x255   : > { %v3662_v58 = vmul.f32 %v8459_v9, %v8459_v9  ;;  %v8483_v2 = vadd.f32 %v8358_v31, %v2986_v56  ;;  %v3666_v51 = vmul.f32 %v8468_v25, %v8468_v25  ;;  %v8492_v45 = vadd.f32 %v8360_v32, %v3304_v11 }
 0x256   : > { %v3549_v39 = vadd.f32 %v8471_v4, %v8447_v0  ;;  %v3669_v3 = vmul.f32 %v8471_v4, %v8471_v4  ;;  %v3577_v1 = vadd.f32 %v8480_v48, %v8456_v60  ;;  %v3673_v56 = vmul.f32 %v8480_v48, %v8480_v48 }
 0x257   : > { %v3556_v47 = vadd.f32 %v8483_v2, %v8459_v9  ;;  %v3670_v40 = vmul.f32 %v8483_v2, %v8483_v2  ;;  %3330 = vmatpush1.bf16.msra.mxu1 %v6169_v38  ;;  %v3584_v11 = vadd.f32 %v8492_v45, %v8468_v25  ;;  %v3674_v29 = vmul.f32 %v8492_v45, %v8492_v45 }
 0x258   : > { %v3550_v41 = vrot.slane %v3549_v39, 4  ;;  %v3693_v57 = vadd.f32 %v3669_v3, %v3661_v46  ;;  %3331 = vmatprep.subr.bf16.mxu1 %v9420_v19  ;;  %v3578_v17 = vrot.slane %v3577_v1, 4  ;;  %v3721_v12 = vadd.f32 %v3673_v56, %v3665_v55 }
 0x259   : > { %v3557_v6 = vrot.slane %v3556_v47, 4  ;;  %v3700_v50 = vadd.f32 %v3670_v40, %v3662_v58  ;;  %v8512_v37 = vpop.f32.mrb[4].mxu1  ;;  %v3585_v38 = vrot.slane %v3584_v11, 4  ;;  %v3728_v46 = vadd.f32 %v3674_v29, %v3666_v51  ;;  %v8514_v3 = vpop.f32.mrb[4].mxu0 }
 0x25a   : > { %v3551_v10 = vadd.f32 %v3550_v41, %v3549_v39  ;;  %v3694_v13 = vrot.slane %v3693_v57, 4  ;;  %v8516_v5 = vpop.f32.mrb[5].mxu1  ;;  %v3579_v23 = vadd.f32 %v3578_v17, %v3577_v1  ;;  %v3722_v16 = vrot.slane %v3721_v12, 4  ;;  %v8518_v63 = vpop.f32.mrb[5].mxu0 }
 0x25b   : > { %v3558_v8 = vadd.f32 %v3557_v6, %v3556_v47  ;;  %v3701_v7 = vrot.slane %v3700_v50, 4  ;;  %v8520_v19 = vpop.f32.mrb[6].mxu1  ;;  %v9421_v40 = vcombine.low %v8320_v14, %v8323_v15  ;;  %v3586_v58 = vadd.f32 %v3585_v38, %v3584_v11  ;;  %v8525_v51 = vpop.f32.mrb[6].mxu0 }
 0x25c   : > { %v3552_v41 = vrot.slane %v3551_v10, 2  ;;  %v3695_v55 = vadd.f32 %v3694_v13, %v3693_v57  ;;  %v3729_v29 = vrot.slane %v3728_v46, 4  ;;  %v8527_v39 = vpop.f32.mrb[7].mxu1  ;;  %v9422_v6 = vcombine.high %v8326_v20, %v8329_v18  ;;  %v8532_v62 = vpop.f32.mrb[7].mxu0 }
 0x25d   : > { %3332 = vmatpush1.bf16.msra.mxu1 %v9421_v40  ;;  %v3580_v17 = vrot.slane %v3579_v23, 2  ;;  %v3723_v47 = vadd.f32 %v3722_v16, %v3721_v12  ;;  %v3559_v1 = vrot.slane %v3558_v8, 2  ;;  %v3702_v56 = vadd.f32 %v3701_v7, %v3700_v50 }
 0x25e   : > { %3333 = vmatprep.subr.bf16.mxu1 %v9422_v6  ;;  %v3553_v14 = vadd.f32 %v3552_v41, %v3551_v10  ;;  %v3696_v15 = vrot.slane %v3695_v55, 2  ;;  %v3587_v40 = vrot.slane %v3586_v58, 2  ;;  %v3730_v57 = vadd.f32 %v3729_v29, %v3728_v46 }
 0x25f   : > { %v3581_v11 = vadd.f32 %v3580_v17, %v3579_v23  ;;  %v3724_v13 = vrot.slane %v3723_v47, 2  ;;  %v3560_v38 = vadd.f32 %v3559_v1, %v3558_v8  ;;  %v3703_v59 = vrot.slane %v3702_v56, 2 }
 0x260   : > { %v3554_v61 = vrot.slane %v3553_v14, 1  ;;  %v3697_v6 = vadd.f32 %v3696_v15, %v3695_v55  ;;  %v3588_v54 = vadd.f32 %v3587_v40, %v3586_v58  ;;  %v3731_v16 = vrot.slane %v3730_v57, 2 }
 0x261   : > { %3334 = vmatpush1.bf16.msra.mxu1 %v9423_v49  ;;  %v9424_v50 = vcombine.high %v8332_v36, %v8335_v21  ;;  %v3582_v12 = vrot.slane %v3581_v11, 1  ;;  %v3725_v7 = vadd.f32 %v3724_v13, %v3723_v47  ;;  %v3561_v10 = vrot.slane %v3560_v38, 1 }
 0x262   : > { %v3704_v46 = vadd.f32 %v3703_v59, %v3702_v56  ;;  %v3555_v23 = vadd.f32 %v3554_v61, %v3553_v14  ;;  %v3698_v41 = vrot.slane %v3697_v6, 1  ;;  %v3589_v8 = vrot.slane %v3588_v54, 1 }
 0x263   : > { %3335 = vmatprep.subr.bf16.mxu1 %v9424_v50  ;;  %v3732_v29 = vadd.f32 %v3731_v16, %v3730_v57  ;;  %v3583_v17 = vadd.f32 %v3582_v12, %v3581_v11  ;;  %v3726_v1 = vrot.slane %v3725_v7, 1  ;;  %v3562_v20 = vadd.f32 %v3561_v10, %v3560_v38 }
 0x264   : > { %v3705_v49 = vrot.slane %v3704_v46, 1  ;;  %v9425_v18 = vcombine.low %v8332_v36, %v8335_v21  ;;  %v3699_v55 = vadd.f32 %v3698_v41, %v3697_v6  ;;  %v8543_v58 = vmul.f32 0.0625, %v3555_v23 }
 0x265   : > { %v3590_v15 = vadd.f32 %v3589_v8, %v3588_v54  ;;  %v3733_v40 = vrot.slane %v3732_v29, 1  ;;  %v9426_v59 = vcombine.high %v8338_v22, %v8346_v26  ;;  %v3727_v61 = vadd.f32 %v3726_v1, %v3725_v7 }
 0x266   : > { %3336 = vmatpush1.bf16.msra.mxu1 %v9425_v18  ;;  %v8548_v47 = vmul.f32 0.0625, %v3583_v17  ;;  %v3706_v56 = vadd.f32 %v3705_v49, %v3704_v46  ;;  %v8550_v14 = vmul.f32 0.0625, %v3562_v20  ;;  %v3821_v57 = vmul.f32 0.0625, %v3699_v55 }
 0x267   : > { %3337 = vmatprep.subr.bf16.mxu1 %v9426_v59  ;;  %v3837_v36 = vmul.f32 %v8543_v58, %v8543_v58  ;;  %v3885_v21 = vsub.f32 %v8447_v0, %v8543_v58  ;;  %v3893_v54 = vsub.f32 %v8471_v4, %v8543_v58  ;;  %v3825_v11 = vmul.f32 0.0625, %v3727_v61 }
 0x268   : > { %v3841_v13 = vmul.f32 %v8548_v47, %v8548_v47  ;;  %v3889_v38 = vsub.f32 %v8456_v60, %v8548_v47  ;;  %v3897_v6 = vsub.f32 %v8480_v48, %v8548_v47  ;;  %v9427_v16 = vcombine.low %v8338_v22, %v8346_v26  ;;  %v8579_v22 = vld [vmem:[%s7842_s10 + $0x4d8] sm:$0xff]  ;;  %v9439_v47 = vld [vmem:[#allocation32_spill] sm:$0xff] }
 0x269   : > { %v3853_v50 = vsub.f32 %v3821_v57, %v3837_v36  ;;  %v3822_v12 = vmul.f32 0.0625, %v3706_v56  ;;  %v3838_v7 = vmul.f32 %v8550_v14, %v8550_v14  ;;  %v3886_v10 = vsub.f32 %v8459_v9, %v8550_v14  ;;  %v8582_v26 = vld [vmem:[%s7842_s10 + $0x4f8] sm:$0xff] }
 0x26a   : > { %3338 = vmatpush1.bf16.msra.mxu1 %v9427_v16  ;;  %v9428_v46 = vcombine.high %v8349_v27, %v8352_v28  ;;  %v3857_v23 = vsub.f32 %v3825_v11, %v3841_v13  ;;  %v3894_v41 = vsub.f32 %v8483_v2, %v8550_v14  ;;  %v3734_v8 = vadd.f32 %v3733_v40, %v3732_v29  ;;  %v9438_v48 = vld [vmem:[#allocation31_spill] sm:$0xff] }
 0x26b   : > { %v8576_v17 = vmul.f32 0.0625, %v3590_v15  ;;  %v3869_v1 = vmax.f32 %v3853_v50, 0.0  ;;  %v3854_v20 = vsub.f32 %v3822_v12, %v3838_v7  ;;  %v8586_v49 = vadd.f32 %v8341_v24, %v8512_v37 }
 0x26c   : > { %3339 = vmatprep.subr.bf16.mxu1 %v9428_v46  ;;  %v8590_v18 = vadd.f32 %v8354_v30, %v8514_v3  ;;  %v3873_v55 = vmax.f32 %v3857_v23, 0.0  ;;  %v3826_v59 = vmul.f32 0.0625, %v3734_v8  ;;  %v9429_v40 = vcombine.low %v8349_v27, %v8352_v28 }
 0x26d   : > { %v3842_v29 = vmul.f32 %v8576_v17, %v8576_v17  ;;  %v3890_v15 = vsub.f32 %v8468_v25, %v8576_v17  ;;  %v3917_v61 = vadd.f32 1e-05, %v3869_v1  ;;  %v3870_v56 = vmax.f32 %v3854_v20, 0.0 }
 0x26e   : > { %3340 = vmatpush1.bf16.msra.mxu1 %v9429_v40  ;;  %v3898_v37 = vsub.f32 %v8492_v45, %v8576_v17  ;;  %v9430_v3 = vcombine.high %v8365_v33, %v8368_v34  ;;  %v6274_v57 = vcombine.high %v8579_v22, %v8582_v26  ;;  %v3921_v36 = vadd.f32 1e-05, %v3873_v55  ;;  %v9444_v17 = vld [vmem:[#allocation33_spill] sm:$0xff] }
 0x26f   : > { %v3858_v11 = vsub.f32 %v3826_v59, %v3842_v29  ;;  %v3677_v13 = vmul.f32 %v8586_v49, %v8586_v49  ;;  %v8610_v27 = vadd.f32 %v8358_v31, %v8516_v5  ;;  %7207 = vrsqrt.f32 %v3917_v61 }
 0x270   : > { %3341 = vmatprep.subr.bf16.mxu1 %v9430_v3  ;;  %v3918_v28 = vadd.f32 1e-05, %v3870_v56  ;;  %v8614_v16 = vadd.f32 %v8360_v32, %v8518_v63  ;;  %v8618_v50 = vadd.f32 %v8341_v24, %v8520_v19  ;;  %7209 = vrsqrt.f32 %v3921_v36 }
 0x271   : > { %v3874_v12 = vmax.f32 %v3858_v11, 0.0  ;;  %v3681_v7 = vmul.f32 %v8590_v18, %v8590_v18  ;;  %v8624_v46 = vadd.f32 %v8354_v30, %v8525_v51  ;;  %v9431_v5 = vcombine.low %v8365_v33, %v8368_v34 }
 0x272   : > { %7211 = vrsqrt.f32 %v3918_v28  ;;  %v3678_v63 = vmul.f32 %v8610_v27, %v8610_v27  ;;  %v3605_v24 = vadd.f32 %v8618_v50, %v8586_v49  ;;  %v3685_v19 = vmul.f32 %v8618_v50, %v8618_v50 }
 0x273   : > { %3342 = vmatpush1.bf16.msra.mxu1 %v9431_v5  ;;  %v9432_v23 = vcombine.high %v8371_v35, %v8382_v42  ;;  %v3922_v30 = vadd.f32 1e-05, %v3874_v12  ;;  %v3633_v51 = vadd.f32 %v8624_v46, %v8590_v18  ;;  %v3689_v33 = vmul.f32 %v8624_v46, %v8624_v46 }
 0x274   : > { %v8644_v34 = vadd.f32 %v8358_v31, %v8527_v39  ;;  %v3682_v8 = vmul.f32 %v8614_v16, %v8614_v16  ;;  %v3606_v1 = vrot.slane %v3605_v24, 4  ;;  %v3749_v20 = vadd.f32 %v3685_v19, %v3677_v13 }
 0x275   : > { %3343 = vmatprep.subr.bf16.mxu1 %v9432_v23  ;;  %v8650_v55 = vadd.f32 %v8360_v32, %v8532_v62  ;;  %7213 = vrsqrt.f32 %v3922_v30  ;;  %v3634_v59 = vrot.slane %v3633_v51, 4  ;;  %v3777_v29 = vadd.f32 %v3689_v33, %v3681_v7 }
 0x276   : > { %v3612_v40 = vadd.f32 %v8644_v34, %v8610_v27  ;;  %v9433_v61 = vcombine.low %v8371_v35, %v8382_v42  ;;  %v3607_v31 = vadd.f32 %v3606_v1, %v3605_v24  ;;  %v3750_v39 = vrot.slane %v3749_v20, 4 }
 0x277   : > { %v3686_v56 = vmul.f32 %v8644_v34, %v8644_v34  ;;  %v3640_v3 = vadd.f32 %v8650_v55, %v8614_v16  ;;  %v9434_v32 = vcombine.high %v8385_v43, %v8388_v44  ;;  %v3635_v62 = vadd.f32 %v3634_v59, %v3633_v51 }
 0x278   : > { %3344 = vmatpush1.bf16.msra.mxu1 %v9433_v61  ;;  %v3778_v36 = vrot.slane %v3777_v29, 4  ;;  %v3613_v11 = vrot.slane %v3612_v40, 4  ;;  %v3690_v13 = vmul.f32 %v8650_v55, %v8650_v55  ;;  %v3608_v35 = vrot.slane %v3607_v31, 2 }
 0x279   : > { %3345 = vmatprep.subr.bf16.mxu1 %v9434_v32  ;;  %v3751_v42 = vadd.f32 %v3750_v39, %v3749_v20  ;;  %v3756_v28 = vadd.f32 %v3686_v56, %v3678_v63  ;;  %v3641_v12 = vrot.slane %v3640_v3, 4  ;;  %v3636_v7 = vrot.slane %v3635_v62, 2  ;;  %v7208_v30 = vpop.eup %7207 }
 0x27a   : > { %v3779_v5 = vadd.f32 %v3778_v36, %v3777_v29  ;;  %v3614_v24 = vadd.f32 %v3613_v11, %v3612_v40  ;;  %v8666_v19 = vadd.f32 %v3690_v13, %v3682_v8  ;;  %v9435_v23 = vcombine.low %v8385_v43, %v8388_v44  ;;  %v7210_v63 = vpop.eup %7209 }
 0x27b   : > { %v3609_v51 = vadd.f32 %v3608_v35, %v3607_v31  ;;  %v3752_v33 = vrot.slane %v3751_v42, 2  ;;  %v3757_v1 = vrot.slane %v3756_v28, 4  ;;  %v8671_v59 = vadd.f32 %v3641_v12, %v3640_v3  ;;  %v9441_v35 = vld [vmem:[#allocation20_spill] sm:$0xff] }
 0x27c   : > { %3346 = vmatpush1.bf16.msra.mxu1 %v9435_v23  ;;  %v9436_v20 = vcombine.high %v8399_v52, %v8402_v53  ;;  %v8679_v8 = vmul.f32 %v7208_v30, %v3885_v21  ;;  %v8684_v43 = vmul.f32 %v7208_v30, %v3893_v54  ;;  %v3637_v44 = vadd.f32 %v3636_v7, %v3635_v62  ;;  %v7212_v40 = vpop.eup %7211 }
 0x27d   : > { %v3780_v29 = vrot.slane %v3779_v5, 2  ;;  %v3953_v61 = vmul.f32 %v7210_v63, %v3889_v38  ;;  %v3961_v31 = vmul.f32 %v7210_v63, %v3897_v6  ;;  %v3610_v39 = vrot.slane %v3609_v51, 1 }
 0x27e   : > { %3347 = vmatprep.subr.bf16.mxu1 %v9436_v20  ;;  %v3753_v0 = vadd.f32 %v3752_v33, %v3751_v42  ;;  %v8695_v21 = vmul.f32 %v7212_v40, %v3894_v41  ;;  %v3638_v4 = vrot.slane %v3637_v44, 1  ;;  %v3615_v54 = vrot.slane %v3614_v24, 2 }
 0x27f   : > { %v3781_v58 = vadd.f32 %v3780_v29, %v3779_v5  ;;  %v9437_v56 = vcombine.low %v8399_v52, %v8402_v53  ;;  %v6499_v60 = vmul.f32 -1.442695, %v3953_v61  ;;  %v6503_v38 = vmul.f32 -1.442695, %v3961_v31  ;;  %v7214_v62 = vpop.eup %7213  ;;  %v9443_v5 = vld [vmem:[#allocation21_spill] sm:$0xff] }
 0x280   : > { %v3611_v3 = vadd.f32 %v3610_v39, %v3609_v51  ;;  %v3754_v32 = vrot.slane %v3753_v0, 1  ;;  %v9440_v6 = vcombine.high %v9438_v48, %v9439_v47  ;;  %v3639_v36 = vadd.f32 %v3638_v4, %v3637_v44 }
 0x281   : > { %3348 = vmatpush1.bf16.msra.mxu1 %v9437_v56  ;;  %v3782_v2 = vrot.slane %v3781_v58, 1  ;;  %v3616_v41 = vadd.f32 %v3615_v54, %v3614_v24  ;;  %v3758_v11 = vadd.f32 %v3757_v1, %v3756_v28  ;;  %7215 = vpow2.f32 %v6499_v60  ;;  %v9448_v54 = vld [vmem:[#allocation35_spill] sm:$0xff]  ;;  %v9449_v56 = vld [vmem:[#allocation36_spill] sm:$0xff] }
 0x282   : > { %3370 = vmatprep.subr.bf16.mxu1 %v9440_v6  ;;  %v3954_v13 = vmul.f32 %v7214_v62, %v3890_v15  ;;  %v3962_v52 = vmul.f32 %v7214_v62, %v3898_v37  ;;  %v3755_v53 = vadd.f32 %v3754_v32, %v3753_v0  ;;  %7217 = vpow2.f32 %v6503_v38  ;;  %v9445_v37 = vld [vmem:[#allocation34_spill] sm:$0xff] }
 0x283   : > { %v8710_v42 = vmul.f32 0.0625, %v3611_v3  ;;  %v3783_v12 = vadd.f32 %v3782_v2, %v3781_v58  ;;  %v8712_v7 = vmul.f32 0.0625, %v3639_v36  ;;  %v9442_v28 = vcombine.low %v9438_v48, %v9439_v47  ;;  %v575_v38 = vld [vmem:[%s7842_s10 + $0x518] sm:$0xff] }
 0x284   : > { %3350 = vmatmul.mubr.bf16.vlgmr.msra.gmra.mrb[16].mxu1 %v9441_v35  ;;  %v6500_v25 = vmul.f32 -1.442695, %v3954_v13  ;;  %v6504_v15 = vmul.f32 -1.442695, %v3962_v52  ;;  %v3829_v24 = vmul.f32 0.0625, %v3755_v53  ;;  %v3617_v45 = vrot.slane %v3616_v41, 1 }
 0x285   : > { %3371 = vmatpush1.bf16.msra.mxu1 %v9442_v28  ;;  %3359 = vmatprep.mubr.bf16.mxu1 %v9443_v5  ;;  %v9446_v23 = vcombine.high %v9444_v17, %v9445_v37  ;;  %v3845_v30 = vmul.f32 %v8710_v42, %v8710_v42  ;;  %v3901_v51 = vsub.f32 %v8586_v49, %v8710_v42  ;;  %v3833_v1 = vmul.f32 0.0625, %v3783_v12  ;;  %v579_v3 = vld [vmem:[%s7842_s10 + $0x538] sm:$0xff] }
 0x286   : > { %v3909_v33 = vsub.f32 %v8618_v50, %v8710_v42  ;;  %7219 = vpow2.f32 %v6500_v25  ;;  %v3849_v20 = vmul.f32 %v8712_v7, %v8712_v7  ;;  %v3905_v63 = vsub.f32 %v8590_v18, %v8712_v7  ;;  %v9451_v13 = vld [vmem:[#allocation22_spill] sm:$0xff] }
 0x287   : > { %3372 = vmatprep.subr.bf16.mxu1 %v9446_v23  ;;  %v3913_v44 = vsub.f32 %v8624_v46, %v8712_v7  ;;  %7221 = vpow2.f32 %v6504_v15  ;;  %v3861_v29 = vsub.f32 %v3829_v24, %v3845_v30  ;;  %v3618_v61 = vadd.f32 %v3617_v45, %v3616_v41  ;;  %v583_v24 = vld [vmem:[%s7842_s10 + $0x558] sm:$0xff] }
 0x288   : > { %v3759_v31 = vrot.slane %v3758_v11, 2  ;;  %v9447_v39 = vcombine.low %v9444_v17, %v9445_v37  ;;  %v3865_v0 = vsub.f32 %v3833_v1, %v3849_v20  ;;  %v3643_v4 = vrot.slane %v8671_v59, 2  ;;  %v587_v45 = vld [vmem:[%s7842_s10 + $0x578] sm:$0xff] }
 0x289   : > { %v3785_v58 = vrot.slane %v8666_v19, 4  ;;  %v9450_v60 = vcombine.high %v9448_v54, %v9449_v56  ;;  %v8746_v32 = vmul.f32 %v7212_v40, %v3886_v10  ;;  %v3877_v48 = vmax.f32 %v3861_v29, 0.0  ;;  %v607_v50 = vld [vmem:[%s7842_s10 + $0x618] sm:$0xff] }
 0x28a   : > { %3373 = vmatpush1.bf16.msra.mxu1 %v9447_v39  ;;  %v3760_v47 = vadd.f32 %v3759_v31, %v3758_v11  ;;  %v8748_v6 = vmul.f32 0.0625, %v3618_v61  ;;  %v3881_v62 = vmax.f32 %v3865_v0, 0.0  ;;  %v3644_v36 = vadd.f32 %v3643_v4, %v8671_v59  ;;  %v9453_v59 = vld [vmem:[#allocation23_spill] sm:$0xff] }
 0x28b   : > { %3374 = vmatprep.subr.bf16.mxu1 %v9450_v60  ;;  %v3786_v2 = vadd.f32 %v3785_v58, %v8666_v19  ;;  %v6273_v41 = vcombine.low %v8579_v22, %v8582_v26  ;;  %v3925_v52 = vadd.f32 1e-05, %v3877_v48  ;;  %v9452_v14 = vcombine.low %v9448_v54, %v9449_v56  ;;  %v7216_v19 = vpop.eup %7215  ;;  %v591_v39 = vld [vmem:[%s7842_s10 + $0x598] sm:$0xff] }
 0x28c   : > { %3360 = vmatmul.mubr.bf16.gmra.mrb[20].mxu1 %v9451_v13  ;;  %v3761_v53 = vrot.slane %v3760_v47, 1  ;;  %v3902_v9 = vsub.f32 %v8610_v27, %v8748_v6  ;;  %v6282_v10 = vcombine.high %v575_v38, %v579_v3  ;;  %v3929_v40 = vadd.f32 1e-05, %v3881_v62  ;;  %v7218_v28 = vpop.eup %7217  ;;  %v595_v0 = vld [vmem:[%s7842_s10 + $0x5b8] sm:$0xff] }
 0x28d   : > { %3402 = vmatprep.mubr.bf16.mxu1 %v9453_v59  ;;  %v3910_v11 = vsub.f32 %v8644_v34, %v8748_v6  ;;  %v3645_v35 = vrot.slane %v3644_v36, 1  ;;  %v3787_v12 = vrot.slane %v3786_v2, 2  ;;  %v4029_v5 = vadd.f32 1.0, %v7216_v19  ;;  %v615_v7 = vld [vmem:[%s7842_s10 + $0x658] sm:$0xff] }
 0x28e   : > { %3375 = vmatpush1.bf16.msra.mxu1 %v9452_v14  ;;  %7223 = vrsqrt.f32 %v3925_v52  ;;  %v3762_v25 = vadd.f32 %v3761_v53, %v3760_v47  ;;  %v3846_v15 = vmul.f32 %v8748_v6, %v8748_v6  ;;  %v4033_v17 = vadd.f32 1.0, %v7218_v28 }
 0x28f   : > { %3376 = vmatprep.subr.bf16.mxu1 %v6274_v57  ;;  %7225 = vrsqrt.f32 %v3929_v40  ;;  %v3646_v37 = vadd.f32 %v3645_v35, %v3644_v36  ;;  %v3788_v23 = vadd.f32 %v3787_v12, %v3786_v2  ;;  %v6281_v22 = vcombine.low %v575_v38, %v579_v3  ;;  %v599_v36 = vld [vmem:[%s7842_s10 + $0x5d8] sm:$0xff] }
 0x290   : > { %7227 = vrcp.f32 %v4029_v5  ;;  %v3830_v30 = vmul.f32 0.0625, %v3762_v25  ;;  %v7220_v26 = vpop.eup %7219  ;;  %v6290_v20 = vcombine.high %v583_v24, %v587_v45  ;;  %v6289_v3 = vcombine.low %v583_v24, %v587_v45  ;;  %v603_v2 = vld [vmem:[%s7842_s10 + $0x5f8] sm:$0xff] }
 0x291   : > { %7229 = vrcp.f32 %v4033_v17  ;;  %v3789_v57 = vrot.slane %v3788_v23, 1  ;;  %v8770_v1 = vmul.f32 0.0625, %v3646_v37  ;;  %v7222_v29 = vpop.eup %7221  ;;  %v4030_v61 = vadd.f32 1.0, %v7220_v26  ;;  %v9454_v26 = vld [vmem:[#allocation19_spill] sm:$0xff] }
 0x292   : > { %3377 = vmatpush1.bf16.msra.mxu1 %v6273_v41  ;;  %v3862_v31 = vsub.f32 %v3830_v30, %v3846_v15  ;;  %v4034_v4 = vadd.f32 1.0, %v7222_v29  ;;  %v6298_v47 = vcombine.high %v591_v39, %v595_v0  ;;  %v6297_v52 = vcombine.low %v591_v39, %v595_v0  ;;  %v627_v29 = vld [vmem:[%s7842_s10 + $0x6b8] sm:$0xff] }
 0x293   : > { %3378 = vmatprep.subr.bf16.mxu1 %v6282_v10  ;;  %v3790_v58 = vadd.f32 %v3789_v57, %v3788_v23  ;;  %v3850_v54 = vmul.f32 %v8770_v1, %v8770_v1  ;;  %v3906_v56 = vsub.f32 %v8614_v16, %v8770_v1  ;;  %7231 = vrcp.f32 %v4030_v61 }
 0x294   : > { %v3878_v60 = vmax.f32 %v3862_v31, 0.0  ;;  %v3914_v38 = vsub.f32 %v8650_v55, %v8770_v1  ;;  %7233 = vrcp.f32 %v4034_v4  ;;  %v6306_v59 = vcombine.high %v599_v36, %v603_v2  ;;  %v635_v31 = vld [vmem:[%s7842_s10 + $0x6f8] sm:$0xff] }
 0x295   : > { %v3834_v48 = vmul.f32 0.0625, %v3790_v58 }
 0x296   : > { %3379 = vmatpush1.bf16.msra.mxu1 %v6281_v22  ;;  %v3926_v62 = vadd.f32 1e-05, %v3878_v60 }
 0x297   : > { %3380 = vmatprep.subr.bf16.mxu1 %v6290_v20  ;;  %v3866_v41 = vsub.f32 %v3834_v48, %v3850_v54  ;;  %v623_v20 = vld [vmem:[%s7842_s10 + $0x698] sm:$0xff] }
 0x298   : > { %v7224_v13 = vpop.eup %7223  ;;  %7235 = vrsqrt.f32 %v3926_v62  ;;  %v6330_v34 = vcombine.high %v623_v20, %v627_v29 }
 0x299   : > { %v7226_v53 = vpop.eup %7225  ;;  %v8785_v14 = vmul.f32 %v7224_v13, %v3909_v33  ;;  %v3882_v10 = vmax.f32 %v3866_v41, 0.0  ;;  %v8790_v19 = vmul.f32 %v7224_v13, %v3901_v51  ;;  %v611_v33 = vld [vmem:[%s7842_s10 + $0x638] sm:$0xff]  ;;  %v6305_v51 = vcombine.low %v599_v36, %v603_v2 }
 0x29a   : > { %3381 = vmatpush1.bf16.msra.mxu1 %v6289_v3  ;;  %v7228_v40 = vpop.eup %7227  ;;  %v3969_v35 = vmul.f32 %v7226_v53, %v3905_v63  ;;  %v3977_v12 = vmul.f32 %v7226_v53, %v3913_v44  ;;  %v6314_v18 = vcombine.high %v607_v50, %v611_v33  ;;  %v619_v44 = vld [vmem:[%s7842_s10 + $0x678] sm:$0xff]  ;;  %v6313_v45 = vcombine.low %v607_v50, %v611_v33 }
 0x29b   : > { %3382 = vmatprep.subr.bf16.mxu1 %v6298_v47  ;;  %v7230_v28 = vpop.eup %7229  ;;  %v3930_v5 = vadd.f32 1e-05, %v3882_v10  ;;  %v4077_v25 = vmul.f32 %v7228_v40, %v8679_v8  ;;  %v6322_v23 = vcombine.high %v615_v7, %v619_v44  ;;  %v6321_v54 = vcombine.low %v615_v7, %v619_v44  ;;  %v643_v50 = vld [vmem:[%s7842_s10 + $0x738] sm:$0xff] }
 0x29c   : > { %v6507_v49 = vmul.f32 -1.442695, %v3969_v35  ;;  %v6511_v42 = vmul.f32 -1.442695, %v3977_v12  ;;  %v4081_v15 = vmul.f32 %v7230_v28, %v8684_v43  ;;  %v6329_v47 = vcombine.low %v623_v20, %v627_v29  ;;  %v639_v12 = vld [vmem:[%s7842_s10 + $0x718] sm:$0xff] }
 0x29d   : > { %7237 = vrsqrt.f32 %v3930_v5  ;;  %v7232_v63 = vpop.eup %7231  ;;  %v6345_v44 = vcombine.low %v639_v12, %v643_v50 }
 0x29e   : > { %3383 = vmatpush1.bf16.msra.mxu1 %v6297_v52  ;;  %7239 = vpow2.f32 %v6507_v49  ;;  %v4286_v46 = vpack.c.bf16 %v4081_v15, %v4077_v25  ;;  %v7234_v24 = vpop.eup %7233  ;;  %v4078_v8 = vmul.f32 %v7232_v63, %v8746_v32  ;;  %v647_v63 = vld [vmem:[%s7842_s10 + $0x758] sm:$0xff] }
 0x29f   : > { %3384 = vmatprep.subr.bf16.mxu1 %v6306_v59  ;;  %7241 = vpow2.f32 %v6511_v42  ;;  %v4082_v43 = vmul.f32 %v7234_v24, %v8695_v21  ;;  %v631_v21 = vld [vmem:[%s7842_s10 + $0x6d8] sm:$0xff] }
 0x2a0   : > { %v4295_v17 = vpack.i.b16 %v4286_v46, %v4286_v46  ;;  %v4358_v37 = vrot.slane %v4286_v46, 7  ;;  %v6338_v27 = vcombine.high %v631_v21, %v635_v31  ;;  %v6337_v49 = vcombine.low %v631_v21, %v635_v31  ;;  %v651_v46 = vld [vmem:[%s7842_s10 + $0x778] sm:$0xff] }
 0x2a1   : > { %v4287_v22 = vpack.c.bf16 %v4082_v43, %v4078_v8  ;;  %v6354_v24 = vcombine.high %v647_v63, %v651_v46  ;;  %v655_v8 = vld [vmem:[%s7842_s10 + $0x798] sm:$0xff]  ;;  %v6353_v43 = vcombine.low %v647_v63, %v651_v46 }
 0x2a2   : > { %3385 = vmatpush1.bf16.msra.mxu1 %v6305_v51  ;;  %v7236_v30 = vpop.eup %7235  ;;  %v4300_v57 = vrot.slane %v4295_v17, %v9454_v26  ;;  %v4404_v39 = vshll.u32 %v4358_v37, 16  ;;  %v6346_v51 = vcombine.high %v639_v12, %v643_v50 }
 0x2a3   : > { %3386 = vmatprep.subr.bf16.mxu1 %v6314_v18  ;;  %v8812_v61 = vmul.f32 %v7236_v30, %v3910_v11  ;;  %v8817_v32 = vmul.f32 %v7236_v30, %v3902_v9  ;;  %v4302_v0 = vpack.i.b16 %v4287_v22, %v4287_v22  ;;  %v4359_v4 = vrot.slane %v4287_v22, 7  ;;  %v663_v22 = vld [vmem:[%s7842_s10 + $0x7d8] sm:$0xff] }
 0x2a4   : > { %v4368_v58 = vsel %vm837_vm0, %v4300_v57, %v4358_v37  ;;  %v4495_v11 = vrot.slane %v4358_v37, 1  ;;  %v4406_v36 = vrot.slane %v4404_v39, 1  ;;  %v667_v57 = vld [vmem:[%s7842_s10 + $0x7f8] sm:$0xff] }
 0x2a5   : > { %v4400_v60 = vshll.u32 %v4368_v58, 16  ;;  %v4494_v3 = vrot.slane %v4368_v58, 1  ;;  %v4307_v48 = vrot.slane %v4302_v0, %v9454_v26  ;;  %v4398_v9 = vshrl.u32 %v4368_v58, 16 }
 0x2a6   : > { %3387 = vmatpush1.bf16.msra.mxu1 %v6313_v45  ;;  %v4414_v10 = vshll.u32 %v4359_v4, 16  ;;  %v4498_v28 = vrot.slane %v4359_v4, 1  ;;  %v659_v45 = vld [vmem:[%s7842_s10 + $0x7b8] sm:$0xff] }
 0x2a7   : > { %3388 = vmatprep.subr.bf16.mxu1 %v6322_v23  ;;  %v7238_v6 = vpop.eup %7237  ;;  %v4402_v62 = vrot.slane %v4400_v60, 1  ;;  %v8824_v2 = vsel %vm903_vm2, %v4494_v3, %v4495_v11  ;;  %v4372_v53 = vsel %vm837_vm0, %v4307_v48, %v4359_v4  ;;  %v6362_v37 = vcombine.high %v655_v8, %v659_v45  ;;  %v675_v60 = vld [vmem:[%s7842_s10 + $0x838] sm:$0xff] }
 0x2a8   : > { %v7240_v41 = vpop.eup %7239  ;;  %v3970_v13 = vmul.f32 %v7238_v6, %v3906_v56  ;;  %v3978_v52 = vmul.f32 %v7238_v6, %v3914_v38  ;;  %v4410_v35 = vshll.u32 %v4372_v53, 16  ;;  %5518 = vmatprep.mubr.bf16.mxu0 %v4372_v53  ;;  %v4497_v55 = vrot.slane %v4372_v53, 1  ;;  %v679_v48 = vld [vmem:[%s7842_s10 + $0x858] sm:$0xff] }
 0x2a9   : > { %v7242_v59 = vpop.eup %7241  ;;  %v4037_v40 = vadd.f32 1.0, %v7240_v41  ;;  %v4403_v33 = vor.u32 %v4402_v62, %v4398_v9  ;;  %5519 = vmatmul.mubr.bf16.vlgmr.msra.gmra.mrb[8].mxu0 %v4368_v58  ;;  %v4408_v1 = vshrl.u32 %v4372_v53, 16  ;;  %v4416_v18 = vrot.slane %v4414_v10, 1  ;;  %v687_v10 = vld [vmem:[%s7842_s10 + $0x898] sm:$0xff] }
 0x2aa   : > { %3389 = vmatpush1.bf16.msra.mxu1 %v6321_v54  ;;  %v4041_v5 = vadd.f32 1.0, %v7242_v59  ;;  %v6508_v16 = vmul.f32 -1.442695, %v3970_v13  ;;  %v6512_v56 = vmul.f32 -1.442695, %v3978_v52  ;;  %v4412_v38 = vrot.slane %v4410_v35, 1 }
 0x2ab   : > { %3390 = vmatprep.subr.bf16.mxu1 %v6330_v34  ;;  %7243 = vrcp.f32 %v4037_v40  ;;  %v8836_v25 = vsel %vm854_vm1, %v4403_v33, %v4406_v36  ;;  %v8839_v42 = vsel %vm903_vm2, %v4497_v55, %v4498_v28  ;;  %v6361_v39 = vcombine.low %v655_v8, %v659_v45  ;;  %v671_v54 = vld [vmem:[%s7842_s10 + $0x818] sm:$0xff]  ;;  %v9455_v35 = vld [vmem:[#allocation24_spill] sm:$0xff]  ;;  %v9456_v33 = vld [vmem:[#allocation25_spill] sm:$0xff] }
 0x2ac   : > { %7245 = vrcp.f32 %v4041_v5  ;;  %v4413_v15 = vor.u32 %v4412_v38, %v4408_v1  ;;  %v6370_v58 = vcombine.high %v663_v22, %v667_v57  ;;  %v6369_v34 = vcombine.low %v663_v22, %v667_v57  ;;  %v691_v59 = vld [vmem:[%s7842_s10 + $0x8b8] sm:$0xff] }
 0x2ad   : > { %7247 = vpow2.f32 %v6508_v16  ;;  %v6378_v11 = vcombine.high %v671_v54, %v675_v60  ;;  %v6377_v6 = vcombine.low %v671_v54, %v675_v60  ;;  %v6394_v55 = vcombine.high %v687_v10, %v691_v59  ;;  %v695_v38 = vld [vmem:[%s7842_s10 + $0x8d8] sm:$0xff] }
 0x2ae   : > { %3391 = vmatpush1.bf16.msra.mxu1 %v6329_v47  ;;  %7249 = vpow2.f32 %v6512_v56  ;;  %v8844_v7 = vsel %vm854_vm1, %v4413_v15, %v4416_v18  ;;  %v683_v47 = vld [vmem:[%s7842_s10 + $0x878] sm:$0xff]  ;;  %v6393_v18 = vcombine.low %v687_v10, %v691_v59 }
 0x2af   : > { %3392 = vmatprep.subr.bf16.mxu1 %v6338_v27  ;;  %v6386_v13 = vcombine.high %v679_v48, %v683_v47  ;;  %v6385_v50 = vcombine.low %v679_v48, %v683_v47  ;;  %v9457_v8 = vld [vmem:[#allocation26_spill] sm:$0xff] }
 0x2b0   : > { %v723_v54 = vld [vmem:[%s7842_s10 + $0x9b8] sm:$0xff] }
 0x2b1   : > { %v731_v48 = vld [vmem:[%s7842_s10 + $0x9f8] sm:$0xff] }
 0x2b2   : > { %3393 = vmatpush1.bf16.msra.mxu1 %v6337_v49  ;;  %v699_v49 = vld [vmem:[%s7842_s10 + $0x8f8] sm:$0xff] }
 0x2b3   : > { %3394 = vmatprep.subr.bf16.mxu1 %v6346_v51  ;;  %v6402_v63 = vcombine.high %v695_v38, %v699_v49  ;;  %v6401_v45 = vcombine.low %v695_v38, %v699_v49  ;;  %v751_v10 = vld [vmem:[%s7842_s10 + $0xa98] sm:$0xff] }
 0x2b4   : > { %v755_v59 = vld [vmem:[%s7842_s10 + $0xab8] sm:$0xff] }
 0x2b5   : > { %v7244_v17 = vpop.eup %7243  ;;  %v775_v38 = vld [vmem:[%s7842_s10 + $0xb58] sm:$0xff] }
 0x2b6   : > { %3395 = vmatpush1.bf16.msra.mxu1 %v6345_v44  ;;  %v7246_v23 = vpop.eup %7245  ;;  %v4085_v30 = vmul.f32 %v7244_v17, %v8790_v19  ;;  %v703_v44 = vld [vmem:[%s7842_s10 + $0x918] sm:$0xff] }
 0x2b7   : > { %3396 = vmatprep.subr.bf16.mxu1 %v6354_v24  ;;  %v7248_v20 = vpop.eup %7247  ;;  %v4089_v29 = vmul.f32 %v7246_v23, %v8785_v14  ;;  %v707_v24 = vld [vmem:[%s7842_s10 + $0x938] sm:$0xff] }
 0x2b8   : > { %v7250_v21 = vpop.eup %7249  ;;  %v4038_v31 = vadd.f32 1.0, %v7248_v20  ;;  %v6410_v17 = vcombine.high %v703_v44, %v707_v24  ;;  %v711_v23 = vld [vmem:[%s7842_s10 + $0x958] sm:$0xff] }
 0x2b9   : > { %v4042_v0 = vadd.f32 1.0, %v7250_v21  ;;  %v4290_v4 = vpack.c.bf16 %v4089_v29, %v4085_v30  ;;  %v715_v30 = vld [vmem:[%s7842_s10 + $0x978] sm:$0xff]  ;;  %v6409_v21 = vcombine.low %v703_v44, %v707_v24 }
 0x2ba   : > { %3397 = vmatpush1.bf16.msra.mxu1 %v6353_v43  ;;  %7251 = vrcp.f32 %v4038_v31  ;;  %v9458_v43 = vld [vmem:[#allocation27_spill] sm:$0xff] }
 0x2bb   : > { %3398 = vmatprep.subr.bf16.mxu1 %v6362_v37  ;;  %7253 = vrcp.f32 %v4042_v0  ;;  %v4323_v19 = vpack.i.b16 %v4290_v4, %v4290_v4  ;;  %v4362_v3 = vrot.slane %v4290_v4, 7  ;;  %v6418_v0 = vcombine.high %v711_v23, %v715_v30  ;;  %v779_v49 = vld [vmem:[%s7842_s10 + $0xb78] sm:$0xff] }
 0x2bc   : > { %v6481_v44 = vcombine.low %v775_v38, %v779_v49 }
 0x2bd   : > { %v4328_v14 = vrot.slane %v4323_v19, %v9454_v26  ;;  %v4444_v62 = vshll.u32 %v4362_v3, 16  ;;  %v4507_v41 = vrot.slane %v4362_v3, 1 }
 0x2be   : > { %3399 = vmatpush1.bf16.msra.mxu1 %v6361_v39 }
 0x2bf   : > { %3400 = vmatprep.subr.bf16.mxu1 %v6370_v58  ;;  %v4384_v27 = vsel %vm837_vm0, %v4328_v14, %v4362_v3  ;;  %v4446_v5 = vrot.slane %v4444_v62, 1  ;;  %v719_v58 = vld [vmem:[%s7842_s10 + $0x998] sm:$0xff]  ;;  %v6417_v3 = vcombine.low %v711_v23, %v715_v30 }
 0x2c0   : > { %v4440_v9 = vshll.u32 %v4384_v27, 16  ;;  %v4506_v36 = vrot.slane %v4384_v27, 1  ;;  %v4438_v52 = vshrl.u32 %v4384_v27, 16  ;;  %v6425_v47 = vcombine.low %v719_v58, %v723_v54  ;;  %v9461_v23 = vld [vmem:[#allocation30_spill] sm:$0xff] }
 0x2c1   : > { %v9462_v30 = vld [vmem:[#allocation18_spill] sm:$0xff] }
 0x2c2   : > { %3401 = vmatpush1.bf16.msra.mxu1 %v6369_v34  ;;  %v4442_v53 = vrot.slane %v4440_v9, 1  ;;  %v8861_v40 = vsel %vm903_vm2, %v4506_v36, %v4507_v41  ;;  %v6426_v34 = vcombine.high %v719_v58, %v723_v54  ;;  %v739_v9 = vld [vmem:[%s7842_s10 + $0xa38] sm:$0xff] }
 0x2c3   : > { %3423 = vmatprep.subr.bf16.mxu1 %v6378_v11  ;;  %v727_v11 = vld [vmem:[%s7842_s10 + $0x9d8] sm:$0xff] }
 0x2c4   : > { %v7252_v12 = vpop.eup %7251  ;;  %v4443_v28 = vor.u32 %v4442_v53, %v4438_v52  ;;  %v6433_v62 = vcombine.low %v727_v11, %v731_v48  ;;  %v743_v41 = vld [vmem:[%s7842_s10 + $0xa58] sm:$0xff] }
 0x2c5   : > { %3403 = vmatmul.mubr.bf16.vlgmr.msra.gmra.mrb[16].mxu1 %v9455_v35  ;;  %v7254_v16 = vpop.eup %7253  ;;  %v4086_v56 = vmul.f32 %v7252_v12, %v8817_v32  ;;  %v6458_v12 = vcombine.high %v751_v10, %v755_v59 }
 0x2c6   : > { %3424 = vmatpush1.bf16.msra.mxu1 %v6377_v6  ;;  %3412 = vmatprep.mubr.bf16.mxu1 %v9456_v33  ;;  %v4090_v1 = vmul.f32 %v7254_v16, %v8812_v61  ;;  %v8870_v51 = vsel %vm854_vm1, %v4443_v28, %v4446_v5  ;;  %v735_v6 = vld [vmem:[%s7842_s10 + $0xa18] sm:$0xff]  ;;  %v6457_v28 = vcombine.low %v751_v10, %v755_v59 }
 0x2c7   : > { %3425 = vmatprep.subr.bf16.mxu1 %v6386_v13  ;;  %v6442_v36 = vcombine.high %v735_v6, %v739_v9  ;;  %v747_v13 = vld [vmem:[%s7842_s10 + $0xa78] sm:$0xff]  ;;  %v6441_v52 = vcombine.low %v735_v6, %v739_v9 }
 0x2c8   : > { %v4291_v15 = vpack.c.bf16 %v4090_v1, %v4086_v56  ;;  %v6450_v53 = vcombine.high %v743_v41, %v747_v13  ;;  %v6449_v35 = vcombine.low %v743_v41, %v747_v13  ;;  %v763_v33 = vld [vmem:[%s7842_s10 + $0xaf8] sm:$0xff] }
 0x2c9   : > { %v767_v16 = vld [vmem:[%s7842_s10 + $0xb18] sm:$0xff] }
 0x2ca   : > { %3426 = vmatpush1.bf16.msra.mxu1 %v6385_v50  ;;  %v4330_v46 = vpack.i.b16 %v4291_v15, %v4291_v15  ;;  %v4363_v32 = vrot.slane %v4291_v15, 7  ;;  %v759_v50 = vld [vmem:[%s7842_s10 + $0xad8] sm:$0xff] }
 0x2cb   : > { %3427 = vmatprep.subr.bf16.mxu1 %v6394_v55  ;;  %v6466_v5 = vcombine.high %v759_v50, %v763_v33  ;;  %v771_v56 = vld [vmem:[%s7842_s10 + $0xb38] sm:$0xff]  ;;  %v6465_v55 = vcombine.low %v759_v50, %v763_v33 }
 0x2cc   : > { %v4335_v61 = vrot.slane %v4330_v46, %v9454_v26  ;;  %v4454_v57 = vshll.u32 %v4363_v32, 16  ;;  %v4510_v29 = vrot.slane %v4363_v32, 1  ;;  %v6474_v1 = vcombine.high %v767_v16, %v771_v56  ;;  %v787_v46 = vld [vmem:[%s7842_s10 + $0xbb8] sm:$0xff] }
 0x2cd   : > { %3413 = vmatmul.mubr.bf16.gmra.mrb[20].mxu1 %v9457_v8  ;;  %v6473_v15 = vcombine.low %v767_v16, %v771_v56  ;;  %v795_v8 = vld [vmem:[%s7842_s10 + $0xbf8] sm:$0xff] }
 0x2ce   : > { %3428 = vmatpush1.bf16.msra.mxu1 %v6393_v18  ;;  %3455 = vmatprep.mubr.bf16.mxu1 %v9458_v43  ;;  %v4388_v37 = vsel %vm837_vm0, %v4335_v61, %v4363_v32  ;;  %v4456_v19 = vrot.slane %v4454_v57, 1  ;;  %v6482_v18 = vcombine.high %v775_v38, %v779_v49  ;;  %v791_v32 = vld [vmem:[%s7842_s10 + $0xbd8] sm:$0xff]  ;;  %v3491_v57 = vsub.s32 3, %v9462_v30 }
 0x2cf   : > { %3429 = vmatprep.subr.bf16.mxu1 %v6402_v63  ;;  %v4450_v22 = vshll.u32 %v4388_v37, 16  ;;  %5528 = vmatprep.mubr.bf16.mxu0 %v4388_v37  ;;  %v4509_v20 = vrot.slane %v4388_v37, 1  ;;  %v4448_v31 = vshrl.u32 %v4388_v37, 16  ;;  %v783_v63 = vld [vmem:[%s7842_s10 + $0xb98] sm:$0xff]  ;;  %v6497_v43 = vcombine.low %v791_v32, %v795_v8  ;;  %v9460_v37 = vld [vmem:[#allocation29_spill] sm:$0xff] }
 0x2d0   : > { %5529 = vmatmul.mubr.bf16.gmra.mrb[12].mxu0 %v4384_v27  ;;  %v6434_v27 = vcombine.high %v727_v11, %v731_v48  ;;  %v6490_v24 = vcombine.high %v783_v63, %v787_v46  ;;  %v6489_v61 = vcombine.low %v783_v63, %v787_v46 }
 0x2d1   : > { %v4452_v39 = vrot.slane %v4450_v22, 1  ;;  %v8881_v4 = vsel %vm903_vm2, %v4509_v20, %v4510_v29  ;;  %v3487_v22 = vsub.s32 2, %v9462_v30  ;;  %v8912_v20 = vld [vmem:[%s7848_s6] sm:$0xff] }
 0x2d2   : > { %3430 = vmatpush1.bf16.msra.mxu1 %v6401_v45  ;;  %v6498_v45 = vcombine.high %v791_v32, %v795_v8 }
 0x2d3   : > { %3431 = vmatprep.subr.bf16.mxu1 %v6410_v17  ;;  %v4453_v60 = vor.u32 %v4452_v39, %v4448_v31  ;;  %v9459_v17 = vld [vmem:[#allocation28_spill] sm:$0xff]  ;;  %v3488_v29 = vrot.slane %v8912_v20, %v3487_v22 }
 0x2d5   : > { %v8886_v14 = vsel %vm854_vm1, %v4453_v60, %v4456_v19 }
 0x2d6   : > { %3432 = vmatpush1.bf16.msra.mxu1 %v6409_v21  ;;  %v3492_v21 = vrot.slane %v8912_v20, %v3491_v57 }
 0x2d7   : > { %3433 = vmatprep.subr.bf16.mxu1 %v6418_v0 }
 0x2da   : > { %3434 = vmatpush1.bf16.msra.mxu1 %v6417_v3 }
 0x2db   : > { %3435 = vmatprep.subr.bf16.mxu1 %v6426_v34 }
 0x2de   : > { %3436 = vmatpush1.bf16.msra.mxu1 %v6425_v47 }
 0x2df   : > { %3437 = vmatprep.subr.bf16.mxu1 %v6434_v27 }
 0x2e2   : > { %3438 = vmatpush1.bf16.msra.mxu1 %v6433_v62 }
 0x2e3   : > { %3439 = vmatprep.subr.bf16.mxu1 %v6442_v36 }
 0x2e6   : > { %3440 = vmatpush1.bf16.msra.mxu1 %v6441_v52 }
 0x2e7   : > { %3441 = vmatprep.subr.bf16.mxu1 %v6450_v53 }
 0x2ea   : > { %3442 = vmatpush1.bf16.msra.mxu1 %v6449_v35 }
 0x2eb   : > { %3443 = vmatprep.subr.bf16.mxu1 %v6458_v12 }
 0x2ee   : > { %3444 = vmatpush1.bf16.msra.mxu1 %v6457_v28 }
 0x2ef   : > { %3445 = vmatprep.subr.bf16.mxu1 %v6466_v5 }
 0x2f2   : > { %3446 = vmatpush1.bf16.msra.mxu1 %v6465_v55 }
 0x2f3   : > { %3447 = vmatprep.subr.bf16.mxu1 %v6474_v1 }
 0x2f6   : > { %3448 = vmatpush1.bf16.msra.mxu1 %v6473_v15 }
 0x2f7   : > { %3449 = vmatprep.subr.bf16.mxu1 %v6482_v18 }
 0x2fa   : > { %3450 = vmatpush1.bf16.msra.mxu1 %v6481_v44 }
 0x2fb   : > { %3451 = vmatprep.subr.bf16.mxu1 %v6490_v24 }
 0x2fe   : > { %3452 = vmatpush1.bf16.msra.mxu1 %v6489_v61 }
 0x2ff   : > { %3453 = vmatprep.subr.bf16.mxu1 %v6498_v45 }
 0x302   : > { %3454 = vmatpush1.bf16.msra.mxu1 %v6497_v43 }
 0x305   : > { %3456 = vmatmul.mubr.bf16.vlgmr.msra.gmra.mrb[16].mxu1 %v9459_v17 }
 0x306   : > { %3465 = vmatprep.mubr.bf16.mxu1 %v9460_v37 }
 0x30d   : > { %3466 = vmatmul.mubr.bf16.gmra.mrb[20].mxu1 %v9461_v23 }
 0x311   : > { %v3139_v31 = vpop.f32.mrb[8].mxu1 }
 0x312   : > { %v8916_v39 = vadd.f32 %v3488_v29, %v3139_v31  ;;  %v3141_v0 = vpop.f32.mrb[9].mxu1 }
 0x313   : > { %v8918_v58 = vadd.f32 %v3492_v21, %v3141_v0  ;;  %v3143_v54 = vpop.f32.mrb[10].mxu1 }
 0x314   : > { %v8920_v60 = vadd.f32 %v3488_v29, %v3143_v54  ;;  %v3145_v19 = vpop.f32.mrb[11].mxu1  ;;  %v3663_v34 = vmul.f32 %v8916_v39, %v8916_v39 }
 0x315   : > { %v8922_v3 = vadd.f32 %v3492_v21, %v3145_v19  ;;  %v3664_v47 = vmul.f32 %v8918_v58, %v8918_v58 }
 0x316   : > { %v3563_v11 = vadd.f32 %v8920_v60, %v8916_v39  ;;  %v3671_v48 = vmul.f32 %v8920_v60, %v8920_v60 }
 0x317   : > { %v3570_v27 = vadd.f32 %v8922_v3, %v8918_v58  ;;  %v3672_v6 = vmul.f32 %v8922_v3, %v8922_v3 }
 0x318   : > { %v3564_v9 = vrot.slane %v3563_v11, 4  ;;  %v3707_v62 = vadd.f32 %v3671_v48, %v3663_v34 }
 0x319   : > { %v3571_v36 = vrot.slane %v3570_v27, 4  ;;  %v3714_v41 = vadd.f32 %v3672_v6, %v3664_v47  ;;  %v3149_v13 = vpop.f32.mrb[12].mxu1 }
 0x31a   : > { %v3565_v52 = vadd.f32 %v3564_v9, %v3563_v11  ;;  %v3708_v53 = vrot.slane %v3707_v62, 4  ;;  %v8936_v10 = vadd.f32 %v3488_v29, %v3149_v13  ;;  %v3151_v59 = vpop.f32.mrb[13].mxu1 }
 0x31b   : > { %v3572_v35 = vadd.f32 %v3571_v36, %v3570_v27  ;;  %v3715_v12 = vrot.slane %v3714_v41, 4  ;;  %v8938_v50 = vadd.f32 %v3492_v21, %v3151_v59  ;;  %v3153_v33 = vpop.f32.mrb[14].mxu1 }
 0x31c   : > { %v3566_v28 = vrot.slane %v3565_v52, 2  ;;  %v3709_v5 = vadd.f32 %v3708_v53, %v3707_v62  ;;  %v3679_v16 = vmul.f32 %v8936_v10, %v8936_v10  ;;  %v8942_v56 = vadd.f32 %v3488_v29, %v3153_v33  ;;  %v3155_v55 = vpop.f32.mrb[15].mxu1 }
 0x31d   : > { %v3573_v1 = vrot.slane %v3572_v35, 2  ;;  %v3716_v38 = vadd.f32 %v3715_v12, %v3714_v41  ;;  %v3680_v49 = vmul.f32 %v8938_v50, %v8938_v50  ;;  %v8946_v15 = vadd.f32 %v3492_v21, %v3155_v55 }
 0x31e   : > { %v3567_v18 = vadd.f32 %v3566_v28, %v3565_v52  ;;  %v3710_v63 = vrot.slane %v3709_v5, 2  ;;  %v3619_v46 = vadd.f32 %v8942_v56, %v8936_v10  ;;  %v3687_v44 = vmul.f32 %v8942_v56, %v8942_v56 }
 0x31f   : > { %v3574_v24 = vadd.f32 %v3573_v1, %v3572_v35  ;;  %v3717_v32 = vrot.slane %v3716_v38, 2  ;;  %v3626_v8 = vadd.f32 %v8946_v15, %v8938_v50  ;;  %v3688_v61 = vmul.f32 %v8946_v15, %v8946_v15 }
 0x320   : > { %v3568_v45 = vrot.slane %v3567_v18, 1  ;;  %v3711_v43 = vadd.f32 %v3710_v63, %v3709_v5  ;;  %v3620_v17 = vrot.slane %v3619_v46, 4  ;;  %v3763_v37 = vadd.f32 %v3687_v44, %v3679_v16 }
 0x321   : > { %v3575_v23 = vrot.slane %v3574_v24, 1  ;;  %v3718_v22 = vadd.f32 %v3717_v32, %v3716_v38  ;;  %v3627_v57 = vrot.slane %v3626_v8, 4  ;;  %v3770_v29 = vadd.f32 %v3688_v61, %v3680_v49 }
 0x322   : > { %v3569_v21 = vadd.f32 %v3568_v45, %v3567_v18  ;;  %v3712_v31 = vrot.slane %v3711_v43, 1  ;;  %v3621_v0 = vadd.f32 %v3620_v17, %v3619_v46  ;;  %v3764_v54 = vrot.slane %v3763_v37, 4 }
 0x323   : > { %v3576_v19 = vadd.f32 %v3575_v23, %v3574_v24  ;;  %v3719_v34 = vrot.slane %v3718_v22, 1  ;;  %v3628_v11 = vadd.f32 %v3627_v57, %v3626_v8  ;;  %v3771_v48 = vrot.slane %v3770_v29, 4 }
 0x324   : > { %v3713_v47 = vadd.f32 %v3712_v31, %v3711_v43  ;;  %v3807_v27 = vmul.f32 0.0625, %v3569_v21  ;;  %v3622_v6 = vrot.slane %v3621_v0, 2  ;;  %v3765_v9 = vadd.f32 %v3764_v54, %v3763_v37 }
 0x325   : > { %v3720_v62 = vadd.f32 %v3719_v34, %v3718_v22  ;;  %v3808_v36 = vmul.f32 0.0625, %v3576_v19  ;;  %v3629_v41 = vrot.slane %v3628_v11, 2  ;;  %v3772_v13 = vadd.f32 %v3771_v48, %v3770_v29 }
 0x326   : > { %v3823_v52 = vmul.f32 0.0625, %v3713_v47  ;;  %v3839_v53 = vmul.f32 %v3807_v27, %v3807_v27  ;;  %v3887_v59 = vsub.f32 %v8916_v39, %v3807_v27  ;;  %v3895_v35 = vsub.f32 %v8920_v60, %v3807_v27 }
 0x327   : > { %v3824_v12 = vmul.f32 0.0625, %v3720_v62  ;;  %v3840_v33 = vmul.f32 %v3808_v36, %v3808_v36  ;;  %v3888_v28 = vsub.f32 %v8918_v58, %v3808_v36  ;;  %v3896_v5 = vsub.f32 %v8922_v3, %v3808_v36 }
 0x328   : > { %v3855_v16 = vsub.f32 %v3823_v52, %v3839_v53  ;;  %v3623_v55 = vadd.f32 %v3622_v6, %v3621_v0  ;;  %v3766_v1 = vrot.slane %v3765_v9, 2  ;;  %v3630_v38 = vadd.f32 %v3629_v41, %v3628_v11 }
 0x329   : > { %v3856_v49 = vsub.f32 %v3824_v12, %v3840_v33  ;;  %v3773_v18 = vrot.slane %v3772_v13, 2  ;;  %v6967_v12 = vld [vmem:[%s7850_s17 + $0x100] ss:$8 sps:$4 sm:$0xff]   ;;  %v6972_v33 = vld [vmem:[%s7850_s17 + $0x114] ss:$8 sps:$4 sm:$0xff]  }
 0x32a   : > { %v3871_v63 = vmax.f32 %v3855_v16, 0.0  ;;  %v3624_v46 = vrot.slane %v3623_v55, 1  ;;  %v3767_v44 = vadd.f32 %v3766_v1, %v3765_v9  ;;  %v3631_v24 = vrot.slane %v3630_v38, 1  ;;  %v6973_v16 = vld [vmem:[%s7850_s17 + $0x120] ss:$8 sps:$4 sm:$0xff]  }
 0x32b   : > { %v3872_v32 = vmax.f32 %v3856_v49, 0.0  ;;  %v3774_v39 = vadd.f32 %v3773_v18, %v3772_v13  ;;  %v6976_v1 = vld [vmem:[%s7850_s17 + $0x130] ss:$8 sps:$4 sm:$0xff]   ;;  %v6979_v49 = vld [vmem:[%s7850_s17 + $0x140] ss:$8 sps:$4 sm:$0xff]  }
 0x32c   : > { %v3919_v8 = vadd.f32 1e-05, %v3871_v63  ;;  %v3625_v60 = vadd.f32 %v3624_v46, %v3623_v55  ;;  %v3768_v61 = vrot.slane %v3767_v44, 1  ;;  %v3632_v45 = vadd.f32 %v3631_v24, %v3630_v38  ;;  %v6978_v55 = vld [vmem:[%s7850_s17 + $0x134] ss:$8 sps:$4 sm:$0xff]  }
 0x32d   : > { %v3920_v43 = vadd.f32 1e-05, %v3872_v32  ;;  %v3775_v58 = vrot.slane %v3774_v39, 1  ;;  %v6981_v38 = vld [vmem:[%s7850_s17 + $0x144] ss:$8 sps:$4 sm:$0xff]  }
 0x32e   : > { %7255 = vrsqrt.f32 %v3919_v8  ;;  %v3769_v3 = vadd.f32 %v3768_v61, %v3767_v44  ;;  %v3815_v17 = vmul.f32 0.0625, %v3625_v60  ;;  %v3816_v37 = vmul.f32 0.0625, %v3632_v45  ;;  %v6984_v18 = vld [vmem:[%s7850_s17 + $0x154] ss:$8 sps:$4 sm:$0xff]   ;;  %v6982_v63 = vld [vmem:[%s7850_s17 + $0x150] ss:$8 sps:$4 sm:$0xff]  }
 0x32f   : > { %7257 = vrsqrt.f32 %v3920_v43  ;;  %v3776_v23 = vadd.f32 %v3775_v58, %v3774_v39  ;;  %v6987_v46 = vld [vmem:[%s7850_s17 + $0x164] ss:$8 sps:$4 sm:$0xff]   ;;  %v6985_v44 = vld [vmem:[%s7850_s17 + $0x160] ss:$8 sps:$4 sm:$0xff]   ;;  %v6988_v24 = vld [vmem:[%s7850_s17 + $0x170] ss:$8 sps:$4 sm:$0xff]  }
 0x330   : > { %v3831_v22 = vmul.f32 0.0625, %v3769_v3  ;;  %v3847_v57 = vmul.f32 %v3815_v17, %v3815_v17  ;;  %v3903_v29 = vsub.f32 %v8936_v10, %v3815_v17  ;;  %v3911_v21 = vsub.f32 %v8942_v56, %v3815_v17  ;;  %v6990_v32 = vld [vmem:[%s7850_s17 + $0x174] ss:$8 sps:$4 sm:$0xff]   ;;  %v6993_v39 = vld [vmem:[%s7850_s17 + $0x184] ss:$8 sps:$4 sm:$0xff]  }
 0x331   : > { %v3832_v31 = vmul.f32 0.0625, %v3776_v23  ;;  %v3848_v0 = vmul.f32 %v3816_v37, %v3816_v37  ;;  %v3904_v54 = vsub.f32 %v8938_v50, %v3816_v37  ;;  %v3912_v19 = vsub.f32 %v8946_v15, %v3816_v37  ;;  %v6991_v8 = vld [vmem:[%s7850_s17 + $0x180] ss:$8 sps:$4 sm:$0xff]   ;;  %v6996_v60 = vld [vmem:[%s7850_s17 + $0x194] ss:$8 sps:$4 sm:$0xff]  }
 0x332   : > { %v3863_v34 = vsub.f32 %v3831_v22, %v3847_v57  ;;  %v6994_v61 = vld [vmem:[%s7850_s17 + $0x190] ss:$8 sps:$4 sm:$0xff]   ;;  %v6999_v45 = vld [vmem:[%s7850_s17 + $0x1a4] ss:$8 sps:$4 sm:$0xff]   ;;  %v6997_v43 = vld [vmem:[%s7850_s17 + $0x1a0] ss:$8 sps:$4 sm:$0xff]  }
 0x333   : > { %v3864_v11 = vsub.f32 %v3832_v31, %v3848_v0  ;;  %v7002_v58 = vld [vmem:[%s7850_s17 + $0x1b4] ss:$8 sps:$4 sm:$0xff]   ;;  %v7000_v3 = vld [vmem:[%s7850_s17 + $0x1b0] ss:$8 sps:$4 sm:$0xff]   ;;  %v7005_v17 = vld [vmem:[%s7850_s17 + $0x1c4] ss:$8 sps:$4 sm:$0xff]  }
 0x334   : > { %v3879_v48 = vmax.f32 %v3863_v34, 0.0  ;;  %v7003_v37 = vld [vmem:[%s7850_s17 + $0x1c0] ss:$8 sps:$4 sm:$0xff]   ;;  %v7008_v23 = vld [vmem:[%s7850_s17 + $0x1d4] ss:$8 sps:$4 sm:$0xff]  }
 0x335   : > { %v3880_v47 = vmax.f32 %v3864_v11, 0.0  ;;  %v7006_v22 = vld [vmem:[%s7850_s17 + $0x1d0] ss:$8 sps:$4 sm:$0xff]   ;;  %v7011_v57 = vld [vmem:[%s7850_s17 + $0x1e4] ss:$8 sps:$4 sm:$0xff]  }
 0x336   : > { %v3927_v27 = vadd.f32 1e-05, %v3879_v48  ;;  %v7012_v31 = vld [vmem:[%s7850_s17 + $0x1f0] ss:$8 sps:$4 sm:$0xff]   ;;  %v7017_v0 = vld [vmem:[%s7850_s17 + $0x204] ss:$8 sps:$4 sm:$0xff]  }
 0x337   : > { %v3928_v6 = vadd.f32 1e-05, %v3880_v47 }
 0x338   : > { %v7256_v9 = vpop.eup %7255  ;;  %7259 = vrsqrt.f32 %v3927_v27 }
 0x339   : > { %v7258_v62 = vpop.eup %7257  ;;  %v8964_v10 = vmul.f32 %v7256_v9, %v3887_v59  ;;  %v8966_v56 = vmul.f32 %v7256_v9, %v3895_v35  ;;  %7261 = vrsqrt.f32 %v3928_v6  ;;  %v6969_v35 = vld [vmem:[%s7850_s17 + $0x104] ss:$8 sps:$4 sm:$0xff]  }
 0x33a   : > { %v8968_v50 = vmul.f32 %v7258_v62, %v3896_v5  ;;  %v8970_v15 = vmul.f32 %v7258_v62, %v3888_v28  ;;  %5539 = vmatprep.subr.bf16.mxu0 %v6969_v35  ;;  %v6970_v28 = vld [vmem:[%s7850_s17 + $0x110] ss:$8 sps:$4 sm:$0xff]   ;;  %v6975_v5 = vld [vmem:[%s7850_s17 + $0x124] ss:$8 sps:$4 sm:$0xff]  }
 0x33b   : > { %5540 = vmatpush1.bf16.msra.mxu0 %v6967_v12 }
 0x33c   : > { %5541 = vmatprep.subr.bf16.mxu0 %v6972_v33 }
 0x33f   : > { %5542 = vmatpush1.bf16.msra.mxu0 %v6970_v28 }
 0x340   : > { %5543 = vmatprep.subr.bf16.mxu0 %v6975_v5 }
 0x342   : > { %v7260_v36 = vpop.eup %7259 }
 0x343   : > { %v7262_v41 = vpop.eup %7261  ;;  %v8972_v13 = vmul.f32 %v7260_v36, %v3911_v21  ;;  %v8974_v52 = vmul.f32 %v7260_v36, %v3903_v29  ;;  %5544 = vmatpush1.bf16.msra.mxu0 %v6973_v16  ;;  %v7009_v29 = vld [vmem:[%s7850_s17 + $0x1e0] ss:$8 sps:$4 sm:$0xff]   ;;  %v7014_v21 = vld [vmem:[%s7850_s17 + $0x1f4] ss:$8 sps:$4 sm:$0xff]  }
 0x344   : > { %v8976_v53 = vmul.f32 %v7262_v41, %v3912_v19  ;;  %v8978_v59 = vmul.f32 %v7262_v41, %v3904_v54  ;;  %5545 = vmatprep.subr.bf16.mxu0 %v6978_v55  ;;  %v3503_v54 = vsub.s32 6, %v9462_v30  ;;  %v3507_v19 = vsub.s32 7, %v9462_v30 }
 0x346   : > { %v3504_v34 = vrot.slane %v8912_v20, %v3503_v54  ;;  %v3508_v11 = vrot.slane %v8912_v20, %v3507_v19 }
 0x347   : > { %5546 = vmatpush1.bf16.msra.mxu0 %v6976_v1 }
 0x348   : > { %5547 = vmatprep.subr.bf16.mxu0 %v6981_v38 }
 0x34b   : > { %5548 = vmatpush1.bf16.msra.mxu0 %v6979_v49 }
 0x34c   : > { %5549 = vmatprep.subr.bf16.mxu0 %v6984_v18 }
 0x34f   : > { %5550 = vmatpush1.bf16.msra.mxu0 %v6982_v63 }
 0x350   : > { %5551 = vmatprep.subr.bf16.mxu0 %v6987_v46 }
 0x353   : > { %5552 = vmatpush1.bf16.msra.mxu0 %v6985_v44 }
 0x354   : > { %5553 = vmatprep.subr.bf16.mxu0 %v6990_v32 }
 0x357   : > { %5554 = vmatpush1.bf16.msra.mxu0 %v6988_v24 }
 0x358   : > { %5555 = vmatprep.subr.bf16.mxu0 %v6993_v39 }
 0x35b   : > { %5556 = vmatpush1.bf16.msra.mxu0 %v6991_v8 }
 0x35c   : > { %5557 = vmatprep.subr.bf16.mxu0 %v6996_v60 }
 0x35f   : > { %5558 = vmatpush1.bf16.msra.mxu0 %v6994_v61 }
 0x360   : > { %5559 = vmatprep.subr.bf16.mxu0 %v6999_v45 }
 0x363   : > { %5560 = vmatpush1.bf16.msra.mxu0 %v6997_v43 }
 0x364   : > { %5561 = vmatprep.subr.bf16.mxu0 %v7002_v58 }
 0x367   : > { %5562 = vmatpush1.bf16.msra.mxu0 %v7000_v3 }
 0x368   : > { %5563 = vmatprep.subr.bf16.mxu0 %v7005_v17 }
 0x36b   : > { %5564 = vmatpush1.bf16.msra.mxu0 %v7003_v37 }
 0x36c   : > { %5565 = vmatprep.subr.bf16.mxu0 %v7008_v23 }
 0x36f   : > { %5566 = vmatpush1.bf16.msra.mxu0 %v7006_v22 }
 0x370   : > { %5567 = vmatprep.subr.bf16.mxu0 %v7011_v57 }
 0x373   : > { %5568 = vmatpush1.bf16.msra.mxu0 %v7009_v29 }
 0x374   : > { %5569 = vmatprep.subr.bf16.mxu0 %v7014_v21 }
 0x377   : > { %5570 = vmatpush1.bf16.msra.mxu0 %v7012_v31 }
 0x378   : > { %5592 = vmatprep.subr.bf16.mxu0 %v7017_v0 }
 0x3d8   : > { %v3457_v48 = vpop.f32.mrb[16].mxu1 }
 0x3d9   : > { %v9017_v47 = vadd.f32 %v3504_v34, %v3457_v48  ;;  %v3459_v27 = vpop.f32.mrb[17].mxu1 }
 0x3da   : > { %v9019_v6 = vadd.f32 %v3508_v11, %v3459_v27  ;;  %v3461_v9 = vpop.f32.mrb[18].mxu1 }
 0x3db   : > { %v9021_v62 = vadd.f32 %v3504_v34, %v3461_v9  ;;  %v3463_v36 = vpop.f32.mrb[19].mxu1  ;;  %v3667_v35 = vmul.f32 %v9017_v47, %v9017_v47 }
 0x3dc   : > { %v9023_v41 = vadd.f32 %v3508_v11, %v3463_v36  ;;  %v3668_v33 = vmul.f32 %v9019_v6, %v9019_v6 }
 0x3dd   : > { %v3591_v12 = vadd.f32 %v9021_v62, %v9017_v47  ;;  %v3675_v20 = vmul.f32 %v9021_v62, %v9021_v62 }
 0x3de   : > { %v3598_v28 = vadd.f32 %v9023_v41, %v9019_v6  ;;  %v3676_v5 = vmul.f32 %v9023_v41, %v9023_v41 }
 0x3df   : > { %v3592_v16 = vrot.slane %v3591_v12, 4  ;;  %v3735_v55 = vadd.f32 %v3675_v20, %v3667_v35 }
 0x3e0   : > { %v3599_v1 = vrot.slane %v3598_v28, 4  ;;  %v3742_v38 = vadd.f32 %v3676_v5, %v3668_v33  ;;  %v3467_v49 = vpop.f32.mrb[20].mxu1 }
 0x3e1   : > { %v3593_v18 = vadd.f32 %v3592_v16, %v3591_v12  ;;  %v3736_v63 = vrot.slane %v3735_v55, 4  ;;  %v9037_v46 = vadd.f32 %v3504_v34, %v3467_v49  ;;  %v3469_v44 = vpop.f32.mrb[21].mxu1 }
 0x3e2   : > { %v3600_v24 = vadd.f32 %v3599_v1, %v3598_v28  ;;  %v3743_v32 = vrot.slane %v3742_v38, 4  ;;  %v9039_v39 = vadd.f32 %v3508_v11, %v3469_v44  ;;  %v3471_v8 = vpop.f32.mrb[22].mxu1 }
 0x3e3   : > { %v3594_v60 = vrot.slane %v3593_v18, 2  ;;  %v3737_v61 = vadd.f32 %v3736_v63, %v3735_v55  ;;  %v3683_v45 = vmul.f32 %v9037_v46, %v9037_v46  ;;  %v9043_v43 = vadd.f32 %v3504_v34, %v3471_v8  ;;  %v3473_v58 = vpop.f32.mrb[23].mxu1 }
 0x3e4   : > { %v3601_v3 = vrot.slane %v3600_v24, 2  ;;  %v3744_v17 = vadd.f32 %v3743_v32, %v3742_v38  ;;  %v3684_v37 = vmul.f32 %v9039_v39, %v9039_v39  ;;  %v9047_v23 = vadd.f32 %v3508_v11, %v3473_v58 }
 0x3e5   : > { %v3595_v22 = vadd.f32 %v3594_v60, %v3593_v18  ;;  %v3738_v57 = vrot.slane %v3737_v61, 2  ;;  %v3647_v29 = vadd.f32 %v9043_v43, %v9037_v46  ;;  %v3691_v21 = vmul.f32 %v9043_v43, %v9043_v43 }
 0x3e6   : > { %v3602_v31 = vadd.f32 %v3601_v3, %v3600_v24  ;;  %v3745_v0 = vrot.slane %v3744_v17, 2  ;;  %v3654_v54 = vadd.f32 %v9047_v23, %v9039_v39  ;;  %v3692_v19 = vmul.f32 %v9047_v23, %v9047_v23 }
 0x3e7   : > { %v3596_v34 = vrot.slane %v3595_v22, 1  ;;  %v3739_v48 = vadd.f32 %v3738_v57, %v3737_v61  ;;  %v3648_v11 = vrot.slane %v3647_v29, 4  ;;  %v3791_v27 = vadd.f32 %v3691_v21, %v3683_v45 }
 0x3e8   : > { %v3603_v9 = vrot.slane %v3602_v31, 1  ;;  %v3746_v36 = vadd.f32 %v3745_v0, %v3744_v17  ;;  %v3655_v35 = vrot.slane %v3654_v54, 4  ;;  %v3798_v12 = vadd.f32 %v3692_v19, %v3684_v37 }
 0x3e9   : > { %v3597_v20 = vadd.f32 %v3596_v34, %v3595_v22  ;;  %v3740_v33 = vrot.slane %v3739_v48, 1  ;;  %v3649_v28 = vadd.f32 %v3648_v11, %v3647_v29  ;;  %v3792_v5 = vrot.slane %v3791_v27, 4 }
 0x3ea   : > { %v3604_v16 = vadd.f32 %v3603_v9, %v3602_v31  ;;  %v3747_v55 = vrot.slane %v3746_v36, 1  ;;  %v3656_v1 = vadd.f32 %v3655_v35, %v3654_v54  ;;  %v3799_v38 = vrot.slane %v3798_v12, 4 }
 0x3eb   : > { %v3741_v49 = vadd.f32 %v3740_v33, %v3739_v48  ;;  %v3811_v18 = vmul.f32 0.0625, %v3597_v20  ;;  %v3650_v63 = vrot.slane %v3649_v28, 2  ;;  %v3793_v44 = vadd.f32 %v3792_v5, %v3791_v27 }
 0x3ec   : > { %v3748_v24 = vadd.f32 %v3747_v55, %v3746_v36  ;;  %v3812_v32 = vmul.f32 0.0625, %v3604_v16  ;;  %v3657_v8 = vrot.slane %v3656_v1, 2  ;;  %v3800_v60 = vadd.f32 %v3799_v38, %v3798_v12 }
 0x3ed   : > { %v3827_v61 = vmul.f32 0.0625, %v3741_v49  ;;  %v3843_v45 = vmul.f32 %v3811_v18, %v3811_v18  ;;  %v3891_v58 = vsub.f32 %v9017_v47, %v3811_v18  ;;  %v3899_v3 = vsub.f32 %v9021_v62, %v3811_v18 }
 0x3ee   : > { %v3828_v17 = vmul.f32 0.0625, %v3748_v24  ;;  %v3844_v37 = vmul.f32 %v3812_v32, %v3812_v32  ;;  %v3892_v22 = vsub.f32 %v9019_v6, %v3812_v32  ;;  %v3900_v57 = vsub.f32 %v9023_v41, %v3812_v32 }
 0x3ef   : > { %v3859_v29 = vsub.f32 %v3827_v61, %v3843_v45  ;;  %v3651_v21 = vadd.f32 %v3650_v63, %v3649_v28  ;;  %v3794_v31 = vrot.slane %v3793_v44, 2  ;;  %v3658_v0 = vadd.f32 %v3657_v8, %v3656_v1 }
 0x3f0   : > { %v3860_v54 = vsub.f32 %v3828_v17, %v3844_v37  ;;  %v3801_v19 = vrot.slane %v3800_v60, 2 }
 0x3f1   : > { %v3875_v34 = vmax.f32 %v3859_v29, 0.0  ;;  %v3652_v48 = vrot.slane %v3651_v21, 1  ;;  %v3795_v11 = vadd.f32 %v3794_v31, %v3793_v44  ;;  %v3659_v27 = vrot.slane %v3658_v0, 1 }
 0x3f2   : > { %v3876_v9 = vmax.f32 %v3860_v54, 0.0  ;;  %v3802_v47 = vadd.f32 %v3801_v19, %v3800_v60 }
 0x3f3   : > { %v3923_v36 = vadd.f32 1e-05, %v3875_v34  ;;  %v3653_v62 = vadd.f32 %v3652_v48, %v3651_v21  ;;  %v3796_v35 = vrot.slane %v3795_v11, 1  ;;  %v3660_v12 = vadd.f32 %v3659_v27, %v3658_v0 }
 0x3f4   : > { %v3924_v20 = vadd.f32 1e-05, %v3876_v9  ;;  %v3803_v6 = vrot.slane %v3802_v47, 1 }
 0x3f5   : > { %7263 = vrsqrt.f32 %v3923_v36  ;;  %v3797_v41 = vadd.f32 %v3796_v35, %v3795_v11  ;;  %v3819_v33 = vmul.f32 0.0625, %v3653_v62  ;;  %v3820_v28 = vmul.f32 0.0625, %v3660_v12 }
 0x3f6   : > { %7265 = vrsqrt.f32 %v3924_v20  ;;  %v3804_v5 = vadd.f32 %v3803_v6, %v3802_v47 }
 0x3f7   : > { %v3835_v16 = vmul.f32 0.0625, %v3797_v41  ;;  %v3851_v55 = vmul.f32 %v3819_v33, %v3819_v33  ;;  %v3907_v1 = vsub.f32 %v9037_v46, %v3819_v33  ;;  %v3915_v38 = vsub.f32 %v9043_v43, %v3819_v33 }
 0x3f8   : > { %v3836_v49 = vmul.f32 0.0625, %v3804_v5  ;;  %v3852_v18 = vmul.f32 %v3820_v28, %v3820_v28  ;;  %v3908_v63 = vsub.f32 %v9039_v39, %v3820_v28  ;;  %v3916_v44 = vsub.f32 %v9047_v23, %v3820_v28 }
 0x3f9   : > { %v3867_v24 = vsub.f32 %v3835_v16, %v3851_v55 }
 0x3fa   : > { %v3868_v32 = vsub.f32 %v3836_v49, %v3852_v18 }
 0x3fb   : > { %v3883_v8 = vmax.f32 %v3867_v24, 0.0 }
 0x3fc   : > { %v3884_v60 = vmax.f32 %v3868_v32, 0.0 }
 0x3fd   : > { %v3931_v61 = vadd.f32 1e-05, %v3883_v8 }
 0x3fe   : > { %v3932_v45 = vadd.f32 1e-05, %v3884_v60 }
 0x3ff   : > { %v7264_v17 = vpop.eup %7263  ;;  %7267 = vrsqrt.f32 %v3931_v61 }
 0x400   : > { %v7266_v37 = vpop.eup %7265  ;;  %v3955_v29 = vmul.f32 %v7264_v17, %v3891_v58  ;;  %v3963_v21 = vmul.f32 %v7264_v17, %v3899_v3  ;;  %7269 = vrsqrt.f32 %v3932_v45 }
 0x401   : > { %v3956_v46 = vmul.f32 %v7266_v37, %v3892_v22  ;;  %v3964_v43 = vmul.f32 %v7266_v37, %v3900_v57 }
 0x402   : > { %v6501_v31 = vmul.f32 -1.442695, %v3955_v29  ;;  %v6505_v0 = vmul.f32 -1.442695, %v3963_v21 }
 0x403   : > { %v6502_v54 = vmul.f32 -1.442695, %v3956_v46  ;;  %v6506_v39 = vmul.f32 -1.442695, %v3964_v43 }
 0x404   : > { %7271 = vpow2.f32 %v6501_v31  ;;  %v7015_v31 = vld [vmem:[%s7850_s17 + $0x200] ss:$8 sps:$4 sm:$0xff]  }
 0x405   : > { %7273 = vpow2.f32 %v6505_v0 }
 0x406   : > { %7275 = vpow2.f32 %v6502_v54 }
 0x407   : > { %7277 = vpow2.f32 %v6506_v39 }
 0x409   : > { %v7268_v23 = vpop.eup %7267 }
 0x40a   : > { %v7270_v19 = vpop.eup %7269  ;;  %v3971_v34 = vmul.f32 %v7268_v23, %v3907_v1  ;;  %v3979_v48 = vmul.f32 %v7268_v23, %v3915_v38 }
 0x40b   : > { %v3972_v11 = vmul.f32 %v7270_v19, %v3908_v63  ;;  %v3980_v27 = vmul.f32 %v7270_v19, %v3916_v44 }
 0x40c   : > { %v6509_v9 = vmul.f32 -1.442695, %v3971_v34  ;;  %v6513_v58 = vmul.f32 -1.442695, %v3979_v48  ;;  %v7020_v34 = vld [vmem:[%s7850_s17 + $0x214] ss:$8 sps:$4 sm:$0xff]  }
 0x40d   : > { %v6510_v3 = vmul.f32 -1.442695, %v3972_v11  ;;  %v6514_v20 = vmul.f32 -1.442695, %v3980_v27 }
 0x40e   : > { %v7272_v47 = vpop.eup %7271  ;;  %7279 = vpow2.f32 %v6509_v9 }
 0x40f   : > { %v7274_v22 = vpop.eup %7273  ;;  %v4031_v57 = vadd.f32 1.0, %v7272_v47  ;;  %7281 = vpow2.f32 %v6513_v58 }
 0x410   : > { %v7276_v36 = vpop.eup %7275  ;;  %v4035_v62 = vadd.f32 1.0, %v7274_v22  ;;  %7283 = vpow2.f32 %v6510_v3 }
 0x411   : > { %v7278_v35 = vpop.eup %7277  ;;  %7285 = vrcp.f32 %v4031_v57  ;;  %v4032_v12 = vadd.f32 1.0, %v7276_v36 }
 0x412   : > { %7287 = vrcp.f32 %v4035_v62  ;;  %v4036_v6 = vadd.f32 1.0, %v7278_v35 }
 0x413   : > { %7289 = vrcp.f32 %v4032_v12 }
 0x414   : > { %7291 = vrcp.f32 %v4036_v6  ;;  %v7023_v6 = vld [vmem:[%s7850_s17 + $0x224] ss:$8 sps:$4 sm:$0xff]  }
 0x415   : > { %7293 = vpow2.f32 %v6514_v20 }
 0x418   : > { %v7280_v41 = vpop.eup %7279 }
 0x419   : > { %v7282_v33 = vpop.eup %7281  ;;  %v4039_v28 = vadd.f32 1.0, %v7280_v41 }
 0x41a   : > { %v7284_v5 = vpop.eup %7283  ;;  %v4043_v16 = vadd.f32 1.0, %v7282_v33 }
 0x41b   : > { %v7286_v55 = vpop.eup %7285  ;;  %7295 = vrcp.f32 %v4039_v28  ;;  %v4040_v1 = vadd.f32 1.0, %v7284_v5 }
 0x41c   : > { %v7288_v38 = vpop.eup %7287  ;;  %7297 = vrcp.f32 %v4043_v16  ;;  %v4079_v49 = vmul.f32 %v7286_v55, %v8964_v10 }
 0x41d   : > { %v7290_v18 = vpop.eup %7289  ;;  %7299 = vrcp.f32 %v4040_v1  ;;  %v4083_v63 = vmul.f32 %v7288_v38, %v8966_v56 }
 0x41e   : > { %v7292_v44 = vpop.eup %7291  ;;  %v4080_v24 = vmul.f32 %v7290_v18, %v8970_v15 }
 0x41f   : > { %v7294_v32 = vpop.eup %7293  ;;  %v4084_v8 = vmul.f32 %v7292_v44, %v8968_v50  ;;  %v4288_v60 = vpack.c.bf16 %v4083_v63, %v4079_v49  ;;  %v7021_v49 = vld [vmem:[%s7850_s17 + $0x220] ss:$8 sps:$4 sm:$0xff]  }
 0x420   : > { %v4044_v61 = vadd.f32 1.0, %v7294_v32 }
 0x421   : > { %v4289_v45 = vpack.c.bf16 %v4084_v8, %v4080_v24  ;;  %v4309_v17 = vpack.i.b16 %v4288_v60, %v4288_v60  ;;  %v4360_v37 = vrot.slane %v4288_v60, 7  ;;  %v7026_v24 = vld [vmem:[%s7850_s17 + $0x234] ss:$8 sps:$4 sm:$0xff]  }
 0x422   : > { %7301 = vrcp.f32 %v4044_v61 }
 0x423   : > { %v4316_v29 = vpack.i.b16 %v4289_v45, %v4289_v45  ;;  %v4361_v10 = vrot.slane %v4289_v45, 7  ;;  %v4314_v21 = vrot.slane %v4309_v17, %v9454_v26  ;;  %v4424_v39 = vshll.u32 %v4360_v37, 16 }
 0x424   : > { %v4501_v27 = vrot.slane %v4360_v37, 1 }
 0x425   : > { %v7296_v46 = vpop.eup %7295  ;;  %v4321_v56 = vrot.slane %v4316_v29, %v9454_v26  ;;  %v4376_v15 = vsel %vm837_vm0, %v4314_v21, %v4360_v37  ;;  %v4434_v11 = vshll.u32 %v4361_v10, 16  ;;  %v4504_v57 = vrot.slane %v4361_v10, 1  ;;  %v7024_v29 = vld [vmem:[%s7850_s17 + $0x230] ss:$8 sps:$4 sm:$0xff]  }
 0x426   : > { %v7298_v43 = vpop.eup %7297  ;;  %v4420_v0 = vshll.u32 %v4376_v15, 16  ;;  %v4500_v50 = vrot.slane %v4376_v15, 1  ;;  %v4087_v54 = vmul.f32 %v7296_v46, %v8974_v52  ;;  %v4418_v58 = vshrl.u32 %v4376_v15, 16  ;;  %v7029_v46 = vld [vmem:[%s7850_s17 + $0x244] ss:$8 sps:$4 sm:$0xff]  }
 0x427   : > { %v7300_v23 = vpop.eup %7299  ;;  %v4380_v19 = vsel %vm837_vm0, %v4321_v56, %v4361_v10  ;;  %v4091_v48 = vmul.f32 %v7298_v43, %v8972_v13  ;;  %v7018_v13 = vld [vmem:[%s7850_s17 + $0x210] ss:$8 sps:$4 sm:$0xff]   ;;  %v4426_v20 = vrot.slane %v4424_v39, 1  ;;  %v4436_v16 = vrot.slane %v4434_v11, 1  ;;  %v7032_v39 = vld [vmem:[%s7850_s17 + $0x254] ss:$8 sps:$4 sm:$0xff]  }
 0x428   : > { %v4430_v9 = vshll.u32 %v4380_v19, 16  ;;  %5571 = vmatprep.mubr.bf16.mxu0 %v4380_v19  ;;  %v4422_v3 = vrot.slane %v4420_v0, 1  ;;  %v4088_v47 = vmul.f32 %v7300_v23, %v8978_v59  ;;  %v4503_v52 = vrot.slane %v4380_v19, 1  ;;  %v7027_v0 = vld [vmem:[%s7850_s17 + $0x240] ss:$8 sps:$4 sm:$0xff]  }
 0x429   : > { %5572 = vmatmul.mubr.bf16.vlgmr.msra.gmra.mrb[8].mxu0 %v4376_v15  ;;  %v4292_v22 = vpack.c.bf16 %v4091_v48, %v4087_v54  ;;  %v9079_v36 = vsel %vm903_vm2, %v4500_v50, %v4501_v27  ;;  %v4428_v62 = vshrl.u32 %v4380_v19, 16  ;;  %v7030_v27 = vld [vmem:[%s7850_s17 + $0x250] ss:$8 sps:$4 sm:$0xff]  }
 0x42a   : > { %v4432_v35 = vrot.slane %v4430_v9, 1  ;;  %5593 = vmatpush1.bf16.msra.mxu0 %v7015_v31  ;;  %v4423_v12 = vor.u32 %v4422_v3, %v4418_v58  ;;  %v9084_v59 = vsel %vm903_vm2, %v4503_v52, %v4504_v57  ;;  %v7035_v3 = vld [vmem:[%s7850_s17 + $0x264] ss:$8 sps:$4 sm:$0xff]   ;;  %v7036_v52 = vld [vmem:[%s7850_s17 + $0x270] ss:$8 sps:$4 sm:$0xff]  }
 0x42b   : > { %5594 = vmatprep.subr.bf16.mxu0 %v7020_v34  ;;  %v4337_v41 = vpack.i.b16 %v4292_v22, %v4292_v22  ;;  %v4364_v28 = vrot.slane %v4292_v22, 7  ;;  %v7033_v22 = vld [vmem:[%s7850_s17 + $0x260] ss:$8 sps:$4 sm:$0xff]   ;;  %v7041_v57 = vld [vmem:[%s7850_s17 + $0x284] ss:$8 sps:$4 sm:$0xff]  }
 0x42c   : > { %v7302_v33 = vpop.eup %7301  ;;  %v4433_v5 = vor.u32 %v4432_v35, %v4428_v62  ;;  %v9087_v55 = vsel %vm854_vm1, %v4423_v12, %v4426_v20  ;;  %v7039_v62 = vld [vmem:[%s7850_s17 + $0x280] ss:$8 sps:$4 sm:$0xff]   ;;  %v7044_v35 = vld [vmem:[%s7850_s17 + $0x294] ss:$8 sps:$4 sm:$0xff]   ;;  %v7047_v12 = vld [vmem:[%s7850_s17 + $0x2a4] ss:$8 sps:$4 sm:$0xff]  }
 0x42d   : > { %v4092_v1 = vmul.f32 %v7302_v33, %v8976_v53  ;;  %v4342_v38 = vrot.slane %v4337_v41, %v9454_v26  ;;  %v4464_v8 = vshll.u32 %v4364_v28, 16  ;;  %v4513_v61 = vrot.slane %v4364_v28, 1  ;;  %v7045_v20 = vld [vmem:[%s7850_s17 + $0x2a0] ss:$8 sps:$4 sm:$0xff]   ;;  %v7048_v41 = vld [vmem:[%s7850_s17 + $0x2b0] ss:$8 sps:$4 sm:$0xff]  }
 0x42e   : > { %5595 = vmatpush1.bf16.msra.mxu0 %v7018_v13  ;;  %v9093_v18 = vsel %vm854_vm1, %v4433_v5, %v4436_v16  ;;  %v7042_v13 = vld [vmem:[%s7850_s17 + $0x290] ss:$8 sps:$4 sm:$0xff]   ;;  %v7053_v33 = vld [vmem:[%s7850_s17 + $0x2c4] ss:$8 sps:$4 sm:$0xff]   ;;  %v7056_v5 = vld [vmem:[%s7850_s17 + $0x2d4] ss:$8 sps:$4 sm:$0xff]  }
 0x42f   : > { %v4293_v63 = vpack.c.bf16 %v4092_v1, %v4088_v47  ;;  %5596 = vmatprep.subr.bf16.mxu0 %v7023_v6  ;;  %v4392_v44 = vsel %vm837_vm0, %v4342_v38, %v4364_v28  ;;  %v4466_v15 = vrot.slane %v4464_v8, 1  ;;  %v7050_v6 = vld [vmem:[%s7850_s17 + $0x2b4] ss:$8 sps:$4 sm:$0xff]   ;;  %v7051_v28 = vld [vmem:[%s7850_s17 + $0x2c0] ss:$8 sps:$4 sm:$0xff]  }
 0x430   : > { %v4460_v32 = vshll.u32 %v4392_v44, 16  ;;  %v4512_v60 = vrot.slane %v4392_v44, 1  ;;  %v4458_v17 = vshrl.u32 %v4392_v44, 16  ;;  %v7054_v16 = vld [vmem:[%s7850_s17 + $0x2d0] ss:$8 sps:$4 sm:$0xff]  }
 0x431   : > { %v4344_v45 = vpack.i.b16 %v4293_v63, %v4293_v63  ;;  %v4365_v53 = vrot.slane %v4293_v63, 7  ;;  %v7059_v1 = vld [vmem:[%s7850_s17 + $0x2e4] ss:$8 sps:$4 sm:$0xff]   ;;  %v7057_v38 = vld [vmem:[%s7850_s17 + $0x2e0] ss:$8 sps:$4 sm:$0xff]  }
 0x432   : > { %v4462_v37 = vrot.slane %v4460_v32, 1  ;;  %5597 = vmatpush1.bf16.msra.mxu0 %v7021_v49  ;;  %v9099_v10 = vsel %vm903_vm2, %v4512_v60, %v4513_v61  ;;  %v7062_v49 = vld [vmem:[%s7850_s17 + $0x2f4] ss:$8 sps:$4 sm:$0xff]   ;;  %v7060_v63 = vld [vmem:[%s7850_s17 + $0x2f0] ss:$8 sps:$4 sm:$0xff]  }
 0x433   : > { %v4349_v21 = vrot.slane %v4344_v45, %v9454_v26  ;;  %5598 = vmatprep.subr.bf16.mxu0 %v7026_v24  ;;  %v4474_v50 = vshll.u32 %v4365_v53, 16  ;;  %v4516_v19 = vrot.slane %v4365_v53, 1  ;;  %v7063_v24 = vld [vmem:[%s7850_s17 + $0x300] ss:$8 sps:$4 sm:$0xff]   ;;  %v7068_v32 = vld [vmem:[%s7850_s17 + $0x314] ss:$8 sps:$4 sm:$0xff]  }
 0x434   : > { %v4463_v56 = vor.u32 %v4462_v37, %v4458_v17  ;;  %v7066_v8 = vld [vmem:[%s7850_s17 + $0x310] ss:$8 sps:$4 sm:$0xff]   ;;  %v7071_v60 = vld [vmem:[%s7850_s17 + $0x324] ss:$8 sps:$4 sm:$0xff]   ;;  %v7069_v61 = vld [vmem:[%s7850_s17 + $0x320] ss:$8 sps:$4 sm:$0xff]  }
 0x435   : > { %v4396_v43 = vsel %vm837_vm0, %v4349_v21, %v4365_v53  ;;  %v4476_v58 = vrot.slane %v4474_v50, 1  ;;  %v7074_v45 = vld [vmem:[%s7850_s17 + $0x334] ss:$8 sps:$4 sm:$0xff]   ;;  %v7075_v53 = vld [vmem:[%s7850_s17 + $0x340] ss:$8 sps:$4 sm:$0xff]  }
 0x436   : > { %v4470_v31 = vshll.u32 %v4396_v43, 16  ;;  %5581 = vmatprep.mubr.bf16.mxu0 %v4396_v43  ;;  %5599 = vmatpush1.bf16.msra.mxu0 %v7024_v29  ;;  %v9106_v54 = vsel %vm854_vm1, %v4463_v56, %v4466_v15  ;;  %v4515_v23 = vrot.slane %v4396_v43, 1  ;;  %v4468_v34 = vshrl.u32 %v4396_v43, 16  ;;  %v7080_v17 = vld [vmem:[%s7850_s17 + $0x354] ss:$8 sps:$4 sm:$0xff]  }
 0x437   : > { %5582 = vmatmul.mubr.bf16.gmra.mrb[12].mxu0 %v4392_v44  ;;  %5600 = vmatprep.subr.bf16.mxu0 %v7029_v46  ;;  %v7065_v44 = vld [vmem:[%s7850_s17 + $0x304] ss:$8 sps:$4 sm:$0xff]   ;;  %v7078_v37 = vld [vmem:[%s7850_s17 + $0x350] ss:$8 sps:$4 sm:$0xff]   ;;  %v7081_v29 = vld [vmem:[%s7850_s17 + $0x360] ss:$8 sps:$4 sm:$0xff]  }
 0x438   : > { %v4472_v48 = vrot.slane %v4470_v31, 1  ;;  %5624 = vmatprep.mubr.bf16.mxu0 %v8844_v7  ;;  %v9111_v11 = vsel %vm903_vm2, %v4515_v23, %v4516_v19  ;;  %v7038_v7 = vld [vmem:[%s7850_s17 + $0x274] ss:$8 sps:$4 sm:$0xff]   ;;  %v7084_v21 = vld [vmem:[%s7850_s17 + $0x370] ss:$8 sps:$4 sm:$0xff]  }
 0x439   : > { %v7089_v46 = vld [vmem:[%s7850_s17 + $0x384] ss:$8 sps:$4 sm:$0xff]   ;;  %v7087_v56 = vld [vmem:[%s7850_s17 + $0x380] ss:$8 sps:$4 sm:$0xff]   ;;  %v7092_v15 = vld [vmem:[%s7850_s17 + $0x394] ss:$8 sps:$4 sm:$0xff]  }
 0x43a   : > { %5601 = vmatpush1.bf16.msra.mxu0 %v7027_v0  ;;  %v4473_v9 = vor.u32 %v4472_v48, %v4468_v34  ;;  %v7090_v43 = vld [vmem:[%s7850_s17 + $0x390] ss:$8 sps:$4 sm:$0xff]   ;;  %v7095_v31 = vld [vmem:[%s7850_s17 + $0x3a4] ss:$8 sps:$4 sm:$0xff]   ;;  %v7093_v0 = vld [vmem:[%s7850_s17 + $0x3a0] ss:$8 sps:$4 sm:$0xff]  }
 0x43b   : > { %5602 = vmatprep.subr.bf16.mxu0 %v7032_v39  ;;  %v7098_v50 = vld [vmem:[%s7850_s17 + $0x3b4] ss:$8 sps:$4 sm:$0xff]   ;;  %v7096_v39 = vld [vmem:[%s7850_s17 + $0x3b0] ss:$8 sps:$4 sm:$0xff]   ;;  %v7101_v23 = vld [vmem:[%s7850_s17 + $0x3c4] ss:$8 sps:$4 sm:$0xff]  }
 0x43c   : > { %v9116_v47 = vsel %vm854_vm1, %v4473_v9, %v4476_v58  ;;  %v7099_v19 = vld [vmem:[%s7850_s17 + $0x3c0] ss:$8 sps:$4 sm:$0xff]   ;;  %v7104_v34 = vld [vmem:[%s7850_s17 + $0x3d4] ss:$8 sps:$4 sm:$0xff]   ;;  %v7102_v48 = vld [vmem:[%s7850_s17 + $0x3d0] ss:$8 sps:$4 sm:$0xff]  }
 0x43d   : > { %v7105_v9 = vld [vmem:[%s7850_s17 + $0x3e0] ss:$8 sps:$4 sm:$0xff]   ;;  %v7110_v58 = vld [vmem:[%s7850_s17 + $0x3f4] ss:$8 sps:$4 sm:$0xff]  }
 0x43e   : > { %5603 = vmatpush1.bf16.msra.mxu0 %v7030_v27  ;;  %v7107_v27 = vld [vmem:[%s7850_s17 + $0x3e4] ss:$8 sps:$4 sm:$0xff]  }
 0x43f   : > { %5604 = vmatprep.subr.bf16.mxu0 %v7035_v3  ;;  %v7108_v3 = vld [vmem:[%s7850_s17 + $0x3f0] ss:$8 sps:$4 sm:$0xff]  }
 0x442   : > { %5605 = vmatpush1.bf16.msra.mxu0 %v7033_v22  ;;  %v7113_v22 = vld [vmem:[%s7850_s17 + $0x404] ss:$8 sps:$4 sm:$0xff]  }
 0x443   : > { %5606 = vmatprep.subr.bf16.mxu0 %v7038_v7  ;;  %v7111_v7 = vld [vmem:[%s7850_s17 + $0x400] ss:$8 sps:$4 sm:$0xff]  }
 0x446   : > { %5607 = vmatpush1.bf16.msra.mxu0 %v7036_v52  ;;  %v7116_v52 = vld [vmem:[%s7850_s17 + $0x414] ss:$8 sps:$4 sm:$0xff]  }
 0x447   : > { %5608 = vmatprep.subr.bf16.mxu0 %v7041_v57  ;;  %v7114_v57 = vld [vmem:[%s7850_s17 + $0x410] ss:$8 sps:$4 sm:$0xff]  }
 0x44a   : > { %5609 = vmatpush1.bf16.msra.mxu0 %v7039_v62  ;;  %v7119_v62 = vld [vmem:[%s7850_s17 + $0x424] ss:$8 sps:$4 sm:$0xff]  }
 0x44b   : > { %5610 = vmatprep.subr.bf16.mxu0 %v7044_v35  ;;  %v7117_v35 = vld [vmem:[%s7850_s17 + $0x420] ss:$8 sps:$4 sm:$0xff]  }
 0x44e   : > { %5611 = vmatpush1.bf16.msra.mxu0 %v7042_v13  ;;  %v7122_v13 = vld [vmem:[%s7850_s17 + $0x434] ss:$8 sps:$4 sm:$0xff]  }
 0x44f   : > { %5612 = vmatprep.subr.bf16.mxu0 %v7047_v12  ;;  %v7123_v12 = vld [vmem:[%s7850_s17 + $0x440] ss:$8 sps:$4 sm:$0xff]  }
 0x452   : > { %5613 = vmatpush1.bf16.msra.mxu0 %v7045_v20  ;;  %v7128_v20 = vld [vmem:[%s7850_s17 + $0x454] ss:$8 sps:$4 sm:$0xff]  }
 0x453   : > { %5614 = vmatprep.subr.bf16.mxu0 %v7050_v6  ;;  %v7126_v6 = vld [vmem:[%s7850_s17 + $0x450] ss:$8 sps:$4 sm:$0xff]  }
 0x456   : > { %5615 = vmatpush1.bf16.msra.mxu0 %v7048_v41  ;;  %v7129_v41 = vld [vmem:[%s7850_s17 + $0x460] ss:$8 sps:$4 sm:$0xff]  }
 0x457   : > { %5616 = vmatprep.subr.bf16.mxu0 %v7053_v33  ;;  %v7132_v33 = vld [vmem:[%s7850_s17 + $0x470] ss:$8 sps:$4 sm:$0xff]  }
 0x45a   : > { %5617 = vmatpush1.bf16.msra.mxu0 %v7051_v28  ;;  %v7137_v28 = vld [vmem:[%s7850_s17 + $0x484] ss:$8 sps:$4 sm:$0xff]  }
 0x45b   : > { %5618 = vmatprep.subr.bf16.mxu0 %v7056_v5  ;;  %v7135_v5 = vld [vmem:[%s7850_s17 + $0x480] ss:$8 sps:$4 sm:$0xff]  }
 0x45e   : > { %5619 = vmatpush1.bf16.msra.mxu0 %v7054_v16  ;;  %v7140_v16 = vld [vmem:[%s7850_s17 + $0x494] ss:$8 sps:$4 sm:$0xff]  }
 0x45f   : > { %5620 = vmatprep.subr.bf16.mxu0 %v7059_v1  ;;  %v7138_v1 = vld [vmem:[%s7850_s17 + $0x490] ss:$8 sps:$4 sm:$0xff]  }
 0x462   : > { %5621 = vmatpush1.bf16.msra.mxu0 %v7057_v38  ;;  %v7143_v38 = vld [vmem:[%s7850_s17 + $0x4a4] ss:$8 sps:$4 sm:$0xff]  }
 0x463   : > { %5622 = vmatprep.subr.bf16.mxu0 %v7062_v49  ;;  %v7141_v49 = vld [vmem:[%s7850_s17 + $0x4a0] ss:$8 sps:$4 sm:$0xff]  }
 0x466   : > { %5623 = vmatpush1.bf16.msra.mxu0 %v7060_v63  ;;  %v7146_v63 = vld [vmem:[%s7850_s17 + $0x4b4] ss:$8 sps:$4 sm:$0xff]  }
 0x467   : > { %5645 = vmatprep.subr.bf16.mxu0 %v7065_v44  ;;  %v7144_v44 = vld [vmem:[%s7850_s17 + $0x4b0] ss:$8 sps:$4 sm:$0xff]  }
 0x469   : > { %5625 = vmatmul.mubr.bf16.vlgmr.msra.gmra.mrb[8].mxu0 %v8836_v25  ;;  %v7072_v25 = vld [vmem:[%s7850_s17 + $0x330] ss:$8 sps:$4 sm:$0xff]  }
 0x46a   : > { %5634 = vmatprep.mubr.bf16.mxu0 %v8886_v14  ;;  %5646 = vmatpush1.bf16.msra.mxu0 %v7063_v24  ;;  %v7077_v14 = vld [vmem:[%s7850_s17 + $0x344] ss:$8 sps:$4 sm:$0xff]  }
 0x46b   : > { %5647 = vmatprep.subr.bf16.mxu0 %v7068_v32  ;;  %v7149_v24 = vld [vmem:[%s7850_s17 + $0x4c4] ss:$8 sps:$4 sm:$0xff]   ;;  %v7147_v32 = vld [vmem:[%s7850_s17 + $0x4c0] ss:$8 sps:$4 sm:$0xff]  }
 0x46e   : > { %5648 = vmatpush1.bf16.msra.mxu0 %v7066_v8  ;;  %v7152_v8 = vld [vmem:[%s7850_s17 + $0x4d4] ss:$8 sps:$4 sm:$0xff]  }
 0x46f   : > { %5649 = vmatprep.subr.bf16.mxu0 %v7071_v60  ;;  %v7150_v60 = vld [vmem:[%s7850_s17 + $0x4d0] ss:$8 sps:$4 sm:$0xff]  }
 0x471   : > { %5635 = vmatmul.mubr.bf16.gmra.mrb[12].mxu0 %v8870_v51  ;;  %v7083_v51 = vld [vmem:[%s7850_s17 + $0x364] ss:$8 sps:$4 sm:$0xff]  }
 0x472   : > { %5650 = vmatpush1.bf16.msra.mxu0 %v7069_v61  ;;  %5677 = vmatprep.mubr.bf16.mxu0 %v9093_v18  ;;  %v7086_v18 = vld [vmem:[%s7850_s17 + $0x374] ss:$8 sps:$4 sm:$0xff]   ;;  %v7155_v61 = vld [vmem:[%s7850_s17 + $0x4e4] ss:$8 sps:$4 sm:$0xff]  }
 0x473   : > { %5651 = vmatprep.subr.bf16.mxu0 %v7074_v45  ;;  %v7153_v45 = vld [vmem:[%s7850_s17 + $0x4e0] ss:$8 sps:$4 sm:$0xff]  }
 0x476   : > { %5652 = vmatpush1.bf16.msra.mxu0 %v7072_v25  ;;  %v7158_v25 = vld [vmem:[%s7850_s17 + $0x4f4] ss:$8 sps:$4 sm:$0xff]  }
 0x477   : > { %5653 = vmatprep.subr.bf16.mxu0 %v7077_v14  ;;  %v7156_v14 = vld [vmem:[%s7850_s17 + $0x4f0] ss:$8 sps:$4 sm:$0xff]  }
 0x47a   : > { %5654 = vmatpush1.bf16.msra.mxu0 %v7075_v53  ;;  %v7161_v53 = vld [vmem:[%s7850_s17 + $0x504] ss:$8 sps:$4 sm:$0xff]  }
 0x47b   : > { %5655 = vmatprep.subr.bf16.mxu0 %v7080_v17  ;;  %v7159_v17 = vld [vmem:[%s7850_s17 + $0x500] ss:$8 sps:$4 sm:$0xff]  }
 0x47e   : > { %5656 = vmatpush1.bf16.msra.mxu0 %v7078_v37  ;;  %v7164_v37 = vld [vmem:[%s7850_s17 + $0x514] ss:$8 sps:$4 sm:$0xff]  }
 0x47f   : > { %5657 = vmatprep.subr.bf16.mxu0 %v7083_v51  ;;  %v7162_v51 = vld [vmem:[%s7850_s17 + $0x510] ss:$8 sps:$4 sm:$0xff]  }
 0x482   : > { %5658 = vmatpush1.bf16.msra.mxu0 %v7081_v29  ;;  %v7167_v29 = vld [vmem:[%s7850_s17 + $0x524] ss:$8 sps:$4 sm:$0xff]  }
 0x483   : > { %5659 = vmatprep.subr.bf16.mxu0 %v7086_v18  ;;  %v7165_v18 = vld [vmem:[%s7850_s17 + $0x520] ss:$8 sps:$4 sm:$0xff]  }
 0x486   : > { %5660 = vmatpush1.bf16.msra.mxu0 %v7084_v21  ;;  %v7170_v21 = vld [vmem:[%s7850_s17 + $0x534] ss:$8 sps:$4 sm:$0xff]  }
 0x487   : > { %5661 = vmatprep.subr.bf16.mxu0 %v7089_v46  ;;  %v7171_v46 = vld [vmem:[%s7850_s17 + $0x540] ss:$8 sps:$4 sm:$0xff]  }
 0x48a   : > { %5662 = vmatpush1.bf16.msra.mxu0 %v7087_v56  ;;  %v7176_v56 = vld [vmem:[%s7850_s17 + $0x554] ss:$8 sps:$4 sm:$0xff]  }
 0x48b   : > { %5663 = vmatprep.subr.bf16.mxu0 %v7092_v15  ;;  %v7174_v15 = vld [vmem:[%s7850_s17 + $0x550] ss:$8 sps:$4 sm:$0xff]  }
 0x48e   : > { %5664 = vmatpush1.bf16.msra.mxu0 %v7090_v43  ;;  %v7177_v43 = vld [vmem:[%s7850_s17 + $0x560] ss:$8 sps:$4 sm:$0xff]  }
 0x48f   : > { %5665 = vmatprep.subr.bf16.mxu0 %v7095_v31  ;;  %v7180_v31 = vld [vmem:[%s7850_s17 + $0x570] ss:$8 sps:$4 sm:$0xff]  }
 0x492   : > { %5666 = vmatpush1.bf16.msra.mxu0 %v7093_v0  ;;  %v7185_v0 = vld [vmem:[%s7850_s17 + $0x584] ss:$8 sps:$4 sm:$0xff]  }
 0x493   : > { %5667 = vmatprep.subr.bf16.mxu0 %v7098_v50  ;;  %v7183_v50 = vld [vmem:[%s7850_s17 + $0x580] ss:$8 sps:$4 sm:$0xff]  }
 0x496   : > { %5668 = vmatpush1.bf16.msra.mxu0 %v7096_v39  ;;  %v7188_v39 = vld [vmem:[%s7850_s17 + $0x594] ss:$8 sps:$4 sm:$0xff]  }
 0x497   : > { %5669 = vmatprep.subr.bf16.mxu0 %v7101_v23  ;;  %v7186_v23 = vld [vmem:[%s7850_s17 + $0x590] ss:$8 sps:$4 sm:$0xff]  }
 0x49a   : > { %5670 = vmatpush1.bf16.msra.mxu0 %v7099_v19  ;;  %v7191_v19 = vld [vmem:[%s7850_s17 + $0x5a4] ss:$8 sps:$4 sm:$0xff]  }
 0x49b   : > { %5671 = vmatprep.subr.bf16.mxu0 %v7104_v34  ;;  %v7189_v34 = vld [vmem:[%s7850_s17 + $0x5a0] ss:$8 sps:$4 sm:$0xff]  }
 0x49e   : > { %5672 = vmatpush1.bf16.msra.mxu0 %v7102_v48  ;;  %v7194_v48 = vld [vmem:[%s7850_s17 + $0x5b4] ss:$8 sps:$4 sm:$0xff]  }
 0x49f   : > { %5673 = vmatprep.subr.bf16.mxu0 %v7107_v27  ;;  %v7192_v27 = vld [vmem:[%s7850_s17 + $0x5b0] ss:$8 sps:$4 sm:$0xff]  }
 0x4a2   : > { %5674 = vmatpush1.bf16.msra.mxu0 %v7105_v9  ;;  %v7197_v9 = vld [vmem:[%s7850_s17 + $0x5c4] ss:$8 sps:$4 sm:$0xff]  }
 0x4a3   : > { %5675 = vmatprep.subr.bf16.mxu0 %v7110_v58  ;;  %v7195_v58 = vld [vmem:[%s7850_s17 + $0x5c0] ss:$8 sps:$4 sm:$0xff]  }
 0x4a6   : > { %5676 = vmatpush1.bf16.msra.mxu0 %v7108_v3  ;;  %v7200_v3 = vld [vmem:[%s7850_s17 + $0x5d4] ss:$8 sps:$4 sm:$0xff]  }
 0x4a7   : > { %5698 = vmatprep.subr.bf16.mxu0 %v7113_v22  ;;  %v7198_v22 = vld [vmem:[%s7850_s17 + $0x5d0] ss:$8 sps:$4 sm:$0xff]  }
 0x4a9   : > { %5678 = vmatmul.mubr.bf16.vlgmr.msra.gmra.mrb[8].mxu0 %v9087_v55  ;;  %v7120_v55 = vld [vmem:[%s7850_s17 + $0x430] ss:$8 sps:$4 sm:$0xff]  }
 0x4aa   : > { %5687 = vmatprep.mubr.bf16.mxu0 %v9116_v47  ;;  %5699 = vmatpush1.bf16.msra.mxu0 %v7111_v7  ;;  %v7125_v47 = vld [vmem:[%s7850_s17 + $0x444] ss:$8 sps:$4 sm:$0xff]  }
 0x4ab   : > { %5700 = vmatprep.subr.bf16.mxu0 %v7116_v52  ;;  %v7203_v7 = vld [vmem:[%s7850_s17 + $0x5e4] ss:$8 sps:$4 sm:$0xff]   ;;  %v7201_v52 = vld [vmem:[%s7850_s17 + $0x5e0] ss:$8 sps:$4 sm:$0xff]  }
 0x4ae   : > { %5701 = vmatpush1.bf16.msra.mxu0 %v7114_v57  ;;  %v7206_v57 = vld [vmem:[%s7850_s17 + $0x5f4] ss:$8 sps:$4 sm:$0xff]  }
 0x4af   : > { %5702 = vmatprep.subr.bf16.mxu0 %v7119_v62  ;;  %v7204_v62 = vld [vmem:[%s7850_s17 + $0x5f0] ss:$8 sps:$4 sm:$0xff]  }
 0x4b1   : > { %5688 = vmatmul.mubr.bf16.gmra.mrb[12].mxu0 %v9106_v54  ;;  %v7131_v54 = vld [vmem:[%s7850_s17 + $0x464] ss:$8 sps:$4 sm:$0xff]  }
 0x4b2   : > { %5703 = vmatpush1.bf16.msra.mxu0 %v7117_v35  ;;  %5730 = vmatprep.mubr.bf16.mxu0 %v8839_v42  ;;  %v7134_v42 = vld [vmem:[%s7850_s17 + $0x474] ss:$8 sps:$4 sm:$0xff]   ;;  %v4285_v35 = vld [vmem:[%s7856_s13] sm:$0x3] }
 0x4b3   : > { %5704 = vmatprep.subr.bf16.mxu0 %v7122_v13  ;;  %v5808_v13 = vrot.slane %v4285_v35, %v9454_v26 }
 0x4b6   : > { %5705 = vmatpush1.bf16.msra.mxu0 %v7120_v55  ;;  %v9463_v55 = vsub.s32 1, %v9462_v30 }
 0x4b7   : > { %5706 = vmatprep.subr.bf16.mxu0 %v7125_v47 }
 0x4b8   : > { %v5812_v47 = vrot.slane %v4285_v35, %v9463_v55 }
 0x4ba   : > { %5707 = vmatpush1.bf16.msra.mxu0 %v7123_v12 }
 0x4bb   : > { %5708 = vmatprep.subr.bf16.mxu0 %v7128_v20 }
 0x4be   : > { %5709 = vmatpush1.bf16.msra.mxu0 %v7126_v6 }
 0x4bf   : > { %5710 = vmatprep.subr.bf16.mxu0 %v7131_v54 }
 0x4c2   : > { %5711 = vmatpush1.bf16.msra.mxu0 %v7129_v41 }
 0x4c3   : > { %5712 = vmatprep.subr.bf16.mxu0 %v7134_v42 }
 0x4c6   : > { %5713 = vmatpush1.bf16.msra.mxu0 %v7132_v33 }
 0x4c7   : > { %5714 = vmatprep.subr.bf16.mxu0 %v7137_v28 }
 0x4ca   : > { %5715 = vmatpush1.bf16.msra.mxu0 %v7135_v5 }
 0x4cb   : > { %5716 = vmatprep.subr.bf16.mxu0 %v7140_v16 }
 0x4ce   : > { %5717 = vmatpush1.bf16.msra.mxu0 %v7138_v1 }
 0x4cf   : > { %5718 = vmatprep.subr.bf16.mxu0 %v7143_v38 }
 0x4d2   : > { %5719 = vmatpush1.bf16.msra.mxu0 %v7141_v49 }
 0x4d3   : > { %5720 = vmatprep.subr.bf16.mxu0 %v7146_v63 }
 0x4d6   : > { %5721 = vmatpush1.bf16.msra.mxu0 %v7144_v44 }
 0x4d7   : > { %5722 = vmatprep.subr.bf16.mxu0 %v7149_v24 }
 0x4da   : > { %5723 = vmatpush1.bf16.msra.mxu0 %v7147_v32 }
 0x4db   : > { %5724 = vmatprep.subr.bf16.mxu0 %v7152_v8 }
 0x4de   : > { %5725 = vmatpush1.bf16.msra.mxu0 %v7150_v60 }
 0x4df   : > { %5726 = vmatprep.subr.bf16.mxu0 %v7155_v61 }
 0x4e2   : > { %5727 = vmatpush1.bf16.msra.mxu0 %v7153_v45 }
 0x4e3   : > { %5728 = vmatprep.subr.bf16.mxu0 %v7158_v25 }
 0x4e6   : > { %5729 = vmatpush1.bf16.msra.mxu0 %v7156_v14 }
 0x4e7   : > { %5751 = vmatprep.subr.bf16.mxu0 %v7161_v53 }
 0x4e9   : > { %5731 = vmatmul.mubr.bf16.vlgmr.msra.gmra.mrb[8].mxu0 %v8824_v2  ;;  %v7168_v2 = vld [vmem:[%s7850_s17 + $0x530] ss:$8 sps:$4 sm:$0xff]  }
 0x4ea   : > { %5740 = vmatprep.mubr.bf16.mxu0 %v8881_v4  ;;  %5752 = vmatpush1.bf16.msra.mxu0 %v7159_v17  ;;  %v7173_v4 = vld [vmem:[%s7850_s17 + $0x544] ss:$8 sps:$4 sm:$0xff]  }
 0x4eb   : > { %5753 = vmatprep.subr.bf16.mxu0 %v7164_v37 }
 0x4ee   : > { %5754 = vmatpush1.bf16.msra.mxu0 %v7162_v51 }
 0x4ef   : > { %5755 = vmatprep.subr.bf16.mxu0 %v7167_v29 }
 0x4f1   : > { %5741 = vmatmul.mubr.bf16.gmra.mrb[12].mxu0 %v8861_v40  ;;  %v7179_v40 = vld [vmem:[%s7850_s17 + $0x564] ss:$8 sps:$4 sm:$0xff]  }
 0x4f2   : > { %5756 = vmatpush1.bf16.msra.mxu0 %v7165_v18  ;;  %5783 = vmatprep.mubr.bf16.mxu0 %v9084_v59  ;;  %v7182_v59 = vld [vmem:[%s7850_s17 + $0x574] ss:$8 sps:$4 sm:$0xff]  }
 0x4f3   : > { %5757 = vmatprep.subr.bf16.mxu0 %v7170_v21 }
 0x4f6   : > { %5758 = vmatpush1.bf16.msra.mxu0 %v7168_v2 }
 0x4f7   : > { %5759 = vmatprep.subr.bf16.mxu0 %v7173_v4 }
 0x4fa   : > { %5760 = vmatpush1.bf16.msra.mxu0 %v7171_v46 }
 0x4fb   : > { %5761 = vmatprep.subr.bf16.mxu0 %v7176_v56 }
 0x4fe   : > { %5762 = vmatpush1.bf16.msra.mxu0 %v7174_v15 }
 0x4ff   : > { %5763 = vmatprep.subr.bf16.mxu0 %v7179_v40 }
 0x502   : > { %5764 = vmatpush1.bf16.msra.mxu0 %v7177_v43 }
 0x503   : > { %5765 = vmatprep.subr.bf16.mxu0 %v7182_v59 }
 0x506   : > { %5766 = vmatpush1.bf16.msra.mxu0 %v7180_v31 }
 0x507   : > { %5767 = vmatprep.subr.bf16.mxu0 %v7185_v0 }
 0x50a   : > { %5768 = vmatpush1.bf16.msra.mxu0 %v7183_v50 }
 0x50b   : > { %5769 = vmatprep.subr.bf16.mxu0 %v7188_v39 }
 0x50e   : > { %5770 = vmatpush1.bf16.msra.mxu0 %v7186_v23 }
 0x50f   : > { %5771 = vmatprep.subr.bf16.mxu0 %v7191_v19 }
 0x512   : > { %5772 = vmatpush1.bf16.msra.mxu0 %v7189_v34 }
 0x513   : > { %5773 = vmatprep.subr.bf16.mxu0 %v7194_v48 }
 0x516   : > { %5774 = vmatpush1.bf16.msra.mxu0 %v7192_v27 }
 0x517   : > { %5775 = vmatprep.subr.bf16.mxu0 %v7197_v9 }
 0x51a   : > { %5776 = vmatpush1.bf16.msra.mxu0 %v7195_v58 }
 0x51b   : > { %5777 = vmatprep.subr.bf16.mxu0 %v7200_v3 }
 0x51e   : > { %5778 = vmatpush1.bf16.msra.mxu0 %v7198_v22 }
 0x51f   : > { %5779 = vmatprep.subr.bf16.mxu0 %v7203_v7 }
 0x522   : > { %5780 = vmatpush1.bf16.msra.mxu0 %v7201_v52 }
 0x523   : > { %5781 = vmatprep.subr.bf16.mxu0 %v7206_v57 }
 0x526   : > { %5782 = vmatpush1.bf16.msra.mxu0 %v7204_v62 }
 0x529   : > { %5784 = vmatmul.mubr.bf16.vlgmr.msra.gmra.mrb[8].mxu0 %v9079_v36 }
 0x52a   : > { %5793 = vmatprep.mubr.bf16.mxu0 %v9111_v11 }
 0x531   : > { %5794 = vmatmul.mubr.bf16.gmra.mrb[12].mxu0 %v9099_v10 }
 0x5fc   : > { %v5785_v12 = vpop.f32.mrb[8].mxu0 }
 0x5fd   : > { %v9252_v20 = vadd.f32 %v5808_v13, %v5785_v12  ;;  %v5787_v6 = vpop.f32.mrb[9].mxu0 }
 0x5fe   : > { %v9254_v54 = vadd.f32 %v5812_v47, %v5787_v6  ;;  %v5789_v41 = vpop.f32.mrb[10].mxu0 }
 0x5ff   : > { %v9256_v42 = vadd.f32 %v5808_v13, %v5789_v41  ;;  %v5791_v36 = vpop.f32.mrb[11].mxu0  ;;  %v5851_v10 = vmul.f32 %v9252_v20, %v9252_v20 }
 0x600   : > { %v9258_v33 = vadd.f32 %v5812_v47, %v5791_v36  ;;  %v5852_v11 = vmul.f32 %v9254_v54, %v9254_v54 }
 0x601   : > { %v5823_v26 = vadd.f32 %v9256_v42, %v9252_v20  ;;  %v5853_v30 = vmul.f32 %v9256_v42, %v9256_v42 }
 0x602   : > { %v5830_v28 = vadd.f32 %v9258_v33, %v9254_v54  ;;  %v5854_v5 = vmul.f32 %v9258_v33, %v9258_v33 }
 0x603   : > { %v5824_v16 = vrot.slane %v5823_v26, 4  ;;  %v5859_v1 = vadd.f32 %v5853_v30, %v5851_v10 }
 0x604   : > { %v5831_v38 = vrot.slane %v5830_v28, 4  ;;  %v5866_v49 = vadd.f32 %v5854_v5, %v5852_v11  ;;  %v5795_v63 = vpop.f32.mrb[12].mxu0 }
 0x605   : > { %v5825_v44 = vadd.f32 %v5824_v16, %v5823_v26  ;;  %v5860_v24 = vrot.slane %v5859_v1, 4  ;;  %v9272_v32 = vadd.f32 %v5808_v13, %v5795_v63  ;;  %v5797_v8 = vpop.f32.mrb[13].mxu0 }
 0x606   : > { %v5832_v60 = vadd.f32 %v5831_v38, %v5830_v28  ;;  %v5867_v61 = vrot.slane %v5866_v49, 4  ;;  %v9274_v45 = vadd.f32 %v5812_v47, %v5797_v8  ;;  %v5799_v25 = vpop.f32.mrb[14].mxu0 }
 0x607   : > { %v5826_v14 = vrot.slane %v5825_v44, 2  ;;  %v5861_v53 = vadd.f32 %v5860_v24, %v5859_v1  ;;  %v5855_v17 = vmul.f32 %v9272_v32, %v9272_v32  ;;  %v9278_v37 = vadd.f32 %v5808_v13, %v5799_v25  ;;  %v5801_v51 = vpop.f32.mrb[15].mxu0 }
 0x608   : > { %v5833_v29 = vrot.slane %v5832_v60, 2  ;;  %v5868_v18 = vadd.f32 %v5867_v61, %v5866_v49  ;;  %v5856_v21 = vmul.f32 %v9274_v45, %v9274_v45  ;;  %v9282_v2 = vadd.f32 %v5812_v47, %v5801_v51 }
 0x609   : > { %v5827_v4 = vadd.f32 %v5826_v14, %v5825_v44  ;;  %v5862_v46 = vrot.slane %v5861_v53, 2  ;;  %v5837_v56 = vadd.f32 %v9278_v37, %v9272_v32  ;;  %v5857_v15 = vmul.f32 %v9278_v37, %v9278_v37 }
 0x60a   : > { %v5834_v40 = vadd.f32 %v5833_v29, %v5832_v60  ;;  %v5869_v43 = vrot.slane %v5868_v18, 2  ;;  %v5844_v59 = vadd.f32 %v9282_v2, %v9274_v45  ;;  %v5858_v31 = vmul.f32 %v9282_v2, %v9282_v2 }
 0x60b   : > { %v5828_v0 = vrot.slane %v5827_v4, 1  ;;  %v5863_v50 = vadd.f32 %v5862_v46, %v5861_v53  ;;  %v5838_v39 = vrot.slane %v5837_v56, 4  ;;  %v5873_v23 = vadd.f32 %v5857_v15, %v5855_v17 }
 0x60c   : > { %v5835_v19 = vrot.slane %v5834_v40, 1  ;;  %v5870_v34 = vadd.f32 %v5869_v43, %v5868_v18  ;;  %v5845_v48 = vrot.slane %v5844_v59, 4  ;;  %v5880_v27 = vadd.f32 %v5858_v31, %v5856_v21 }
 0x60d   : > { %v5829_v9 = vadd.f32 %v5828_v0, %v5827_v4  ;;  %v5864_v58 = vrot.slane %v5863_v50, 1  ;;  %v5839_v3 = vadd.f32 %v5838_v39, %v5837_v56  ;;  %v5874_v22 = vrot.slane %v5873_v23, 4 }
 0x60e   : > { %v5836_v7 = vadd.f32 %v5835_v19, %v5834_v40  ;;  %v5871_v52 = vrot.slane %v5870_v34, 1  ;;  %v5846_v57 = vadd.f32 %v5845_v48, %v5844_v59  ;;  %v5881_v62 = vrot.slane %v5880_v27, 4 }
 0x60f   : > { %v5865_v35 = vadd.f32 %v5864_v58, %v5863_v50  ;;  %v5887_v13 = vmul.f32 0.0625, %v5829_v9  ;;  %v5840_v55 = vrot.slane %v5839_v3, 2  ;;  %v5875_v47 = vadd.f32 %v5874_v22, %v5873_v23 }
 0x610   : > { %v5872_v12 = vadd.f32 %v5871_v52, %v5870_v34  ;;  %v5888_v6 = vmul.f32 0.0625, %v5836_v7  ;;  %v5847_v41 = vrot.slane %v5846_v57, 2  ;;  %v5882_v36 = vadd.f32 %v5881_v62, %v5880_v27  ;;  %v7312_v7 = vld [vmem:[#allocation11] sm:$0xff]  ;;  %v7314_v62 = vld [vmem:[#allocation11 + $0x8] sm:$0xff] }
 0x611   : > { %v5891_v10 = vmul.f32 0.0625, %v5865_v35  ;;  %v5895_v26 = vmul.f32 %v5887_v13, %v5887_v13  ;;  %v5907_v30 = vsub.f32 %v9252_v20, %v5887_v13  ;;  %v5909_v11 = vsub.f32 %v9256_v42, %v5887_v13  ;;  %v7315_v35 = vld [vmem:[#allocation11 + $0x18] sm:$0xff] }
 0x612   : > { %v5892_v28 = vmul.f32 0.0625, %v5872_v12  ;;  %v5896_v5 = vmul.f32 %v5888_v6, %v5888_v6  ;;  %v5908_v16 = vsub.f32 %v9254_v54, %v5888_v6  ;;  %v5910_v1 = vsub.f32 %v9258_v33, %v5888_v6 }
 0x613   : > { %v5899_v38 = vsub.f32 %v5891_v10, %v5895_v26  ;;  %v5841_v49 = vadd.f32 %v5840_v55, %v5839_v3  ;;  %v5876_v63 = vrot.slane %v5875_v47, 2  ;;  %v5848_v44 = vadd.f32 %v5847_v41, %v5846_v57  ;;  %v7313_v57 = vld [vmem:[#allocation11 + $0x10] sm:$0xff]  ;;  %v7316_v10 = vld [vmem:[#allocation11 + $0x20] sm:$0xff] }
 0x614   : > { %v5900_v24 = vsub.f32 %v5892_v28, %v5896_v5  ;;  %v5883_v8 = vrot.slane %v5882_v36, 2  ;;  %v7318_v28 = vld [vmem:[#allocation11 + $0x28] sm:$0xff] }
 0x615   : > { %v5903_v60 = vmax.f32 %v5899_v38, 0.0  ;;  %v5842_v61 = vrot.slane %v5841_v49, 1  ;;  %v5877_v25 = vadd.f32 %v5876_v63, %v5875_v47  ;;  %v5849_v14 = vrot.slane %v5848_v44, 1 }
 0x616   : > { %v5904_v53 = vmax.f32 %v5900_v24, 0.0  ;;  %v5884_v20 = vadd.f32 %v5883_v8, %v5882_v36 }
 0x617   : > { %v5915_v17 = vadd.f32 1e-05, %v5903_v60  ;;  %v5843_v42 = vadd.f32 %v5842_v61, %v5841_v49  ;;  %v5878_v51 = vrot.slane %v5877_v25, 1  ;;  %v5850_v29 = vadd.f32 %v5849_v14, %v5848_v44 }
 0x618   : > { %v5916_v18 = vadd.f32 1e-05, %v5904_v53  ;;  %v5885_v54 = vrot.slane %v5884_v20, 1 }
 0x619   : > { %7303 = vrsqrt.f32 %v5915_v17  ;;  %v5879_v33 = vadd.f32 %v5878_v51, %v5877_v25  ;;  %v5889_v21 = vmul.f32 0.0625, %v5843_v42  ;;  %v5890_v4 = vmul.f32 0.0625, %v5850_v29 }
 0x61a   : > { %7305 = vrsqrt.f32 %v5916_v18  ;;  %v5886_v46 = vadd.f32 %v5885_v54, %v5884_v20 }
 0x61b   : > { %v5893_v56 = vmul.f32 0.0625, %v5879_v33  ;;  %v5897_v15 = vmul.f32 %v5889_v21, %v5889_v21  ;;  %v5911_v40 = vsub.f32 %v9272_v32, %v5889_v21  ;;  %v5913_v43 = vsub.f32 %v9278_v37, %v5889_v21 }
 0x61c   : > { %v5894_v59 = vmul.f32 0.0625, %v5886_v46  ;;  %v5898_v31 = vmul.f32 %v5890_v4, %v5890_v4  ;;  %v5912_v0 = vsub.f32 %v9274_v45, %v5890_v4  ;;  %v5914_v50 = vsub.f32 %v9282_v2, %v5890_v4 }
 0x61d   : > { %v5901_v39 = vsub.f32 %v5893_v56, %v5897_v15 }
 0x61e   : > { %v5902_v23 = vsub.f32 %v5894_v59, %v5898_v31 }
 0x61f   : > { %v5905_v19 = vmax.f32 %v5901_v39, 0.0 }
 0x620   : > { %v5906_v34 = vmax.f32 %v5902_v23, 0.0 }
 0x621   : > { %v5917_v48 = vadd.f32 1e-05, %v5905_v19 }
 0x622   : > { %v5918_v27 = vadd.f32 1e-05, %v5906_v34 }
 0x623   : > { %v7304_v9 = vpop.eup %7303  ;;  %7307 = vrsqrt.f32 %v5917_v48 }
 0x624   : > { %v7306_v58 = vpop.eup %7305  ;;  %v5923_v3 = vmul.f32 %v7304_v9, %v5907_v30  ;;  %v5925_v22 = vmul.f32 %v7304_v9, %v5909_v11  ;;  %7309 = vrsqrt.f32 %v5918_v27  ;;  %v7317_v30 = vld [vmem:[#allocation11 + $0x30] sm:$0xff] }
 0x625   : > { %v5924_v32 = vmul.f32 %v7306_v58, %v5908_v16  ;;  %v5926_v37 = vmul.f32 %v7306_v58, %v5910_v1  ;;  %v7319_v16 = vld [vmem:[#allocation11 + $0x38] sm:$0xff] }
 0x626   : > { %v5931_v52 = vadd.f32 %v7312_v7, %v5923_v3  ;;  %v5933_v45 = vadd.f32 %v7313_v57, %v5925_v22 }
 0x627   : > { %v5932_v2 = vadd.f32 %v7314_v62, %v5924_v32  ;;  %v5934_v13 = vadd.f32 %v7315_v35, %v5926_v37 }
 0x628   : > { %5939 = vst [vmem:[#allocation11] sm:$0xff] %v5931_v52  ;;  %5941 = vst [vmem:[#allocation11 + $0x10] sm:$0xff] %v5933_v45 }
 0x629   : > { %5940 = vst [vmem:[#allocation11 + $0x8] sm:$0xff] %v5932_v2  ;;  %5942 = vst [vmem:[#allocation11 + $0x18] sm:$0xff] %v5934_v13 }
 0x62d   : > { %v7308_v55 = vpop.eup %7307 }
 0x62e   : > { %v7310_v47 = vpop.eup %7309  ;;  %v5927_v12 = vmul.f32 %v7308_v55, %v5911_v40  ;;  %v5929_v6 = vmul.f32 %v7308_v55, %v5913_v43 }
 0x62f   : > { %v5928_v41 = vmul.f32 %v7310_v47, %v5912_v0  ;;  %v5930_v36 = vmul.f32 %v7310_v47, %v5914_v50 }
 0x630   : > { %v5935_v26 = vadd.f32 %v7316_v10, %v5927_v12  ;;  %v5937_v11 = vadd.f32 %v7317_v30, %v5929_v6 }
 0x631   : > { %v5936_v5 = vadd.f32 %v7318_v28, %v5928_v41  ;;  %v5938_v1 = vadd.f32 %v7319_v16, %v5930_v36 }
 0x632   : > { %5943 = vst [vmem:[#allocation11 + $0x20] sm:$0xff] %v5935_v26  ;;  %5945 = vst [vmem:[#allocation11 + $0x30] sm:$0xff] %v5937_v11 }
 0x633   : > { %5944 = vst [vmem:[#allocation11 + $0x28] sm:$0xff] %v5936_v5  ;;  %5946 = vst [vmem:[#allocation11 + $0x38] sm:$0xff] %v5938_v1 }
 0x634   : > { %7481 = shalt.err (!%p7478_p0)
}
 0x635   : > { %s7482_s8 = scalar_lea.hbm %s9346_s5, 1024 }
 0x636   : > { %p7483_p2 = scmp.ne.s32.totalorder %s9346_s5, %s7482_s8  ;;  %p7488_p12 = scmp.lt.u32.totalorder %s7482_s8, %s9346_s5 }
 0x638   : > { %p7484_p1 = pnand %p7483_p2, %p6859_p5 }
 0x63a   : > { %p7485_p13 = pneg %p7484_p1 }
 0x63c   : > { %p7490_p6 = pnand %p7488_p12, %p7485_p13 }
 0x63e   : > { %7493 = shalt.err (!%p7490_p6)
}
 0x63f   : > { %s7570_s15 = smov 256   ;;  %s7571_s16 = smov 16  }
 0x640   : > { %6836 = dma.vmem_to_hbm [thread:$0]  (%p6859_p5), %s5958_s12, 1024, %s9346_s5, [#allocation4], %s7570_s15, %s7570_s15, %s7571_s16  }
 0x641   : > { %7531 = dma.done.wait (%p6859_p5), [#allocation4], 1024  }
 0x642   : > { %7533 = vsyncadd (%p6859_p5), [#allocation4], 4294966272 }
 0x643 PF: > { %s23_s23 = sadd.s32 1, %s7556_s23   ;;  %s9464_s10 = sld [smem:[#allocation17_spill]] }
 0x644   : > { %p20_p4 = scmp.ge.s32.totalorder %s23_s23, 8   ;;  %s9465_s11 = sld [smem:[#allocation16_spill]] }
 0x645   : > { %s9466_s18 = smov %s7540_s19  ;;  %s9467_s19 = smov %s7544_s20 }
 0x646   : > { %s9469_s21 = smov %s7552_s22  ;;  %22 = sbr.rel (!%p20_p4) target bundleno = 11 (0xb), region = 123 }
 0x649   : > { %s9468_s20 = smov %s9464_s10 }
 0x64a   : > { %s9470_s22 = smov %s9465_s11 }
 0x64d   :  { %5973 = vsyncpa [#allocation3], 1 }
 0x64e   :  { %5975 = vsyncpa [#allocation3 + $0x1], 1 }
 0x64f   :  { %5976 = vsyncpa [#allocation6], 1 }
 0x650   :  { %5978 = vsyncpa [#allocation6 + $0x1], 1 }
 0x651   :  { %5979 = vsyncpa [#allocation9], 1 }
 0x652   :  { %5981 = vsyncpa [#allocation9 + $0x1], 1 }
 0x653   :  { %5982 = vsyncpa [#allocation4], 1 }
 0x654   :  { %5984 = vsyncpa [#allocation4 + $0x1], 1 }

</bundles_post_ra>
